<compile_context>
chip_gen: v7x
topology: tpu7x:2x2x1
jax: 0.10.0
libtpu: 0.0.40
codegen_flags: <defaults>
</compile_context>

<pallas_src>
import functools

import jax
import jax.numpy as jnp
from jax import lax
from jax.experimental import pallas as pl
from jax.experimental.pallas import tpu as pltpu


def _round_up(v, m):
    return (v + m - 1) // m * m


# ---------------------------------------------------------------------------
# Fused double 3x3 conv + BN + ReLU kernel
# ---------------------------------------------------------------------------
def _make_kernel(B, C_in, C_mid, C_out, Wp, LEAD, LC, PF):
    TRAIL = PF - LEAD - LC

    def taps():
        for k in range(9):
            ky, kx = divmod(k, 3)
            yield k, (ky - 1) * Wp + (kx - 1)

    def kernel(x_ref, w1_ref, b1_ref, w2_ref, b2_ref, mask_ref, o_ref, v_ref):
        mask = mask_ref[...]          # (1, LC) f32, interior = 1, border/slack = 0
        b1 = b1_ref[...]              # (C_mid, 1) f32 BN1 shift
        b2 = b2_ref[...]              # (C_out, 1) f32 BN2 shift

        # Zero the slack strips of the intermediate frame once per step
        # (VMEM scratch is uninitialized per core; conv2 taps read Wp+1 lanes
        #  into them).  Both strips are 128-aligned, 128-multiple wide.
        v_ref[:, 0:LEAD] = jnp.zeros((C_mid, LEAD), v_ref.dtype)
        v_ref[:, LEAD + LC:PF] = jnp.zeros((C_mid, TRAIL), v_ref.dtype)

        for b in range(B):
            # ---- conv1: 3x3 (BN1 scale folded into w1) + shift + ReLU ------
            acc = jnp.zeros((C_mid, LC), jnp.float32)
            for k, off in taps():
                tap = x_ref[b, :, LEAD + off:LEAD + off + LC]       # (C_in, LC) bf16
                acc = acc + jnp.dot(w1_ref[k], tap,
                                    preferred_element_type=jnp.float32)
            y1 = jnp.maximum(acc + b1, 0.0) * mask                  # border -> 0
            # stage into the padded frame used by conv2 (lane-dense store)
            v_ref[:, LEAD:LEAD + LC] = y1.astype(v_ref.dtype)

            # ---- conv2: 3x3 (BN2 scale folded into w2) + shift + ReLU ------
            acc2 = jnp.zeros((C_out, LC), jnp.float32)
            for k, off in taps():
                tap = v_ref[:, LEAD + off:LEAD + off + LC]          # (C_mid, LC) bf16
                acc2 = acc2 + jnp.dot(w2_ref[k], tap,
                                      preferred_element_type=jnp.float32)
            y2 = jnp.maximum(acc2 + b2, 0.0) * mask
            o_ref[b] = y2.astype(o_ref.dtype)      # one full-row lane-dense store

    return kernel


def _pick_block_n(N, c_in, c_out, PF, LC):
    """Images per grid step: amortize per-step overhead, keep >=2 steps for
    megacore sharding, and stay within a conservative VMEM budget."""
    per_img = 2 * (c_in * PF * 2 + c_out * LC * 4)   # double-buffered in + out blocks
    cap_vmem = max(1, (20 * 1024 * 1024) // max(per_img, 1))
    cap_grid = max(1, N // 2) if N >= 2 else 1
    return int(max(1, min(8, cap_grid, cap_vmem)))


def double_conv_3x3(x_flat, w1, b1, w2, b2, mask, *, Wp, LEAD, LC, block_n):
    """x_flat: (N, C_in, PF) bf16, zero-bordered padded image at lane offset
    LEAD, zero slack >= Wp+1 on both sides.  w1: (9, C_mid, C_in) bf16 tap-major
    scale-folded weights, w2: (9, C_out, C_mid).  Returns (N, C_out, LC) f32
    containing the padded-coordinate frame of the second conv's output."""
    N, C_in, PF = x_flat.shape
    C_mid = w1.shape[1]
    C_out = w2.shape[1]
    B = block_n
    assert N % B == 0
    assert LEAD >= Wp + 1 and (PF - LEAD - LC) >= Wp + 1
    assert LEAD % 128 == 0 and LC % 128 == 0 and PF % 128 == 0

    kernel = _make_kernel(B, C_in, C_mid, C_out, Wp, LEAD, LC, PF)

    vmem_est = (2 * B * (C_in * PF * 2 + C_out * LC * 4)
                + C_mid * PF * 2 + 9 * (C_mid * C_in + C_out * C_mid) * 2
                + LC * 4 + (1 << 20))
    vmem_limit = int(min(48 * 1024 * 1024, max(16 * 1024 * 1024, 2 * vmem_est)))

    return pl.pallas_call(
        kernel,
        out_shape=jax.ShapeDtypeStruct((N, C_out, LC), jnp.float32),
        grid=(N // B,),
        in_specs=[
            pl.BlockSpec((B, C_in, PF), lambda n: (n, 0, 0)),
            pl.BlockSpec((9, C_mid, C_in), lambda n: (0, 0, 0)),   # grid-invariant
            pl.BlockSpec((C_mid, 1), lambda n: (0, 0)),
            pl.BlockSpec((9, C_out, C_mid), lambda n: (0, 0, 0)),
            pl.BlockSpec((C_out, 1), lambda n: (0, 0)),
            pl.BlockSpec((1, LC), lambda n: (0, 0)),
        ],
        out_specs=pl.BlockSpec((B, C_out, LC), lambda n: (n, 0, 0)),
        scratch_shapes=[pltpu.VMEM((C_mid, PF), jnp.bfloat16)],
        compiler_params=pltpu.CompilerParams(
            dimension_semantics=("parallel",),       # shard images over TCs (v7x)
            vmem_limit_bytes=vmem_limit),
    )(x_flat, w1, b1, w2, b2, mask)


# ---------------------------------------------------------------------------
# UpConv forward
# ---------------------------------------------------------------------------
def bn_fold(gamma, beta, mean, var, eps=1e-5):
    scale = gamma / jnp.sqrt(var + eps)
    shift = beta - mean * scale
    return scale.astype(jnp.float32), shift.astype(jnp.float32)


@functools.partial(jax.jit, static_argnums=(2,))
def upconv_forward(x, params, scale_factor):
    """x: (N, C_in, H, W) NCHW  ->  (N, C_out, H*s, W*s) NCHW."""
    N, C_in, H, W = x.shape
    H2, W2 = H * scale_factor, W * scale_factor
    Hp, Wp = H2 + 2, W2 + 2
    Lp = Hp * Wp
    LC = _round_up(Lp, 128)                  # lane-aligned compute/output width
    LEAD = _round_up(Wp + 1, 128)            # leading/trailing zero slack
    PF = LEAD + LC + LEAD
    C_mid = params["w1"].shape[0]
    C_out = params["w2"].shape[0]
    CPi, CPm, CPo = (_round_up(c, 8) for c in (C_in, C_mid, C_out))

    s0, b0 = bn_fold(*params["bn0"])
    s1, b1 = bn_fold(*params["bn1"])
    s2, b2 = bn_fold(*params["bn2"])

    # 1x1 conv + BN0 at LOW resolution (pointwise, commutes exactly with
    # nearest upsample) — tiny, fuses into the upsample/pad glue under XLA.
    v = jnp.einsum("oc,nchw->nohw", params["w0"], x,
                   precision=lax.Precision.HIGHEST)
    v = v * s0[None, :, None, None] + b0[None, :, None, None]

    # nearest upsample, zero pad, channel-pad, flatten into the slacked frame
    xu = jnp.broadcast_to(v[:, :, :, None, :, None],
                          (N, C_in, H, scale_factor, W, scale_factor))
    xu = xu.reshape(N, C_in, H2, W2)
    xp = jnp.pad(xu, ((0, 0), (0, CPi - C_in), (1, 1), (1, 1))).reshape(N, CPi, Lp)
    xf = jnp.pad(xp, ((0, 0), (0, 0), (LEAD, PF - LEAD - Lp))).astype(jnp.bfloat16)

    # BN scales folded into 3x3 weights; tap-major (9, C_out_pad, C_in_pad) bf16
    def fold3x3(w, s, co_pad, ci_pad):
        co, ci = w.shape[:2]
        wf = (w * s[:, None, None, None]).transpose(2, 3, 0, 1)   # (Ky,Kx,O,I)
        wf = jnp.pad(wf, ((0, 0), (0, 0), (0, co_pad - co), (0, ci_pad - ci)))
        return wf.reshape(9, co_pad, ci_pad).astype(jnp.bfloat16)

    w1f = fold3x3(params["w1"], s1, CPm, CPi)
    w2f = fold3x3(params["w2"], s2, CPo, CPm)
    b1f = jnp.pad(b1, (0, CPm - C_mid)).reshape(CPm, 1).astype(jnp.float32)
    b2f = jnp.pad(b2, (0, CPo - C_out)).reshape(CPo, 1).astype(jnp.float32)

    # interior mask over the compute window, precomputed once (grid-invariant)
    p = jnp.arange(LC, dtype=jnp.int32)
    hh, ww = p // Wp, p % Wp
    mask = (((hh >= 1) & (hh <= H2) & (ww >= 1) & (ww <= W2))
            .astype(jnp.float32).reshape(1, LC))

    B = _pick_block_n(N, CPi, CPo, PF, LC)
    Npad = _round_up(N, B)
    if Npad != N:
        xf = jnp.pad(xf, ((0, Npad - N), (0, 0), (0, 0)))

    out = double_conv_3x3(xf, w1f, b1f, w2f, b2f, mask,
                          Wp=Wp, LEAD=LEAD, LC=LC, block_n=B)

    out = out[:N, :C_out, :Lp].reshape(N, C_out, Hp, Wp)
    return out[:, :, 1:1 + H2, 1:1 + W2]


# ---------------------------------------------------------------------------
# Pure-JAX reference (exact f32 semantics of the PyTorch module, eval mode)
# ---------------------------------------------------------------------------
@functools.partial(jax.jit, static_argnums=(2,))
def upconv_reference(x, params, scale_factor):
    HIGH = lax.Precision.HIGHEST
    s0, b0 = bn_fold(*params["bn0"])
    y = jnp.einsum("oc,nchw->nohw", params["w0"], x, precision=HIGH)
    y = y * s0[None, :, None, None] + b0[None, :, None, None]
    N, C, H, W = y.shape
    y = jnp.broadcast_to(y[:, :, :, None, :, None],
                         (N, C, H, scale_factor, W, scale_factor))
    y = y.reshape(N, C, H * scale_factor, W * scale_factor)

    def conv_bn_relu(z, w, s, b):
        zc = lax.conv_general_dilated(
            z, w, (1, 1), "SAME",
            dimension_numbers=("NCHW", "OIHW", "NCHW"), precision=HIGH)
        return jnp.maximum(zc * s[None, :, None, None]
                           + b[None, :, None, None], 0.0)

    s1, b1 = bn_fold(*params["bn1"])
    y = conv_bn_relu(y, params["w1"], s1, b1)
    s2, b2 = bn_fold(*params["bn2"])
    y = conv_bn_relu(y, params["w2"], s2, b2)
    return y


# ---------------------------------------------------------------------------
if __name__ == "__main__":
    key = jax.random.PRNGKey(0)
    ks = jax.random.split(key, 10)

    # UpConv(in_channels=4, out_channels=8, scale_factor=2), mid = out = 8
    N, C_in, H, W = 2, 4, 16, 16
    C_out = 8
    C_mid = C_out
    scale_factor = 2

    def bn_params(k, c):
        k1, k2, k3, k4 = jax.random.split(k, 4)
        gamma = jax.random.uniform(k1, (c,), jnp.float32, 0.5, 1.5)
        beta = jax.random.normal(k2, (c,), jnp.float32) * 0.1
        mean = jax.random.normal(k3, (c,), jnp.float32) * 0.1
        var = jax.random.uniform(k4, (c,), jnp.float32, 0.5, 1.5)
        return (gamma, beta, mean, var)

    params = {
        # fuse_layers: Conv2d(C_in, C_in, 1, bias=False) weight, [cout, cin]
        "w0": jax.random.normal(ks[0], (C_in, C_in), jnp.float32) * 0.3,
        "bn0": bn_params(ks[1], C_in),
        # double_conv conv1: Conv2d(C_in, C_mid, 3, padding=1, bias=False), OIHW
        "w1": jax.random.normal(ks[2], (C_mid, C_in, 3, 3), jnp.float32) * 0.3,
        "bn1": bn_params(ks[3], C_mid),
        # double_conv conv2: Conv2d(C_mid, C_out, 3, padding=1, bias=False), OIHW
        "w2": jax.random.normal(ks[4], (C_out, C_mid, 3, 3), jnp.float32) * 0.3,
        "bn2": bn_params(ks[5], C_out),
    }

    x = jax.random.normal(ks[6], (N, C_in, H, W), jnp.float32)

    out = jax.block_until_ready(upconv_forward(x, params, scale_factor))
    ref = jax.block_until_ready(upconv_reference(x, params, scale_factor))

    assert out.shape == (N, C_out, H * scale_factor, W * scale_factor), out.shape
    max_err = float(jnp.max(jnp.abs(out - ref)))
    # bf16 MXU feed with f32 accumulation: tolerance relaxed vs. the f32 ref.
    assert jnp.allclose(out, ref, rtol=5e-2, atol=1.5e-1), max_err

    print("KERNEL_OK")
</pallas_src>

<mosaic_0001>
module attributes {stable_mosaic.version = 11 : i64} {
  func.func @kernel(%arg0: i32, %arg1: memref<1x8x1536xbf16, #tpu.memory_space<vmem>>, %arg2: memref<9x8x8xbf16, #tpu.memory_space<vmem>>, %arg3: memref<8x1xf32, #tpu.memory_space<vmem>>, %arg4: memref<9x8x8xbf16, #tpu.memory_space<vmem>>, %arg5: memref<8x1xf32, #tpu.memory_space<vmem>>, %arg6: memref<1x1280xf32, #tpu.memory_space<vmem>>, %arg7: memref<1x8x1280xf32, #tpu.memory_space<vmem>>, %arg8: memref<8x1536xbf16, #tpu.memory_space<vmem>>) attributes {dimension_semantics = [#tpu.dimension_semantics<parallel>], iteration_bounds = array<i64: 2>, scalar_prefetch = 0 : i64, scratch_operands = 1 : i64, tpu.core_type = #tpu.core_type<tc>, window_params = [{transform_indices = @transform_0, window_bounds = array<i64: 1, 8, 1536>}, {pipeline_mode = #tpu.pipeline_mode<synchronous>, transform_indices = @transform_1, window_bounds = array<i64: 9, 8, 8>}, {pipeline_mode = #tpu.pipeline_mode<synchronous>, transform_indices = @transform_2, window_bounds = array<i64: 8, 1>}, {pipeline_mode = #tpu.pipeline_mode<synchronous>, transform_indices = @transform_3, window_bounds = array<i64: 9, 8, 8>}, {pipeline_mode = #tpu.pipeline_mode<synchronous>, transform_indices = @transform_4, window_bounds = array<i64: 8, 1>}, {pipeline_mode = #tpu.pipeline_mode<synchronous>, transform_indices = @transform_5, window_bounds = array<i64: 1, 1280>}, {transform_indices = @transform_6, window_bounds = array<i64: 1, 8, 1280>}]} {
    %c0 = arith.constant 0 : index
    %c0_0 = arith.constant 0 : index
    %0 = vector.load %arg6[%c0, %c0_0] : memref<1x1280xf32, #tpu.memory_space<vmem>>, vector<1x1280xf32>
    %c0_1 = arith.constant 0 : index
    %c0_2 = arith.constant 0 : index
    %1 = vector.load %arg3[%c0_1, %c0_2] : memref<8x1xf32, #tpu.memory_space<vmem>>, vector<8x1xf32>
    %c0_3 = arith.constant 0 : index
    %c0_4 = arith.constant 0 : index
    %2 = vector.load %arg5[%c0_3, %c0_4] : memref<8x1xf32, #tpu.memory_space<vmem>>, vector<8x1xf32>
    %cst = arith.constant 0.000000e+00 : bf16
    %3 = vector.broadcast %cst : bf16 to vector<8x128xbf16>
    %c0_5 = arith.constant 0 : index
    %c0_6 = arith.constant 0 : index
    %4 = vector.load %arg8[%c0_5, %c0_6] : memref<8x1536xbf16, #tpu.memory_space<vmem>>, vector<8x128xbf16>
    tpu.vector_store %arg8[%c0_5, %c0_6], %3 {strides = array<i32>} : memref<8x1536xbf16, #tpu.memory_space<vmem>>, vector<8x128xbf16>,
    %cst_7 = arith.constant 0.000000e+00 : bf16
    %5 = vector.broadcast %cst_7 : bf16 to vector<8x128xbf16>
    %c0_8 = arith.constant 0 : index
    %c1408 = arith.constant 1408 : index
    %6 = vector.load %arg8[%c0_8, %c1408] : memref<8x1536xbf16, #tpu.memory_space<vmem>>, vector<8x128xbf16>
    tpu.vector_store %arg8[%c0_8, %c1408], %5 {strides = array<i32>} : memref<8x1536xbf16, #tpu.memory_space<vmem>>, vector<8x128xbf16>,
    %cst_9 = arith.constant 0.000000e+00 : f32
    %7 = vector.broadcast %cst_9 : f32 to vector<8x1280xf32>
    %c0_10 = arith.constant 0 : index
    %c0_11 = arith.constant 0 : index
    %c93 = arith.constant 93 : index
    %8 = vector.load %arg1[%c0_10, %c0_11, %c93] : memref<1x8x1536xbf16, #tpu.memory_space<vmem>>, vector<1x8x1280xbf16>
    %9 = vector.shape_cast %8 : vector<1x8x1280xbf16> to vector<8x1280xbf16>
    %c0_12 = arith.constant 0 : index
    %c0_13 = arith.constant 0 : index
    %c0_14 = arith.constant 0 : index
    %10 = vector.load %arg2[%c0_12, %c0_13, %c0_14] : memref<9x8x8xbf16, #tpu.memory_space<vmem>>, vector<1x8x8xbf16>
    %11 = vector.shape_cast %10 : vector<1x8x8xbf16> to vector<8x8xbf16>
    %cst_15 = arith.constant dense<0.000000e+00> : vector<8x1280xf32>
    %12 = tpu.matmul %11, %9, %cst_15 {dimension_numbers = #tpu.dot_dimension_numbers<[1], [0], [0], [1], [0, 0, 1, 1], [], []>} : vector<8x8xbf16>, vector<8x1280xbf16>, vector<8x1280xf32> -> vector<8x1280xf32>
    %13 = arith.addf %7, %12 : vector<8x1280xf32>
    %c0_16 = arith.constant 0 : index
    %c0_17 = arith.constant 0 : index
    %c94 = arith.constant 94 : index
    %14 = vector.load %arg1[%c0_16, %c0_17, %c94] : memref<1x8x1536xbf16, #tpu.memory_space<vmem>>, vector<1x8x1280xbf16>
    %15 = vector.shape_cast %14 : vector<1x8x1280xbf16> to vector<8x1280xbf16>
    %c1 = arith.constant 1 : index
    %c0_18 = arith.constant 0 : index
    %c0_19 = arith.constant 0 : index
    %16 = vector.load %arg2[%c1, %c0_18, %c0_19] : memref<9x8x8xbf16, #tpu.memory_space<vmem>>, vector<1x8x8xbf16>
    %17 = vector.shape_cast %16 : vector<1x8x8xbf16> to vector<8x8xbf16>
    %cst_20 = arith.constant dense<0.000000e+00> : vector<8x1280xf32>
    %18 = tpu.matmul %17, %15, %cst_20 {dimension_numbers = #tpu.dot_dimension_numbers<[1], [0], [0], [1], [0, 0, 1, 1], [], []>} : vector<8x8xbf16>, vector<8x1280xbf16>, vector<8x1280xf32> -> vector<8x1280xf32>
    %19 = arith.addf %13, %18 : vector<8x1280xf32>
    %c0_21 = arith.constant 0 : index
    %c0_22 = arith.constant 0 : index
    %c95 = arith.constant 95 : index
    %20 = vector.load %arg1[%c0_21, %c0_22, %c95] : memref<1x8x1536xbf16, #tpu.memory_space<vmem>>, vector<1x8x1280xbf16>
    %21 = vector.shape_cast %20 : vector<1x8x1280xbf16> to vector<8x1280xbf16>
    %c2 = arith.constant 2 : index
    %c0_23 = arith.constant 0 : index
    %c0_24 = arith.constant 0 : index
    %22 = vector.load %arg2[%c2, %c0_23, %c0_24] : memref<9x8x8xbf16, #tpu.memory_space<vmem>>, vector<1x8x8xbf16>
    %23 = vector.shape_cast %22 : vector<1x8x8xbf16> to vector<8x8xbf16>
    %cst_25 = arith.constant dense<0.000000e+00> : vector<8x1280xf32>
    %24 = tpu.matmul %23, %21, %cst_25 {dimension_numbers = #tpu.dot_dimension_numbers<[1], [0], [0], [1], [0, 0, 1, 1], [], []>} : vector<8x8xbf16>, vector<8x1280xbf16>, vector<8x1280xf32> -> vector<8x1280xf32>
    %25 = arith.addf %19, %24 : vector<8x1280xf32>
    %c0_26 = arith.constant 0 : index
    %c0_27 = arith.constant 0 : index
    %c127 = arith.constant 127 : index
    %26 = vector.load %arg1[%c0_26, %c0_27, %c127] : memref<1x8x1536xbf16, #tpu.memory_space<vmem>>, vector<1x8x1280xbf16>
    %27 = vector.shape_cast %26 : vector<1x8x1280xbf16> to vector<8x1280xbf16>
    %c3 = arith.constant 3 : index
    %c0_28 = arith.constant 0 : index
    %c0_29 = arith.constant 0 : index
    %28 = vector.load %arg2[%c3, %c0_28, %c0_29] : memref<9x8x8xbf16, #tpu.memory_space<vmem>>, vector<1x8x8xbf16>
    %29 = vector.shape_cast %28 : vector<1x8x8xbf16> to vector<8x8xbf16>
    %cst_30 = arith.constant dense<0.000000e+00> : vector<8x1280xf32>
    %30 = tpu.matmul %29, %27, %cst_30 {dimension_numbers = #tpu.dot_dimension_numbers<[1], [0], [0], [1], [0, 0, 1, 1], [], []>} : vector<8x8xbf16>, vector<8x1280xbf16>, vector<8x1280xf32> -> vector<8x1280xf32>
    %31 = arith.addf %25, %30 : vector<8x1280xf32>
    %c0_31 = arith.constant 0 : index
    %c0_32 = arith.constant 0 : index
    %c128 = arith.constant 128 : index
    %32 = vector.load %arg1[%c0_31, %c0_32, %c128] : memref<1x8x1536xbf16, #tpu.memory_space<vmem>>, vector<1x8x1280xbf16>
    %33 = vector.shape_cast %32 : vector<1x8x1280xbf16> to vector<8x1280xbf16>
    %c4 = arith.constant 4 : index
    %c0_33 = arith.constant 0 : index
    %c0_34 = arith.constant 0 : index
    %34 = vector.load %arg2[%c4, %c0_33, %c0_34] : memref<9x8x8xbf16, #tpu.memory_space<vmem>>, vector<1x8x8xbf16>
    %35 = vector.shape_cast %34 : vector<1x8x8xbf16> to vector<8x8xbf16>
    %cst_35 = arith.constant dense<0.000000e+00> : vector<8x1280xf32>
    %36 = tpu.matmul %35, %33, %cst_35 {dimension_numbers = #tpu.dot_dimension_numbers<[1], [0], [0], [1], [0, 0, 1, 1], [], []>} : vector<8x8xbf16>, vector<8x1280xbf16>, vector<8x1280xf32> -> vector<8x1280xf32>
    %37 = arith.addf %31, %36 : vector<8x1280xf32>
    %c0_36 = arith.constant 0 : index
    %c0_37 = arith.constant 0 : index
    %c129 = arith.constant 129 : index
    %38 = vector.load %arg1[%c0_36, %c0_37, %c129] : memref<1x8x1536xbf16, #tpu.memory_space<vmem>>, vector<1x8x1280xbf16>
    %39 = vector.shape_cast %38 : vector<1x8x1280xbf16> to vector<8x1280xbf16>
    %c5 = arith.constant 5 : index
    %c0_38 = arith.constant 0 : index
    %c0_39 = arith.constant 0 : index
    %40 = vector.load %arg2[%c5, %c0_38, %c0_39] : memref<9x8x8xbf16, #tpu.memory_space<vmem>>, vector<1x8x8xbf16>
    %41 = vector.shape_cast %40 : vector<1x8x8xbf16> to vector<8x8xbf16>
    %cst_40 = arith.constant dense<0.000000e+00> : vector<8x1280xf32>
    %42 = tpu.matmul %41, %39, %cst_40 {dimension_numbers = #tpu.dot_dimension_numbers<[1], [0], [0], [1], [0, 0, 1, 1], [], []>} : vector<8x8xbf16>, vector<8x1280xbf16>, vector<8x1280xf32> -> vector<8x1280xf32>
    %43 = arith.addf %37, %42 : vector<8x1280xf32>
    %c0_41 = arith.constant 0 : index
    %c0_42 = arith.constant 0 : index
    %c161 = arith.constant 161 : index
    %44 = vector.load %arg1[%c0_41, %c0_42, %c161] : memref<1x8x1536xbf16, #tpu.memory_space<vmem>>, vector<1x8x1280xbf16>
    %45 = vector.shape_cast %44 : vector<1x8x1280xbf16> to vector<8x1280xbf16>
    %c6 = arith.constant 6 : index
    %c0_43 = arith.constant 0 : index
    %c0_44 = arith.constant 0 : index
    %46 = vector.load %arg2[%c6, %c0_43, %c0_44] : memref<9x8x8xbf16, #tpu.memory_space<vmem>>, vector<1x8x8xbf16>
    %47 = vector.shape_cast %46 : vector<1x8x8xbf16> to vector<8x8xbf16>
    %cst_45 = arith.constant dense<0.000000e+00> : vector<8x1280xf32>
    %48 = tpu.matmul %47, %45, %cst_45 {dimension_numbers = #tpu.dot_dimension_numbers<[1], [0], [0], [1], [0, 0, 1, 1], [], []>} : vector<8x8xbf16>, vector<8x1280xbf16>, vector<8x1280xf32> -> vector<8x1280xf32>
    %49 = arith.addf %43, %48 : vector<8x1280xf32>
    %c0_46 = arith.constant 0 : index
    %c0_47 = arith.constant 0 : index
    %c162 = arith.constant 162 : index
    %50 = vector.load %arg1[%c0_46, %c0_47, %c162] : memref<1x8x1536xbf16, #tpu.memory_space<vmem>>, vector<1x8x1280xbf16>
    %51 = vector.shape_cast %50 : vector<1x8x1280xbf16> to vector<8x1280xbf16>
    %c7 = arith.constant 7 : index
    %c0_48 = arith.constant 0 : index
    %c0_49 = arith.constant 0 : index
    %52 = vector.load %arg2[%c7, %c0_48, %c0_49] : memref<9x8x8xbf16, #tpu.memory_space<vmem>>, vector<1x8x8xbf16>
    %53 = vector.shape_cast %52 : vector<1x8x8xbf16> to vector<8x8xbf16>
    %cst_50 = arith.constant dense<0.000000e+00> : vector<8x1280xf32>
    %54 = tpu.matmul %53, %51, %cst_50 {dimension_numbers = #tpu.dot_dimension_numbers<[1], [0], [0], [1], [0, 0, 1, 1], [], []>} : vector<8x8xbf16>, vector<8x1280xbf16>, vector<8x1280xf32> -> vector<8x1280xf32>
    %55 = arith.addf %49, %54 : vector<8x1280xf32>
    %c0_51 = arith.constant 0 : index
    %c0_52 = arith.constant 0 : index
    %c163 = arith.constant 163 : index
    %56 = vector.load %arg1[%c0_51, %c0_52, %c163] : memref<1x8x1536xbf16, #tpu.memory_space<vmem>>, vector<1x8x1280xbf16>
    %57 = vector.shape_cast %56 : vector<1x8x1280xbf16> to vector<8x1280xbf16>
    %c8 = arith.constant 8 : index
    %c0_53 = arith.constant 0 : index
    %c0_54 = arith.constant 0 : index
    %58 = vector.load %arg2[%c8, %c0_53, %c0_54] : memref<9x8x8xbf16, #tpu.memory_space<vmem>>, vector<1x8x8xbf16>
    %59 = vector.shape_cast %58 : vector<1x8x8xbf16> to vector<8x8xbf16>
    %cst_55 = arith.constant dense<0.000000e+00> : vector<8x1280xf32>
    %60 = tpu.matmul %59, %57, %cst_55 {dimension_numbers = #tpu.dot_dimension_numbers<[1], [0], [0], [1], [0, 0, 1, 1], [], []>} : vector<8x8xbf16>, vector<8x1280xbf16>, vector<8x1280xf32> -> vector<8x1280xf32>
    %61 = arith.addf %55, %60 : vector<8x1280xf32>
    %62 = vector.broadcast %1 : vector<8x1xf32> to vector<8x1280xf32>
    %63 = arith.addf %61, %62 : vector<8x1280xf32>
    %cst_56 = arith.constant 0.000000e+00 : f32
    %64 = vector.broadcast %cst_56 : f32 to vector<8x1280xf32>
    %65 = arith.maximumf %63, %64 : vector<8x1280xf32>
    %66 = vector.broadcast %0 : vector<1x1280xf32> to vector<8x1280xf32>
    %67 = arith.mulf %65, %66 : vector<8x1280xf32>
    %68 = arith.truncf %67 : vector<8x1280xf32> to vector<8x1280xbf16>
    %c0_57 = arith.constant 0 : index
    %c128_58 = arith.constant 128 : index
    %69 = vector.load %arg8[%c0_57, %c128_58] : memref<8x1536xbf16, #tpu.memory_space<vmem>>, vector<8x1280xbf16>
    tpu.vector_store %arg8[%c0_57, %c128_58], %68 {strides = array<i32>} : memref<8x1536xbf16, #tpu.memory_space<vmem>>, vector<8x1280xbf16>,
    %cst_59 = arith.constant 0.000000e+00 : f32
    %70 = vector.broadcast %cst_59 : f32 to vector<8x1280xf32>
    %c0_60 = arith.constant 0 : index
    %c93_61 = arith.constant 93 : index
    %71 = vector.load %arg8[%c0_60, %c93_61] : memref<8x1536xbf16, #tpu.memory_space<vmem>>, vector<8x1280xbf16>
    %c0_62 = arith.constant 0 : index
    %c0_63 = arith.constant 0 : index
    %c0_64 = arith.constant 0 : index
    %72 = vector.load %arg4[%c0_62, %c0_63, %c0_64] : memref<9x8x8xbf16, #tpu.memory_space<vmem>>, vector<1x8x8xbf16>
    %73 = vector.shape_cast %72 : vector<1x8x8xbf16> to vector<8x8xbf16>
    %cst_65 = arith.constant dense<0.000000e+00> : vector<8x1280xf32>
    %74 = tpu.matmul %73, %71, %cst_65 {dimension_numbers = #tpu.dot_dimension_numbers<[1], [0], [0], [1], [0, 0, 1, 1], [], []>} : vector<8x8xbf16>, vector<8x1280xbf16>, vector<8x1280xf32> -> vector<8x1280xf32>
    %75 = arith.addf %70, %74 : vector<8x1280xf32>
    %c0_66 = arith.constant 0 : index
    %c94_67 = arith.constant 94 : index
    %76 = vector.load %arg8[%c0_66, %c94_67] : memref<8x1536xbf16, #tpu.memory_space<vmem>>, vector<8x1280xbf16>
    %c1_68 = arith.constant 1 : index
    %c0_69 = arith.constant 0 : index
    %c0_70 = arith.constant 0 : index
    %77 = vector.load %arg4[%c1_68, %c0_69, %c0_70] : memref<9x8x8xbf16, #tpu.memory_space<vmem>>, vector<1x8x8xbf16>
    %78 = vector.shape_cast %77 : vector<1x8x8xbf16> to vector<8x8xbf16>
    %cst_71 = arith.constant dense<0.000000e+00> : vector<8x1280xf32>
    %79 = tpu.matmul %78, %76, %cst_71 {dimension_numbers = #tpu.dot_dimension_numbers<[1], [0], [0], [1], [0, 0, 1, 1], [], []>} : vector<8x8xbf16>, vector<8x1280xbf16>, vector<8x1280xf32> -> vector<8x1280xf32>
    %80 = arith.addf %75, %79 : vector<8x1280xf32>
    %c0_72 = arith.constant 0 : index
    %c95_73 = arith.constant 95 : index
    %81 = vector.load %arg8[%c0_72, %c95_73] : memref<8x1536xbf16, #tpu.memory_space<vmem>>, vector<8x1280xbf16>
    %c2_74 = arith.constant 2 : index
    %c0_75 = arith.constant 0 : index
    %c0_76 = arith.constant 0 : index
    %82 = vector.load %arg4[%c2_74, %c0_75, %c0_76] : memref<9x8x8xbf16, #tpu.memory_space<vmem>>, vector<1x8x8xbf16>
    %83 = vector.shape_cast %82 : vector<1x8x8xbf16> to vector<8x8xbf16>
    %cst_77 = arith.constant dense<0.000000e+00> : vector<8x1280xf32>
    %84 = tpu.matmul %83, %81, %cst_77 {dimension_numbers = #tpu.dot_dimension_numbers<[1], [0], [0], [1], [0, 0, 1, 1], [], []>} : vector<8x8xbf16>, vector<8x1280xbf16>, vector<8x1280xf32> -> vector<8x1280xf32>
    %85 = arith.addf %80, %84 : vector<8x1280xf32>
    %c0_78 = arith.constant 0 : index
    %c127_79 = arith.constant 127 : index
    %86 = vector.load %arg8[%c0_78, %c127_79] : memref<8x1536xbf16, #tpu.memory_space<vmem>>, vector<8x1280xbf16>
    %c3_80 = arith.constant 3 : index
    %c0_81 = arith.constant 0 : index
    %c0_82 = arith.constant 0 : index
    %87 = vector.load %arg4[%c3_80, %c0_81, %c0_82] : memref<9x8x8xbf16, #tpu.memory_space<vmem>>, vector<1x8x8xbf16>
    %88 = vector.shape_cast %87 : vector<1x8x8xbf16> to vector<8x8xbf16>
    %cst_83 = arith.constant dense<0.000000e+00> : vector<8x1280xf32>
    %89 = tpu.matmul %88, %86, %cst_83 {dimension_numbers = #tpu.dot_dimension_numbers<[1], [0], [0], [1], [0, 0, 1, 1], [], []>} : vector<8x8xbf16>, vector<8x1280xbf16>, vector<8x1280xf32> -> vector<8x1280xf32>
    %90 = arith.addf %85, %89 : vector<8x1280xf32>
    %c0_84 = arith.constant 0 : index
    %c128_85 = arith.constant 128 : index
    %91 = vector.load %arg8[%c0_84, %c128_85] : memref<8x1536xbf16, #tpu.memory_space<vmem>>, vector<8x1280xbf16>
    %c4_86 = arith.constant 4 : index
    %c0_87 = arith.constant 0 : index
    %c0_88 = arith.constant 0 : index
    %92 = vector.load %arg4[%c4_86, %c0_87, %c0_88] : memref<9x8x8xbf16, #tpu.memory_space<vmem>>, vector<1x8x8xbf16>
    %93 = vector.shape_cast %92 : vector<1x8x8xbf16> to vector<8x8xbf16>
    %cst_89 = arith.constant dense<0.000000e+00> : vector<8x1280xf32>
    %94 = tpu.matmul %93, %91, %cst_89 {dimension_numbers = #tpu.dot_dimension_numbers<[1], [0], [0], [1], [0, 0, 1, 1], [], []>} : vector<8x8xbf16>, vector<8x1280xbf16>, vector<8x1280xf32> -> vector<8x1280xf32>
    %95 = arith.addf %90, %94 : vector<8x1280xf32>
    %c0_90 = arith.constant 0 : index
    %c129_91 = arith.constant 129 : index
    %96 = vector.load %arg8[%c0_90, %c129_91] : memref<8x1536xbf16, #tpu.memory_space<vmem>>, vector<8x1280xbf16>
    %c5_92 = arith.constant 5 : index
    %c0_93 = arith.constant 0 : index
    %c0_94 = arith.constant 0 : index
    %97 = vector.load %arg4[%c5_92, %c0_93, %c0_94] : memref<9x8x8xbf16, #tpu.memory_space<vmem>>, vector<1x8x8xbf16>
    %98 = vector.shape_cast %97 : vector<1x8x8xbf16> to vector<8x8xbf16>
    %cst_95 = arith.constant dense<0.000000e+00> : vector<8x1280xf32>
    %99 = tpu.matmul %98, %96, %cst_95 {dimension_numbers = #tpu.dot_dimension_numbers<[1], [0], [0], [1], [0, 0, 1, 1], [], []>} : vector<8x8xbf16>, vector<8x1280xbf16>, vector<8x1280xf32> -> vector<8x1280xf32>
    %100 = arith.addf %95, %99 : vector<8x1280xf32>
    %c0_96 = arith.constant 0 : index
    %c161_97 = arith.constant 161 : index
    %101 = vector.load %arg8[%c0_96, %c161_97] : memref<8x1536xbf16, #tpu.memory_space<vmem>>, vector<8x1280xbf16>
    %c6_98 = arith.constant 6 : index
    %c0_99 = arith.constant 0 : index
    %c0_100 = arith.constant 0 : index
    %102 = vector.load %arg4[%c6_98, %c0_99, %c0_100] : memref<9x8x8xbf16, #tpu.memory_space<vmem>>, vector<1x8x8xbf16>
    %103 = vector.shape_cast %102 : vector<1x8x8xbf16> to vector<8x8xbf16>
    %cst_101 = arith.constant dense<0.000000e+00> : vector<8x1280xf32>
    %104 = tpu.matmul %103, %101, %cst_101 {dimension_numbers = #tpu.dot_dimension_numbers<[1], [0], [0], [1], [0, 0, 1, 1], [], []>} : vector<8x8xbf16>, vector<8x1280xbf16>, vector<8x1280xf32> -> vector<8x1280xf32>
    %105 = arith.addf %100, %104 : vector<8x1280xf32>
    %c0_102 = arith.constant 0 : index
    %c162_103 = arith.constant 162 : index
    %106 = vector.load %arg8[%c0_102, %c162_103] : memref<8x1536xbf16, #tpu.memory_space<vmem>>, vector<8x1280xbf16>
    %c7_104 = arith.constant 7 : index
    %c0_105 = arith.constant 0 : index
    %c0_106 = arith.constant 0 : index
    %107 = vector.load %arg4[%c7_104, %c0_105, %c0_106] : memref<9x8x8xbf16, #tpu.memory_space<vmem>>, vector<1x8x8xbf16>
    %108 = vector.shape_cast %107 : vector<1x8x8xbf16> to vector<8x8xbf16>
    %cst_107 = arith.constant dense<0.000000e+00> : vector<8x1280xf32>
    %109 = tpu.matmul %108, %106, %cst_107 {dimension_numbers = #tpu.dot_dimension_numbers<[1], [0], [0], [1], [0, 0, 1, 1], [], []>} : vector<8x8xbf16>, vector<8x1280xbf16>, vector<8x1280xf32> -> vector<8x1280xf32>
    %110 = arith.addf %105, %109 : vector<8x1280xf32>
    %c0_108 = arith.constant 0 : index
    %c163_109 = arith.constant 163 : index
    %111 = vector.load %arg8[%c0_108, %c163_109] : memref<8x1536xbf16, #tpu.memory_space<vmem>>, vector<8x1280xbf16>
    %c8_110 = arith.constant 8 : index
    %c0_111 = arith.constant 0 : index
    %c0_112 = arith.constant 0 : index
    %112 = vector.load %arg4[%c8_110, %c0_111, %c0_112] : memref<9x8x8xbf16, #tpu.memory_space<vmem>>, vector<1x8x8xbf16>
    %113 = vector.shape_cast %112 : vector<1x8x8xbf16> to vector<8x8xbf16>
    %cst_113 = arith.constant dense<0.000000e+00> : vector<8x1280xf32>
    %114 = tpu.matmul %113, %111, %cst_113 {dimension_numbers = #tpu.dot_dimension_numbers<[1], [0], [0], [1], [0, 0, 1, 1], [], []>} : vector<8x8xbf16>, vector<8x1280xbf16>, vector<8x1280xf32> -> vector<8x1280xf32>
    %115 = arith.addf %110, %114 : vector<8x1280xf32>
    %116 = vector.broadcast %2 : vector<8x1xf32> to vector<8x1280xf32>
    %117 = arith.addf %115, %116 : vector<8x1280xf32>
    %cst_114 = arith.constant 0.000000e+00 : f32
    %118 = vector.broadcast %cst_114 : f32 to vector<8x1280xf32>
    %119 = arith.maximumf %117, %118 : vector<8x1280xf32>
    %120 = vector.broadcast %0 : vector<1x1280xf32> to vector<8x1280xf32>
    %121 = arith.mulf %119, %120 : vector<8x1280xf32>
    %c0_115 = arith.constant 0 : index
    %c0_116 = arith.constant 0 : index
    %c0_117 = arith.constant 0 : index
    %122 = vector.load %arg7[%c0_115, %c0_116, %c0_117] : memref<1x8x1280xf32, #tpu.memory_space<vmem>>, vector<1x8x1280xf32>
    %123 = vector.shape_cast %122 : vector<1x8x1280xf32> to vector<8x1280xf32>
    %124 = vector.shape_cast %121 : vector<8x1280xf32> to vector<1x8x1280xf32>
    tpu.vector_store %arg7[%c0_115, %c0_116, %c0_117], %124 {strides = array<i32>} : memref<1x8x1280xf32, #tpu.memory_space<vmem>>, vector<1x8x1280xf32>,
    return
  }
  func.func @transform_0(%arg0: i32) -> (i32, i32, i32) {
    %c0_i32 = arith.constant 0 : i32
    %c0_i32_0 = arith.constant 0 : i32
    %c0_i32_1 = arith.constant 0 : i32
    return %arg0, %c0_i32, %c0_i32_0 : i32, i32, i32
  }
  func.func @transform_1(%arg0: i32) -> (i32, i32, i32) {
    %c0_i32 = arith.constant 0 : i32
    %c0_i32_0 = arith.constant 0 : i32
    %c0_i32_1 = arith.constant 0 : i32
    %c0_i32_2 = arith.constant 0 : i32
    return %c0_i32, %c0_i32_0, %c0_i32_1 : i32, i32, i32
  }
  func.func @transform_2(%arg0: i32) -> (i32, i32) {
    %c0_i32 = arith.constant 0 : i32
    %c0_i32_0 = arith.constant 0 : i32
    %c0_i32_1 = arith.constant 0 : i32
    return %c0_i32, %c0_i32_0 : i32, i32
  }
  func.func @transform_3(%arg0: i32) -> (i32, i32, i32) {
    %c0_i32 = arith.constant 0 : i32
    %c0_i32_0 = arith.constant 0 : i32
    %c0_i32_1 = arith.constant 0 : i32
    %c0_i32_2 = arith.constant 0 : i32
    return %c0_i32, %c0_i32_0, %c0_i32_1 : i32, i32, i32
  }
  func.func @transform_4(%arg0: i32) -> (i32, i32) {
    %c0_i32 = arith.constant 0 : i32
    %c0_i32_0 = arith.constant 0 : i32
    %c0_i32_1 = arith.constant 0 : i32
    return %c0_i32, %c0_i32_0 : i32, i32
  }
  func.func @transform_5(%arg0: i32) -> (i32, i32) {
    %c0_i32 = arith.constant 0 : i32
    %c0_i32_0 = arith.constant 0 : i32
    %c0_i32_1 = arith.constant 0 : i32
    return %c0_i32, %c0_i32_0 : i32, i32
  }
  func.func @transform_6(%arg0: i32) -> (i32, i32, i32) {
    %c0_i32 = arith.constant 0 : i32
    %c0_i32_0 = arith.constant 0 : i32
    %c0_i32_1 = arith.constant 0 : i32
    return %arg0, %c0_i32, %c0_i32_0 : i32, i32, i32
  }
}

</mosaic_0001>

<bundles_post_ra>
// kernel: upconv_forward.1
= control target key start
LH: loop header
LB: loop body
LE: loop exit
PB: predicated region body
PF: predicated region fallthrough
CT: control target
= control target key end

     0   :  { %s6062_s21 = smov 0   ;;  %s7177_s0 = inlined_call_operand.vmem [shape: bf16[2,8,1536], index: 0, kind: input, shape index: {}]   ;;  %s7178_s1 = inlined_call_operand.vmem [shape: bf16[9,8,8], index: 1, kind: input, shape index: {}]   ;;  %s7179_s2 = inlined_call_operand.vmem [shape: f32[8,1], index: 2, kind: input, shape index: {}]   ;;  %s7180_s3 = inlined_call_operand.vmem [shape: bf16[9,8,8], index: 3, kind: input, shape index: {}]   ;;  %s7181_s4 = inlined_call_operand.vmem [shape: f32[8,1], index: 4, kind: input, shape index: {}]   ;;  %s7182_s5 = inlined_call_operand.vmem [shape: f32[1,1280], index: 5, kind: input, shape index: {}]   ;;  %s7183_s6 = inlined_call_operand.vmem [shape: f32[2,8,1280], index: 6, kind: output, shape index: {}]  }
   0x1 LB: > { %s5667_s22 = sadd.s32 4294967295, %s6016_s21   ;;  %p5671_p0 = scmp.ge.s32.totalorder %s6016_s21, 1  ;;  %s6016_s21 = sphi %s6062_s21, %s16_s21  }
   0x2   : > { %p212_p1 = scmp.lt.s32.totalorder %s6016_s21, 3 }
   0x4   : > { %p213_p2 = pnand %p5671_p0, %p212_p1 }
   0x5   : > { %p242_p3 = scmp.lt.s32.totalorder (!%p213_p2), %s5667_s22, 1  ;;  %v6018_v0 = vmov (!%p213_p2), 0   ;;  %s6019_s27 = smov (!%p213_p2), 34   ;;  %vm318_vm0 = vcmask (!%p213_p2), 277504   ;;  %vm333_vm1 = vcmask (!%p213_p2), 1043456   ;;  %vm329_vm2 = vcmask (!%p213_p2), 64512  }
   0x6   : > { %216 = sbr.rel (%p213_p2) target bundleno = 1072 (0x430), region = 44  ;;  %396 = vmatprep.mubr.bf16.mxu0 (!%p213_p2), %v6018_v0  ;;  %257 = vst [vmem:[#allocation2] sm:$0xf] (!%p213_p2), %v6018_v0  ;;  %258 = vst [vmem:[#allocation2 + $0x2c] sm:$0xf] (!%p213_p2), %v6018_v0  ;;  %437 = vmatprep.mubr.bf16.mxu1 (!%p213_p2), %v6018_v0  ;;  %s6020_s28 = smov (!%p213_p2), 35  }
   0x7   : > { %5965 = vset.pattern.permute.xlu0 (!%p213_p2), %v6018_v0  ;;  %s6021_s29 = smov (!%p213_p2), 33   ;;  %s6022_s30 = smov (!%p213_p2), 1   ;;  %v5674_v40 = vld [vmem:[%s7178_s1 + $0x4] sm:$0xf] (!%p213_p2)  ;;  %vm591_vm3 = vcmask (!%p213_p2), 285696   ;;  %vm864_vm4 = vcmask (!%p213_p2), 269312  }
   0x8   : > { %s6023_s7 = smov (!%p213_p2), 127   ;;  %s6024_s8 = smov (!%p213_p2), 95   ;;  %vm1147_vm5 = vcmask (!%p213_p2), 7168   ;;  %vm1744_vm6 = vcmask (!%p213_p2), 1039360   ;;  %vm2027_vm7 = vcmask (!%p213_p2), 777216   ;;  %vm2310_vm8 = vcmask (!%p213_p2), 769024  }
   0x9   : > { %s6025_s11 = smov (!%p213_p2), 94   ;;  %s6026_s14 = smov (!%p213_p2), 93   ;;  %vm2593_vm9 = vcmask (!%p213_p2), 760832  }
   0xd   : > { %s7185_s22 = smov (!%p242_p3, %s5667_s22), 1 }
   0xe   : > { %s5946_s23 = smul.u32 48, %s7185_s22 }
   0xf   : > { %s5947_s19 = smul.u32 80, %s7185_s22 }
  0x10   : > { %s6080_s26 = scalar_lea.vmem %s7177_s0, %s5946_s23 }
  0x11   : > { %v260_v1 = vld [vmem:[%s6080_s26 + $0x8] sm:$0xff]  ;;  %v259_v2 = vld [vmem:[%s6080_s26] sm:$0xff]  ;;  %v261_v7 = vld [vmem:[%s6080_s26 + $0x10] sm:$0xff] }
  0x12   : > { %v5677_v3 = vcombine.low %v260_v1, %v260_v1  ;;  %v5675_v4 = vcombine.low %v259_v2, %v259_v2  ;;  %v5678_v5 = vcombine.high %v260_v1, %v260_v1  ;;  %v5676_v6 = vcombine.high %v259_v2, %v259_v2  ;;  %v262_v10 = vld [vmem:[%s6080_s26 + $0x18] sm:$0xff]  ;;  %v263_v13 = vld [vmem:[%s6080_s26 + $0x20] sm:$0xff]  ;;  %v5976_v16 = vld [vmem:[%s6080_s26 + $0x28] ss:$0 sps:$4 sm:$0xff]  }
  0x13   : > { %v5680_v8 = vcombine.high %v261_v7, %v261_v7  ;;  %v5679_v9 = vcombine.low %v261_v7, %v261_v7  ;;  %v5682_v11 = vcombine.high %v262_v10, %v262_v10  ;;  %v5681_v12 = vcombine.low %v262_v10, %v262_v10  ;;  %v1686_v17 = vld [vmem:[%s6080_s26 + $0x4] sm:$0xff]  ;;  %v1687_v20 = vld [vmem:[%s6080_s26 + $0xc] sm:$0xff]  ;;  %v1688_v23 = vld [vmem:[%s6080_s26 + $0x14] sm:$0xff] }
  0x14   : > { %300 = vrot.lane.b32.xlu1 %v5677_v3, %s6019_s27  ;;  %296 = vrot.lane.b32.xlu0 %v5675_v4, %s6019_s27  ;;  %v5684_v14 = vcombine.high %v263_v13, %v263_v13  ;;  %v5683_v15 = vcombine.low %v263_v13, %v263_v13  ;;  %v6134_v18 = vcombine.high %v1686_v17, %v1686_v17  ;;  %v1689_v26 = vld [vmem:[%s6080_s26 + $0x1c] sm:$0xff]  ;;  %v1690_v29 = vld [vmem:[%s6080_s26 + $0x24] sm:$0xff] }
  0x15   : > { %v6136_v19 = vcombine.low %v1686_v17, %v1686_v17  ;;  %v6143_v21 = vcombine.high %v1687_v20, %v1687_v20  ;;  %v6145_v22 = vcombine.low %v1687_v20, %v1687_v20  ;;  %v6152_v24 = vcombine.high %v1688_v23, %v1688_v23  ;;  %v6179_v32 = vld [vmem:[%s6080_s26 + $0x2c] ss:$0 sps:$4 sm:$0xff]  }
  0x16   : > { %v6154_v25 = vcombine.low %v1688_v23, %v1688_v23  ;;  %v6161_v27 = vcombine.high %v1689_v26, %v1689_v26  ;;  %v6163_v28 = vcombine.low %v1689_v26, %v1689_v26  ;;  %v6170_v30 = vcombine.high %v1690_v29, %v1690_v29 }
  0x17   : > { %v6172_v31 = vcombine.low %v1690_v29, %v1690_v29 }
  0x18   : > { %302 = vrot.lane.b32.xlu1 %v5678_v5, %s6019_s27  ;;  %298 = vrot.lane.b32.xlu0 %v5676_v6, %s6019_s27 }
  0x1c   : > { %306 = vrot.lane.b32.xlu1 %v5680_v8, %s6019_s27  ;;  %304 = vrot.lane.b32.xlu0 %v5679_v9, %s6019_s27 }
  0x20   : > { %310 = vrot.lane.b32.xlu1 %v5682_v11, %s6019_s27  ;;  %308 = vrot.lane.b32.xlu0 %v5681_v12, %s6019_s27 }
  0x24   : > { %314 = vrot.lane.b32.xlu1 %v5684_v14, %s6019_s27  ;;  %312 = vrot.lane.b32.xlu0 %v5683_v15, %s6019_s27 }
  0x28   : > { %569 = vrot.lane.b32.xlu1 %v5675_v4, %s6020_s28  ;;  %316 = vrot.lane.b32.xlu0 %v5976_v16, %s6019_s27 }
  0x2c   : > { %573 = vrot.lane.b32.xlu1 %v5677_v3, %s6020_s28  ;;  %571 = vrot.lane.b32.xlu0 %v5676_v6, %s6020_s28 }
  0x30   : > { %577 = vrot.lane.b32.xlu1 %v5679_v9, %s6020_s28  ;;  %575 = vrot.lane.b32.xlu0 %v5678_v5, %s6020_s28 }
  0x34   : > { %581 = vrot.lane.b32.xlu1 %v5681_v12, %s6020_s28  ;;  %579 = vrot.lane.b32.xlu0 %v5680_v8, %s6020_s28 }
  0x38   : > { %585 = vrot.lane.b32.xlu1 %v5683_v15, %s6020_s28  ;;  %583 = vrot.lane.b32.xlu0 %v5682_v11, %s6020_s28 }
  0x3c   : > { %589 = vrot.lane.b32.xlu1 %v5976_v16, %s6020_s28  ;;  %587 = vrot.lane.b32.xlu0 %v5684_v14, %s6020_s28 }
  0x40   : > { %844 = vrot.lane.b32.xlu1 %v5676_v6, %s6021_s29  ;;  %842 = vrot.lane.b32.xlu0 %v5675_v4, %s6021_s29 }
  0x44   : > { %848 = vrot.lane.b32.xlu1 %v5678_v5, %s6021_s29  ;;  %846 = vrot.lane.b32.xlu0 %v5677_v3, %s6021_s29 }
  0x48   : > { %852 = vrot.lane.b32.xlu1 %v5680_v8, %s6021_s29  ;;  %850 = vrot.lane.b32.xlu0 %v5679_v9, %s6021_s29 }
  0x4c   : > { %856 = vrot.lane.b32.xlu1 %v5682_v11, %s6021_s29  ;;  %854 = vrot.lane.b32.xlu0 %v5681_v12, %s6021_s29 }
  0x50   : > { %860 = vrot.lane.b32.xlu1 %v5684_v14, %s6021_s29  ;;  %858 = vrot.lane.b32.xlu0 %v5683_v15, %s6021_s29 }
  0x54   : > { %1125 = vrot.lane.b32.xlu1 %v5675_v4, %s6022_s30  ;;  %862 = vrot.lane.b32.xlu0 %v5976_v16, %s6021_s29 }
  0x58   : > { %1129 = vrot.lane.b32.xlu1 %v5677_v3, %s6022_s30  ;;  %1127 = vrot.lane.b32.xlu0 %v5676_v6, %s6022_s30  ;;  %v265_v3 = vld [vmem:[%s7178_s1] sm:$0xf] }
  0x5c   : > { %1133 = vrot.lane.b32.xlu1 %v5679_v9, %s6022_s30  ;;  %1131 = vrot.lane.b32.xlu0 %v5678_v5, %s6022_s30 }
  0x60   : > { %1137 = vrot.lane.b32.xlu1 %v5681_v12, %s6022_s30  ;;  %1135 = vrot.lane.b32.xlu0 %v5680_v8, %s6022_s30 }
  0x64   : > { %1141 = vrot.lane.b32.xlu1 %v5683_v15, %s6022_s30  ;;  %1139 = vrot.lane.b32.xlu0 %v5682_v11, %s6022_s30 }
  0x68   : > { %1145 = vrot.lane.b32.xlu1 %v5976_v16, %s6022_s30  ;;  %1143 = vrot.lane.b32.xlu0 %v5684_v14, %s6022_s30 }
  0x6c   : > { %1724 = vrot.lane.b32.xlu1 %v6134_v18, %s6023_s7  ;;  %1722 = vrot.lane.b32.xlu0 %v6136_v19, %s6023_s7 }
  0x70   : > { %1728 = vrot.lane.b32.xlu1 %v6143_v21, %s6023_s7  ;;  %1726 = vrot.lane.b32.xlu0 %v6145_v22, %s6023_s7 }
  0x74   : > { %1732 = vrot.lane.b32.xlu1 %v6152_v24, %s6023_s7  ;;  %1730 = vrot.lane.b32.xlu0 %v6154_v25, %s6023_s7 }
  0x78   : > { %1736 = vrot.lane.b32.xlu1 %v6161_v27, %s6023_s7  ;;  %1734 = vrot.lane.b32.xlu0 %v6163_v28, %s6023_s7 }
  0x7c   : > { %1740 = vrot.lane.b32.xlu1 %v6170_v30, %s6023_s7  ;;  %1738 = vrot.lane.b32.xlu0 %v6172_v31, %s6023_s7 }
  0x80   : > { %2005 = vrot.lane.b32.xlu1 %v6136_v19, %s6024_s8  ;;  %1742 = vrot.lane.b32.xlu0 %v6179_v32, %s6023_s7 }
  0x84   : > { %2009 = vrot.lane.b32.xlu1 %v6145_v22, %s6024_s8  ;;  %2007 = vrot.lane.b32.xlu0 %v6134_v18, %s6024_s8 }
  0x86   : > { %v301_v33 = vpop.permute.xlu1 %300  ;;  %v297_v34 = vpop.permute.xlu0 %296 }
  0x88   : > { %2013 = vrot.lane.b32.xlu1 %v6154_v25, %s6024_s8  ;;  %2011 = vrot.lane.b32.xlu0 %v6143_v21, %s6024_s8 }
  0x8a   : > { %v303_v35 = vpop.permute.xlu1 %302  ;;  %v299_v36 = vpop.permute.xlu0 %298 }
  0x8b   : > { %v320_v37 = vsel %vm318_vm0, %v299_v36, %v301_v33  ;;  %v319_v38 = vsel %vm318_vm0, %v297_v34, %v299_v36  ;;  %v321_v41 = vsel %vm318_vm0, %v301_v33, %v303_v35 }
  0x8c   : > { %5686 = vmatprep.subr.msk.bf16.mxu0 %vm333_vm1, %v320_v37  ;;  %v335_v39 = vsel %vm333_vm1, %v319_v38, 0  ;;  %2017 = vrot.lane.b32.xlu1 %v6163_v28, %s6024_s8  ;;  %v341_v45 = vsel %vm333_vm1, %v321_v41, 0 }
  0x8d   : > { %365 = vmatpush1.bf16.msra.mxu0 %v335_v39  ;;  %2015 = vrot.lane.b32.xlu0 %v6152_v24, %s6024_s8 }
  0x8e   : > { %v307_v42 = vpop.permute.xlu1 %306  ;;  %v305_v43 = vpop.permute.xlu0 %304 }
  0x8f   : > { %v322_v44 = vsel %vm318_vm0, %v303_v35, %v305_v43  ;;  %v323_v46 = vsel %vm318_vm0, %v305_v43, %v307_v42  ;;  %v5706_v43 = vld [vmem:[%s7178_s1 + $0x8] sm:$0xf] }
  0x90   : > { %5687 = vmatmul.mubr.msk.bf16.vlgmr.msra.gmra.mrb[0].mxu0 %vm329_vm2, %v5674_v40  ;;  %5688 = vmatprep.subr.msk.bf16.mxu1 %vm333_vm1, %v322_v44  ;;  %v347_v50 = vsel %vm333_vm1, %v323_v46, 0 }
  0x91   : > { %406 = vmatpush1.bf16.msra.mxu1 %v341_v45  ;;  %478 = vmatprep.mubr.bf16.mxu0 %v6018_v0 }
  0x92   : > { %v311_v47 = vpop.permute.xlu1 %310  ;;  %v309_v48 = vpop.permute.xlu0 %308  ;;  %2021 = vrot.lane.b32.xlu1 %v6172_v31, %s6024_s8  ;;  %2019 = vrot.lane.b32.xlu0 %v6161_v27, %s6024_s8 }
  0x93   : > { %v324_v49 = vsel %vm318_vm0, %v307_v42, %v309_v48  ;;  %v325_v51 = vsel %vm318_vm0, %v309_v48, %v311_v47 }
  0x94   : > { %5689 = vmatmul.mubr.msk.bf16.vlgmr.msra.gmra.mrb[0].mxu1 %vm329_vm2, %v5674_v40  ;;  %5690 = vmatprep.subr.msk.bf16.mxu0 %vm333_vm1, %v324_v49  ;;  %v353_v55 = vsel %vm333_vm1, %v325_v51, 0 }
  0x95   : > { %447 = vmatpush1.bf16.msra.mxu0 %v347_v50  ;;  %519 = vmatprep.mubr.bf16.mxu1 %v6018_v0 }
  0x96   : > { %v315_v52 = vpop.permute.xlu1 %314  ;;  %v313_v53 = vpop.permute.xlu0 %312  ;;  %2025 = vrot.lane.b32.xlu1 %v6179_v32, %s6024_s8  ;;  %2023 = vrot.lane.b32.xlu0 %v6170_v30, %s6024_s8 }
  0x97   : > { %v326_v54 = vsel %vm318_vm0, %v311_v47, %v313_v53  ;;  %v327_v56 = vsel %vm318_vm0, %v313_v53, %v315_v52 }
  0x98   : > { %5691 = vmatmul.mubr.msk.bf16.vlgmr.msra.gmra.mrb[4].mxu0 %vm329_vm2, %v5674_v40  ;;  %5692 = vmatprep.subr.msk.bf16.mxu1 %vm333_vm1, %v326_v54  ;;  %v359_v60 = vsel %vm333_vm1, %v327_v56, 0 }
  0x99   : > { %488 = vmatpush1.bf16.msra.mxu1 %v353_v55  ;;  %560 = vmatprep.mubr.bf16.mxu0 %v6018_v0 }
  0x9a   : > { %v570_v57 = vpop.permute.xlu1 %569  ;;  %v317_v58 = vpop.permute.xlu0 %316  ;;  %2290 = vrot.lane.b32.xlu1 %v6134_v18, %s6025_s11  ;;  %2288 = vrot.lane.b32.xlu0 %v6136_v19, %s6025_s11 }
  0x9b   : > { %v328_v59 = vsel %vm318_vm0, %v315_v52, %v317_v58 }
  0x9c   : > { %5693 = vmatmul.mubr.msk.bf16.vlgmr.msra.gmra.mrb[4].mxu1 %vm329_vm2, %v5674_v40  ;;  %5694 = vmatprep.subr.msk.bf16.mxu0 %vm333_vm1, %v328_v59 }
  0x9d   : > { %529 = vmatpush1.bf16.msra.mxu0 %v359_v60  ;;  %667 = vmatprep.mubr.bf16.mxu1 %v6018_v0 }
  0x9e   : > { %v574_v61 = vpop.permute.xlu1 %573  ;;  %v572_v62 = vpop.permute.xlu0 %571  ;;  %2294 = vrot.lane.b32.xlu1 %v6143_v21, %s6025_s11  ;;  %2292 = vrot.lane.b32.xlu0 %v6145_v22, %s6025_s11 }
  0x9f   : > { %v592_v63 = vsel %vm591_vm3, %v570_v57, %v572_v62  ;;  %v593_v1 = vsel %vm591_vm3, %v572_v62, %v574_v61 }
  0xa0   : > { %5695 = vmatmul.mubr.msk.bf16.vlgmr.msra.gmra.mrb[8].mxu0 %vm329_vm2, %v5674_v40  ;;  %5696 = vmatprep.subr.msk.bf16.mxu1 %vm333_vm1, %v593_v1  ;;  %v606_v2 = vsel %vm333_vm1, %v592_v63, 0 }
  0xa1   : > { %636 = vmatpush1.bf16.msra.mxu1 %v606_v2  ;;  %708 = vmatprep.mubr.bf16.mxu0 %v6018_v0 }
  0xa2   : > { %v578_v4 = vpop.permute.xlu1 %577  ;;  %v576_v5 = vpop.permute.xlu0 %575  ;;  %2298 = vrot.lane.b32.xlu1 %v6152_v24, %s6025_s11  ;;  %2296 = vrot.lane.b32.xlu0 %v6154_v25, %s6025_s11 }
  0xa3   : > { %v594_v6 = vsel %vm591_vm3, %v574_v61, %v576_v5  ;;  %v595_v7 = vsel %vm591_vm3, %v576_v5, %v578_v4 }
  0xa4   : > { %5697 = vmatmul.mubr.msk.bf16.vlgmr.msra.gmra.mrb[8].mxu1 %vm329_vm2, %v265_v3  ;;  %5698 = vmatprep.subr.msk.bf16.mxu0 %vm333_vm1, %v595_v7  ;;  %v612_v8 = vsel %vm333_vm1, %v594_v6, 0 }
  0xa5   : > { %677 = vmatpush1.bf16.msra.mxu0 %v612_v8  ;;  %749 = vmatprep.mubr.bf16.mxu1 %v6018_v0 }
  0xa6   : > { %v582_v9 = vpop.permute.xlu1 %581  ;;  %v580_v10 = vpop.permute.xlu0 %579  ;;  %2302 = vrot.lane.b32.xlu1 %v6161_v27, %s6025_s11  ;;  %2300 = vrot.lane.b32.xlu0 %v6163_v28, %s6025_s11 }
  0xa7   : > { %v596_v11 = vsel %vm591_vm3, %v578_v4, %v580_v10  ;;  %v597_v12 = vsel %vm591_vm3, %v580_v10, %v582_v9  ;;  %v5717_v4 = vld [vmem:[%s7178_s1 + $0xc] sm:$0xf] }
  0xa8   : > { %5699 = vmatmul.mubr.msk.bf16.vlgmr.msra.gmra.mrb[12].mxu0 %vm329_vm2, %v265_v3  ;;  %5700 = vmatprep.subr.msk.bf16.mxu1 %vm333_vm1, %v597_v12  ;;  %v618_v13 = vsel %vm333_vm1, %v596_v11, 0 }
  0xa9   : > { %718 = vmatpush1.bf16.msra.mxu1 %v618_v13  ;;  %790 = vmatprep.mubr.bf16.mxu0 %v6018_v0 }
  0xaa   : > { %v586_v14 = vpop.permute.xlu1 %585  ;;  %v584_v15 = vpop.permute.xlu0 %583  ;;  %2306 = vrot.lane.b32.xlu1 %v6170_v30, %s6025_s11  ;;  %2304 = vrot.lane.b32.xlu0 %v6172_v31, %s6025_s11 }
  0xab   : > { %v598_v16 = vsel %vm591_vm3, %v582_v9, %v584_v15  ;;  %v599_v17 = vsel %vm591_vm3, %v584_v15, %v586_v14 }
  0xac   : > { %5701 = vmatmul.mubr.msk.bf16.vlgmr.msra.gmra.mrb[12].mxu1 %vm329_vm2, %v265_v3  ;;  %5702 = vmatprep.subr.msk.bf16.mxu0 %vm333_vm1, %v599_v17  ;;  %v624_v20 = vsel %vm333_vm1, %v598_v16, 0 }
  0xad   : > { %759 = vmatpush1.bf16.msra.mxu0 %v624_v20  ;;  %831 = vmatprep.mubr.bf16.mxu1 %v6018_v0 }
  0xae   : > { %v590_v23 = vpop.permute.xlu1 %589  ;;  %v588_v26 = vpop.permute.xlu0 %587  ;;  %2571 = vrot.lane.b32.xlu1 %v6136_v19, %s6026_s14  ;;  %2308 = vrot.lane.b32.xlu0 %v6179_v32, %s6025_s11 }
  0xaf   : > { %v600_v29 = vsel %vm591_vm3, %v586_v14, %v588_v26  ;;  %v601_v33 = vsel %vm591_vm3, %v588_v26, %v590_v23 }
  0xb0   : > { %5703 = vmatmul.mubr.msk.bf16.vlgmr.msra.gmra.mrb[16].mxu0 %vm329_vm2, %v265_v3  ;;  %5704 = vmatprep.subr.msk.bf16.mxu1 %vm333_vm1, %v601_v33  ;;  %v630_v34 = vsel %vm333_vm1, %v600_v29, 0  ;;  %v1442_v33 = vsel %vm333_vm1, %v6136_v19, 0 }
  0xb1   : > { %800 = vmatpush1.bf16.msra.mxu1 %v630_v34  ;;  %940 = vmatprep.mubr.bf16.mxu0 %v6018_v0 }
  0xb2   : > { %v845_v35 = vpop.permute.xlu1 %844  ;;  %v843_v36 = vpop.permute.xlu0 %842  ;;  %2575 = vrot.lane.b32.xlu1 %v6145_v22, %s6026_s14  ;;  %2573 = vrot.lane.b32.xlu0 %v6134_v18, %s6026_s14 }
  0xb3   : > { %v865_v37 = vsel %vm864_vm4, %v843_v36, %v845_v35 }
  0xb4   : > { %5705 = vmatmul.mubr.msk.bf16.vlgmr.msra.gmra.mrb[16].mxu1 %vm329_vm2, %v265_v3  ;;  %v879_v41 = vsel %vm333_vm1, %v865_v37, 0 }
  0xb5   : > { %981 = vmatprep.mubr.bf16.mxu1 %v6018_v0 }
  0xb6   : > { %v849_v38 = vpop.permute.xlu1 %848  ;;  %v847_v39 = vpop.permute.xlu0 %846  ;;  %2579 = vrot.lane.b32.xlu1 %v6154_v25, %s6026_s14  ;;  %2577 = vrot.lane.b32.xlu0 %v6143_v21, %s6026_s14 }
  0xb7   : > { %v866_v40 = vsel %vm864_vm4, %v845_v35, %v847_v39  ;;  %v867_v42 = vsel %vm864_vm4, %v847_v39, %v849_v38 }
  0xb8   : > { %5707 = vmatprep.subr.msk.bf16.mxu0 %vm333_vm1, %v866_v40  ;;  %v885_v47 = vsel %vm333_vm1, %v867_v42, 0 }
  0xb9   : > { %909 = vmatpush1.bf16.msra.mxu0 %v879_v41 }
  0xba   : > { %v853_v44 = vpop.permute.xlu1 %852  ;;  %v851_v45 = vpop.permute.xlu0 %850  ;;  %2583 = vrot.lane.b32.xlu1 %v6163_v28, %s6026_s14  ;;  %2581 = vrot.lane.b32.xlu0 %v6152_v24, %s6026_s14 }
  0xbb   : > { %v868_v46 = vsel %vm864_vm4, %v849_v38, %v851_v45  ;;  %v869_v48 = vsel %vm864_vm4, %v851_v45, %v853_v44  ;;  %v5728_v38 = vld [vmem:[%s7178_s1 + $0x10] sm:$0xf] }
  0xbc   : > { %5708 = vmatmul.mubr.msk.bf16.vlgmr.msra.gmra.mrb[20].mxu0 %vm329_vm2, %v5706_v43  ;;  %5709 = vmatprep.subr.msk.bf16.mxu1 %vm333_vm1, %v868_v46  ;;  %v891_v52 = vsel %vm333_vm1, %v869_v48, 0 }
  0xbd   : > { %950 = vmatpush1.bf16.msra.mxu1 %v885_v47  ;;  %1022 = vmatprep.mubr.bf16.mxu0 %v6018_v0 }
  0xbe   : > { %v857_v49 = vpop.permute.xlu1 %856  ;;  %v855_v50 = vpop.permute.xlu0 %854  ;;  %2587 = vrot.lane.b32.xlu1 %v6172_v31, %s6026_s14  ;;  %2585 = vrot.lane.b32.xlu0 %v6161_v27, %s6026_s14 }
  0xbf   : > { %v870_v51 = vsel %vm864_vm4, %v853_v44, %v855_v50  ;;  %v871_v53 = vsel %vm864_vm4, %v855_v50, %v857_v49 }
  0xc0   : > { %5710 = vmatmul.mubr.msk.bf16.vlgmr.msra.gmra.mrb[20].mxu1 %vm329_vm2, %v5706_v43  ;;  %5711 = vmatprep.subr.msk.bf16.mxu0 %vm333_vm1, %v870_v51  ;;  %v897_v57 = vsel %vm333_vm1, %v871_v53, 0  ;;  %v5749_v53 = vld [vmem:[%s7178_s1 + $0x14] sm:$0xf] }
  0xc1   : > { %991 = vmatpush1.bf16.msra.mxu0 %v891_v52  ;;  %1063 = vmatprep.mubr.bf16.mxu1 %v6018_v0 }
  0xc2   : > { %v861_v54 = vpop.permute.xlu1 %860  ;;  %v859_v55 = vpop.permute.xlu0 %858  ;;  %2591 = vrot.lane.b32.xlu1 %v6179_v32, %s6026_s14  ;;  %2589 = vrot.lane.b32.xlu0 %v6170_v30, %s6026_s14 }
  0xc3   : > { %v872_v56 = vsel %vm864_vm4, %v857_v49, %v859_v55  ;;  %v873_v58 = vsel %vm864_vm4, %v859_v55, %v861_v54 }
  0xc4   : > { %5712 = vmatmul.mubr.msk.bf16.vlgmr.msra.gmra.mrb[24].mxu0 %vm329_vm2, %v5706_v43  ;;  %5713 = vmatprep.subr.msk.bf16.mxu1 %vm333_vm1, %v872_v56  ;;  %v903_v61 = vsel %vm333_vm1, %v873_v58, 0 }
  0xc5   : > { %1032 = vmatpush1.bf16.msra.mxu1 %v897_v57  ;;  %1104 = vmatprep.mubr.bf16.mxu0 %v6018_v0 }
  0xc6   : > { %v1126_v59 = vpop.permute.xlu1 %1125  ;;  %v863_v60 = vpop.permute.xlu0 %862 }
  0xc7   : > { %v874_v32 = vsel %vm864_vm4, %v861_v54, %v863_v60 }
  0xc8   : > { %5714 = vmatmul.mubr.msk.bf16.vlgmr.msra.gmra.mrb[24].mxu1 %vm329_vm2, %v5706_v43  ;;  %5715 = vmatprep.subr.msk.bf16.mxu0 %vm333_vm1, %v874_v32 }
  0xc9   : > { %1073 = vmatpush1.bf16.msra.mxu0 %v903_v61  ;;  %1223 = vmatprep.mubr.bf16.mxu1 %v6018_v0 }
  0xca   : > { %v1130_v62 = vpop.permute.xlu1 %1129  ;;  %v1128_v63 = vpop.permute.xlu0 %1127 }
  0xcb   : > { %v1148_v1 = vsel %vm1147_vm5, %v1126_v59, %v1128_v63  ;;  %v1149_v2 = vsel %vm1147_vm5, %v1128_v63, %v1130_v62 }
  0xcc   : > { %5716 = vmatmul.mubr.msk.bf16.vlgmr.msra.gmra.mrb[28].mxu0 %vm329_vm2, %v5706_v43  ;;  %5718 = vmatprep.subr.msk.bf16.mxu1 %vm333_vm1, %v1149_v2  ;;  %v1162_v3 = vsel %vm333_vm1, %v1148_v1, 0 }
  0xcd   : > { %1192 = vmatpush1.bf16.msra.mxu1 %v1162_v3  ;;  %1264 = vmatprep.mubr.bf16.mxu0 %v6018_v0 }
  0xce   : > { %v1134_v5 = vpop.permute.xlu1 %1133  ;;  %v1132_v6 = vpop.permute.xlu0 %1131 }
  0xcf   : > { %v1150_v7 = vsel %vm1147_vm5, %v1130_v62, %v1132_v6  ;;  %v1151_v8 = vsel %vm1147_vm5, %v1132_v6, %v1134_v5 }
  0xd0   : > { %5719 = vmatmul.mubr.msk.bf16.vlgmr.msra.gmra.mrb[28].mxu1 %vm329_vm2, %v5717_v4  ;;  %5720 = vmatprep.subr.msk.bf16.mxu0 %vm333_vm1, %v1151_v8  ;;  %v1168_v9 = vsel %vm333_vm1, %v1150_v7, 0 }
  0xd1   : > { %1233 = vmatpush1.bf16.msra.mxu0 %v1168_v9  ;;  %1305 = vmatprep.mubr.bf16.mxu1 %v6018_v0 }
  0xd2   : > { %v1138_v10 = vpop.permute.xlu1 %1137  ;;  %v1136_v11 = vpop.permute.xlu0 %1135 }
  0xd3   : > { %v1152_v12 = vsel %vm1147_vm5, %v1134_v5, %v1136_v11  ;;  %v1153_v13 = vsel %vm1147_vm5, %v1136_v11, %v1138_v10 }
  0xd4   : > { %5721 = vmatmul.mubr.msk.bf16.vlgmr.msra.gmra.mrb[32].mxu0 %vm329_vm2, %v5717_v4  ;;  %5722 = vmatprep.subr.msk.bf16.mxu1 %vm333_vm1, %v1153_v13  ;;  %v1174_v14 = vsel %vm333_vm1, %v1152_v12, 0 }
  0xd5   : > { %1274 = vmatpush1.bf16.msra.mxu1 %v1174_v14  ;;  %1346 = vmatprep.mubr.bf16.mxu0 %v6018_v0 }
  0xd6   : > { %v1142_v15 = vpop.permute.xlu1 %1141  ;;  %v1140_v16 = vpop.permute.xlu0 %1139 }
  0xd7   : > { %v1154_v17 = vsel %vm1147_vm5, %v1138_v10, %v1140_v16  ;;  %v1155_v20 = vsel %vm1147_vm5, %v1140_v16, %v1142_v15  ;;  %v255_v16 = vld [vmem:[%s7179_s2] sm:$0xff] }
  0xd8   : > { %5723 = vmatmul.mubr.msk.bf16.vlgmr.msra.gmra.mrb[32].mxu1 %vm329_vm2, %v5717_v4  ;;  %5724 = vmatprep.subr.msk.bf16.mxu0 %vm333_vm1, %v1155_v20  ;;  %v1180_v23 = vsel %vm333_vm1, %v1154_v17, 0 }
  0xd9   : > { %1315 = vmatpush1.bf16.msra.mxu0 %v1180_v23  ;;  %1387 = vmatprep.mubr.bf16.mxu1 %v6018_v0 }
  0xda   : > { %v1146_v26 = vpop.permute.xlu1 %1145  ;;  %v1144_v29 = vpop.permute.xlu0 %1143  ;;  %5739 = vmatprep.subr.msk.bf16.mxu0 %vm333_vm1, %v6134_v18  ;;  %v1448_v18 = vsel %vm333_vm1, %v6145_v22, 0  ;;  %2854 = vperm.xlu0 %5965, %v255_v16  }
  0xdb   : > { %v1156_v34 = vsel %vm1147_vm5, %v1142_v15, %v1144_v29  ;;  %v1157_v35 = vsel %vm1147_vm5, %v1144_v29, %v1146_v26  ;;  %v5771_v15 = vld [vmem:[%s7178_s1 + $0x18] sm:$0xf] }
  0xdc   : > { %5725 = vmatmul.mubr.msk.bf16.vlgmr.msra.gmra.mrb[36].mxu0 %vm329_vm2, %v5717_v4  ;;  %5726 = vmatprep.subr.msk.bf16.mxu1 %vm333_vm1, %v1157_v35  ;;  %v1186_v36 = vsel %vm333_vm1, %v1156_v34, 0 }
  0xdd   : > { %1356 = vmatpush1.bf16.msra.mxu1 %v1186_v36  ;;  %1472 = vmatpush1.bf16.msra.mxu0 %v1442_v33 }
  0xde   : > { %1503 = vmatprep.mubr.bf16.mxu0 %v6018_v0  ;;  %5741 = vmatprep.subr.msk.bf16.mxu1 %vm333_vm1, %v6143_v21  ;;  %v1725_v19 = vpop.permute.xlu1 %1724  ;;  %v1723_v37 = vpop.permute.xlu0 %1722  ;;  %v1454_v21 = vsel %vm333_vm1, %v6154_v25, 0 }
  0xdf   : > { %5743 = vmatprep.subr.msk.bf16.mxu0 %vm333_vm1, %v6152_v24  ;;  %v1460_v24 = vsel %vm333_vm1, %v6163_v28, 0 }
  0xe0   : > { %5727 = vmatmul.mubr.msk.bf16.vlgmr.msra.gmra.mrb[36].mxu1 %vm329_vm2, %v5717_v4 }
  0xe1   : > { %1513 = vmatpush1.bf16.msra.mxu1 %v1448_v18  ;;  %1544 = vmatprep.mubr.bf16.mxu1 %v6018_v0 }
  0xe2   : > { %v1729_v39 = vpop.permute.xlu1 %1728  ;;  %5745 = vmatprep.subr.msk.bf16.mxu1 %vm333_vm1, %v6161_v27  ;;  %v1727_v22 = vpop.permute.xlu0 %1726  ;;  %v1466_v27 = vsel %vm333_vm1, %v6172_v31, 0 }
  0xe3   : > { %v1746_v25 = vsel %vm1744_vm6, %v1725_v19, %v1727_v22  ;;  %v1747_v31 = vsel %vm1744_vm6, %v1727_v22, %v1729_v39 }
  0xe4   : > { %5740 = vmatmul.mubr.msk.bf16.vlgmr.msra.gmra.mrb[40].mxu0 %vm329_vm2, %v5728_v38  ;;  %v1765_v51 = vsel %vm333_vm1, %v1747_v31, 0 }
  0xe5   : > { %1554 = vmatpush1.bf16.msra.mxu0 %v1454_v21  ;;  %1585 = vmatprep.mubr.bf16.mxu0 %v6018_v0 }
  0xe6   : > { %v1733_v40 = vpop.permute.xlu1 %1732  ;;  %5747 = vmatprep.subr.msk.bf16.mxu0 %vm333_vm1, %v6170_v30  ;;  %v1731_v41 = vpop.permute.xlu0 %1730  ;;  %v1745_v30 = vsel %vm1744_vm6, %v1723_v37, %v1725_v19 }
  0xe7   : > { %v1748_v28 = vsel %vm1744_vm6, %v1729_v39, %v1731_v41  ;;  %v1759_v47 = vsel %vm333_vm1, %v1745_v30, 0  ;;  %v1749_v52 = vsel %vm1744_vm6, %v1731_v41, %v1733_v40  ;;  %v5782_v30 = vld [vmem:[%s7178_s1 + $0x1c] sm:$0xf] }
  0xe8   : > { %5742 = vmatmul.mubr.msk.bf16.vlgmr.msra.gmra.mrb[40].mxu1 %vm329_vm2, %v5728_v38  ;;  %v1771_v57 = vsel %vm333_vm1, %v1749_v52, 0 }
  0xe9   : > { %1595 = vmatpush1.bf16.msra.mxu1 %v1460_v24  ;;  %1626 = vmatprep.mubr.bf16.mxu1 %v6018_v0 }
  0xea   : > { %5761 = vmatprep.subr.msk.bf16.mxu1 %vm333_vm1, %v1746_v25  ;;  %v1737_v42 = vpop.permute.xlu1 %1736  ;;  %v1735_v43 = vpop.permute.xlu0 %1734 }
  0xeb   : > { %v1750_v46 = vsel %vm1744_vm6, %v1733_v40, %v1735_v43  ;;  %v1751_v58 = vsel %vm1744_vm6, %v1735_v43, %v1737_v42 }
  0xec   : > { %5744 = vmatmul.mubr.msk.bf16.vlgmr.msra.gmra.mrb[44].mxu0 %vm329_vm2, %v5728_v38  ;;  %v1777_v61 = vsel %vm333_vm1, %v1751_v58, 0 }
  0xed   : > { %1636 = vmatpush1.bf16.msra.mxu0 %v1466_v27  ;;  %1667 = vmatprep.mubr.bf16.mxu0 %v6018_v0 }
  0xee   : > { %5763 = vmatprep.subr.msk.bf16.mxu0 %vm333_vm1, %v1748_v28  ;;  %v1741_v44 = vpop.permute.xlu1 %1740  ;;  %v1739_v45 = vpop.permute.xlu0 %1738 }
  0xef   : > { %v1752_v50 = vsel %vm1744_vm6, %v1737_v42, %v1739_v45  ;;  %v1753_v62 = vsel %vm1744_vm6, %v1739_v45, %v1741_v44 }
  0xf0   : > { %5746 = vmatmul.mubr.msk.bf16.vlgmr.msra.gmra.mrb[44].mxu1 %vm329_vm2, %v5728_v38  ;;  %v1783_v3 = vsel %vm333_vm1, %v1753_v62, 0 }
  0xf1   : > { %1789 = vmatpush1.bf16.msra.mxu1 %v1759_v47  ;;  %1820 = vmatprep.mubr.bf16.mxu1 %v6018_v0 }
  0xf2   : > { %5765 = vmatprep.subr.msk.bf16.mxu1 %vm333_vm1, %v1750_v46  ;;  %v2006_v48 = vpop.permute.xlu1 %2005  ;;  %v1743_v49 = vpop.permute.xlu0 %1742 }
  0xf3   : > { %v1754_v56 = vsel %vm1744_vm6, %v1741_v44, %v1743_v49 }
  0xf4   : > { %5748 = vmatmul.mubr.msk.bf16.vlgmr.msra.gmra.mrb[48].mxu0 %vm329_vm2, %v5728_v38 }
  0xf5   : > { %1830 = vmatpush1.bf16.msra.mxu0 %v1765_v51  ;;  %1861 = vmatprep.mubr.bf16.mxu0 %v6018_v0 }
  0xf6   : > { %5767 = vmatprep.subr.msk.bf16.mxu0 %vm333_vm1, %v1752_v50  ;;  %v2010_v54 = vpop.permute.xlu1 %2009  ;;  %v2008_v55 = vpop.permute.xlu0 %2007 }
  0xf7   : > { %v2029_v32 = vsel %vm2027_vm7, %v2008_v55, %v2010_v54  ;;  %v2028_v4 = vsel %vm2027_vm7, %v2006_v48, %v2008_v55 }
  0xf8   : > { %5762 = vmatmul.mubr.msk.bf16.vlgmr.msra.gmra.mrb[48].mxu1 %vm329_vm2, %v5749_v53  ;;  %v2042_v6 = vsel %vm333_vm1, %v2028_v4, 0  ;;  %v5793_v4 = vld [vmem:[%s7178_s1 + $0x20] sm:$0xf] }
  0xf9   : > { %1871 = vmatpush1.bf16.msra.mxu1 %v1771_v57  ;;  %1902 = vmatprep.mubr.bf16.mxu1 %v6018_v0 }
  0xfa   : > { %5769 = vmatprep.subr.msk.bf16.mxu1 %vm333_vm1, %v1754_v56  ;;  %v2014_v59 = vpop.permute.xlu1 %2013  ;;  %v2012_v60 = vpop.permute.xlu0 %2011 }
  0xfb   : > { %v2031_v2 = vsel %vm2027_vm7, %v2012_v60, %v2014_v59  ;;  %v2030_v9 = vsel %vm2027_vm7, %v2010_v54, %v2012_v60 }
  0xfc   : > { %5764 = vmatmul.mubr.msk.bf16.vlgmr.msra.gmra.mrb[52].mxu0 %vm329_vm2, %v5749_v53  ;;  %v2048_v11 = vsel %vm333_vm1, %v2030_v9, 0 }
  0xfd   : > { %1912 = vmatpush1.bf16.msra.mxu0 %v1777_v61  ;;  %1943 = vmatprep.mubr.bf16.mxu0 %v6018_v0 }
  0xfe   : > { %5772 = vmatprep.subr.msk.bf16.mxu0 %vm333_vm1, %v2029_v32  ;;  %v2018_v63 = vpop.permute.xlu1 %2017 }
  0xff   : > { %v2016_v1 = vpop.permute.xlu0 %2015 }
 0x100   : > { %5766 = vmatmul.mubr.msk.bf16.vlgmr.msra.gmra.mrb[52].mxu1 %vm329_vm2, %v5749_v53  ;;  %v2033_v5 = vsel %vm2027_vm7, %v2016_v1, %v2018_v63  ;;  %v2032_v14 = vsel %vm2027_vm7, %v2014_v59, %v2016_v1 }
 0x101   : > { %1953 = vmatpush1.bf16.msra.mxu1 %v1783_v3  ;;  %1984 = vmatprep.mubr.bf16.mxu1 %v6018_v0  ;;  %v2054_v20 = vsel %vm333_vm1, %v2032_v14, 0 }
 0x102   : > { %5774 = vmatprep.subr.msk.bf16.mxu1 %vm333_vm1, %v2031_v2 }
 0x104   : > { %5768 = vmatmul.mubr.msk.bf16.vlgmr.msra.gmra.mrb[56].mxu0 %vm329_vm2, %v5749_v53  ;;  %v2022_v7 = vpop.permute.xlu1 %2021  ;;  %v2020_v8 = vpop.permute.xlu0 %2019 }
 0x105   : > { %2072 = vmatpush1.bf16.msra.mxu0 %v2042_v6  ;;  %2103 = vmatprep.mubr.bf16.mxu0 %v6018_v0  ;;  %v2035_v10 = vsel %vm2027_vm7, %v2020_v8, %v2022_v7  ;;  %v2034_v29 = vsel %vm2027_vm7, %v2018_v63, %v2020_v8 }
 0x106   : > { %5776 = vmatprep.subr.msk.bf16.mxu0 %vm333_vm1, %v2033_v5  ;;  %v2060_v33 = vsel %vm333_vm1, %v2034_v29, 0 }
 0x108   : > { %5770 = vmatmul.mubr.msk.bf16.vlgmr.msra.gmra.mrb[56].mxu1 %vm329_vm2, %v5749_v53  ;;  %v2026_v12 = vpop.permute.xlu1 %2025  ;;  %v2024_v13 = vpop.permute.xlu0 %2023 }
 0x109   : > { %2113 = vmatpush1.bf16.msra.mxu1 %v2048_v11  ;;  %2144 = vmatprep.mubr.bf16.mxu1 %v6018_v0  ;;  %v2037_v17 = vsel %vm2027_vm7, %v2024_v13, %v2026_v12  ;;  %v2036_v36 = vsel %vm2027_vm7, %v2022_v7, %v2024_v13 }
 0x10a   : > { %5778 = vmatprep.subr.msk.bf16.mxu1 %vm333_vm1, %v2035_v10  ;;  %v2066_v37 = vsel %vm333_vm1, %v2036_v36, 0 }
 0x10c   : > { %5773 = vmatmul.mubr.msk.bf16.vlgmr.msra.gmra.mrb[60].mxu0 %vm329_vm2, %v5771_v15  ;;  %v2291_v23 = vpop.permute.xlu1 %2290  ;;  %v2289_v26 = vpop.permute.xlu0 %2288 }
 0x10d   : > { %2154 = vmatpush1.bf16.msra.mxu0 %v2054_v20  ;;  %2185 = vmatprep.mubr.bf16.mxu0 %v6018_v0  ;;  %v2311_v19 = vsel %vm2310_vm8, %v2289_v26, %v2291_v23 }
 0x10e   : > { %5780 = vmatprep.subr.msk.bf16.mxu0 %vm333_vm1, %v2037_v17  ;;  %v2325_v22 = vsel %vm333_vm1, %v2311_v19, 0 }
 0x110   : > { %5775 = vmatmul.mubr.msk.bf16.vlgmr.msra.gmra.mrb[60].mxu1 %vm329_vm2, %v5771_v15  ;;  %v2295_v34 = vpop.permute.xlu1 %2294  ;;  %v2293_v35 = vpop.permute.xlu0 %2292 }
 0x111   : > { %2195 = vmatpush1.bf16.msra.mxu1 %v2060_v33  ;;  %2226 = vmatprep.mubr.bf16.mxu1 %v6018_v0  ;;  %v2312_v18 = vsel %vm2310_vm8, %v2291_v23, %v2293_v35  ;;  %v2313_v24 = vsel %vm2310_vm8, %v2293_v35, %v2295_v34 }
 0x112   : > { %5783 = vmatprep.subr.msk.bf16.mxu1 %vm333_vm1, %v2312_v18  ;;  %v2331_v27 = vsel %vm333_vm1, %v2313_v24, 0 }
 0x114   : > { %5777 = vmatmul.mubr.msk.bf16.vlgmr.msra.gmra.mrb[64].mxu0 %vm329_vm2, %v5771_v15  ;;  %v2299_v38 = vpop.permute.xlu1 %2298  ;;  %v2297_v21 = vpop.permute.xlu0 %2296 }
 0x115   : > { %2236 = vmatpush1.bf16.msra.mxu0 %v2066_v37  ;;  %2267 = vmatprep.mubr.bf16.mxu0 %v6018_v0  ;;  %v2314_v39 = vsel %vm2310_vm8, %v2295_v34, %v2297_v21  ;;  %v2315_v42 = vsel %vm2310_vm8, %v2297_v21, %v2299_v38 }
 0x116   : > { %5785 = vmatprep.subr.msk.bf16.mxu0 %vm333_vm1, %v2314_v39  ;;  %v2337_v45 = vsel %vm333_vm1, %v2315_v42, 0 }
 0x118   : > { %5779 = vmatmul.mubr.msk.bf16.vlgmr.msra.gmra.mrb[64].mxu1 %vm329_vm2, %v5771_v15  ;;  %v2303_v40 = vpop.permute.xlu1 %2302  ;;  %v2301_v41 = vpop.permute.xlu0 %2300 }
 0x119   : > { %2355 = vmatpush1.bf16.msra.mxu1 %v2325_v22  ;;  %2386 = vmatprep.mubr.bf16.mxu1 %v6018_v0  ;;  %v2316_v25 = vsel %vm2310_vm8, %v2299_v38, %v2301_v41  ;;  %v2317_v46 = vsel %vm2310_vm8, %v2301_v41, %v2303_v40 }
 0x11a   : > { %5787 = vmatprep.subr.msk.bf16.mxu1 %vm333_vm1, %v2316_v25  ;;  %v2343_v49 = vsel %vm333_vm1, %v2317_v46, 0 }
 0x11c   : > { %5781 = vmatmul.mubr.msk.bf16.vlgmr.msra.gmra.mrb[68].mxu0 %vm329_vm2, %v5771_v15  ;;  %v2307_v43 = vpop.permute.xlu1 %2306  ;;  %v2305_v28 = vpop.permute.xlu0 %2304 }
 0x11d   : > { %2396 = vmatpush1.bf16.msra.mxu0 %v2331_v27  ;;  %2427 = vmatprep.mubr.bf16.mxu0 %v6018_v0  ;;  %v2318_v44 = vsel %vm2310_vm8, %v2303_v40, %v2305_v28  ;;  %v2319_v50 = vsel %vm2310_vm8, %v2305_v28, %v2307_v43 }
 0x11e   : > { %5789 = vmatprep.subr.msk.bf16.mxu0 %vm333_vm1, %v2318_v44  ;;  %v2349_v54 = vsel %vm333_vm1, %v2319_v50, 0 }
 0x120   : > { %5784 = vmatmul.mubr.msk.bf16.vlgmr.msra.gmra.mrb[68].mxu1 %vm329_vm2, %v5782_v30  ;;  %v2572_v47 = vpop.permute.xlu1 %2571  ;;  %v2309_v31 = vpop.permute.xlu0 %2308 }
 0x121   : > { %2437 = vmatpush1.bf16.msra.mxu1 %v2337_v45  ;;  %v2320_v48 = vsel %vm2310_vm8, %v2307_v43, %v2309_v31  ;;  %2468 = vmatprep.mubr.bf16.mxu1 %v6018_v0 }
 0x122   : > { %5791 = vmatprep.subr.msk.bf16.mxu1 %vm333_vm1, %v2320_v48 }
 0x124   : > { %5786 = vmatmul.mubr.msk.bf16.vlgmr.msra.gmra.mrb[72].mxu0 %vm329_vm2, %v5782_v30  ;;  %v2576_v51 = vpop.permute.xlu1 %2575  ;;  %v2574_v52 = vpop.permute.xlu0 %2573 }
 0x125   : > { %2478 = vmatpush1.bf16.msra.mxu0 %v2343_v49  ;;  %2509 = vmatprep.mubr.bf16.mxu0 %v6018_v0  ;;  %v2595_v53 = vsel %vm2593_vm9, %v2574_v52, %v2576_v51  ;;  %v2594_v55 = vsel %vm2593_vm9, %v2572_v47, %v2574_v52 }
 0x126   : > { %5794 = vmatprep.subr.msk.bf16.mxu0 %vm333_vm1, %v2595_v53  ;;  %v2608_v59 = vsel %vm333_vm1, %v2594_v55, 0 }
 0x128   : > { %5788 = vmatmul.mubr.msk.bf16.vlgmr.msra.gmra.mrb[72].mxu1 %vm329_vm2, %v5782_v30  ;;  %v2580_v56 = vpop.permute.xlu1 %2579  ;;  %v2578_v57 = vpop.permute.xlu0 %2577 }
 0x129   : > { %2519 = vmatpush1.bf16.msra.mxu1 %v2349_v54  ;;  %v2597_v58 = vsel %vm2593_vm9, %v2578_v57, %v2580_v56  ;;  %2550 = vmatprep.mubr.bf16.mxu1 %v6018_v0  ;;  %v2596_v60 = vsel %vm2593_vm9, %v2576_v51, %v2578_v57 }
 0x12a   : > { %5796 = vmatprep.subr.msk.bf16.mxu1 %vm333_vm1, %v2597_v58  ;;  %v2614_v63 = vsel %vm333_vm1, %v2596_v60, 0 }
 0x12c   : > { %5790 = vmatmul.mubr.msk.bf16.vlgmr.msra.gmra.mrb[76].mxu0 %vm329_vm2, %v5782_v30  ;;  %v2584_v32 = vpop.permute.xlu1 %2583  ;;  %v2582_v61 = vpop.permute.xlu0 %2581 }
 0x12d   : > { %2638 = vmatpush1.bf16.msra.mxu0 %v2608_v59  ;;  %2669 = vmatprep.mubr.bf16.mxu0 %v6018_v0  ;;  %v2599_v62 = vsel %vm2593_vm9, %v2582_v61, %v2584_v32  ;;  %v2598_v1 = vsel %vm2593_vm9, %v2580_v56, %v2582_v61 }
 0x12e   : > { %5798 = vmatprep.subr.msk.bf16.mxu0 %vm333_vm1, %v2599_v62  ;;  %v2620_v6 = vsel %vm333_vm1, %v2598_v1, 0 }
 0x130   : > { %5792 = vmatmul.mubr.msk.bf16.vlgmr.msra.gmra.mrb[76].mxu1 %vm329_vm2, %v5782_v30  ;;  %v2588_v2 = vpop.permute.xlu1 %2587  ;;  %v2586_v3 = vpop.permute.xlu0 %2585 }
 0x131   : > { %2679 = vmatpush1.bf16.msra.mxu1 %v2614_v63  ;;  %2710 = vmatprep.mubr.bf16.mxu1 %v6018_v0  ;;  %v2601_v5 = vsel %vm2593_vm9, %v2586_v3, %v2588_v2  ;;  %v2600_v7 = vsel %vm2593_vm9, %v2584_v32, %v2586_v3 }
 0x132   : > { %5800 = vmatprep.subr.msk.bf16.mxu1 %vm333_vm1, %v2601_v5  ;;  %v2626_v11 = vsel %vm333_vm1, %v2600_v7, 0 }
 0x134   : > { %5795 = vmatmul.mubr.msk.bf16.vlgmr.msra.gmra.mrb[80].mxu0 %vm329_vm2, %v5793_v4  ;;  %v2592_v8 = vpop.permute.xlu1 %2591  ;;  %v2590_v9 = vpop.permute.xlu0 %2589 }
 0x135   : > { %2720 = vmatpush1.bf16.msra.mxu0 %v2620_v6  ;;  %2751 = vmatprep.mubr.bf16.mxu0 %v6018_v0  ;;  %v2603_v10 = vsel %vm2593_vm9, %v2590_v9, %v2592_v8  ;;  %v2602_v12 = vsel %vm2593_vm9, %v2588_v2, %v2590_v9 }
 0x136   : > { %5802 = vmatprep.subr.msk.bf16.mxu0 %vm333_vm1, %v2603_v10  ;;  %v2632_v13 = vsel %vm333_vm1, %v2602_v12, 0 }
 0x138   : > { %5797 = vmatmul.mubr.msk.bf16.vlgmr.msra.gmra.mrb[80].mxu1 %vm329_vm2, %v5793_v4 }
 0x139   : > { %2761 = vmatpush1.bf16.msra.mxu1 %v2626_v11  ;;  %2792 = vmatprep.mubr.bf16.mxu1 %v6018_v0 }
 0x13c   : > { %5799 = vmatmul.mubr.msk.bf16.vlgmr.msra.gmra.mrb[84].mxu0 %vm329_vm2, %v5793_v4 }
 0x13d   : > { %2802 = vmatpush1.bf16.msra.mxu0 %v2632_v13  ;;  %2833 = vmatprep.mubr.bf16.mxu0 %v6018_v0 }
 0x140   : > { %5801 = vmatmul.mubr.msk.bf16.vlgmr.msra.gmra.mrb[84].mxu1 %vm329_vm2, %v5793_v4 }
 0x141   : > { %3118 = vmatprep.mubr.bf16.mxu1 %v6018_v0 }
 0x144   : > { %5803 = vmatmul.mubr.msk.bf16.vlgmr.msra.gmra.mrb[88].mxu0 %vm329_vm2, %v5793_v4 }
 0x145   : > { %3159 = vmatprep.mubr.bf16.mxu0 %v6018_v0 }
 0x163   : > { %v398_v14 = vpop.f32.mrb[0].mxu0 }
 0x164   : > { %v400_v15 = vpop.f32.mrb[1].mxu0 }
 0x165   : > { %v402_v16 = vpop.f32.mrb[2].mxu0 }
 0x166   : > { %v403_v17 = vpop.f32.mrb[3].mxu0 }
 0x167   : > { %v439_v20 = vpop.f32.mrb[0].mxu1 }
 0x168   : > { %v441_v23 = vpop.f32.mrb[1].mxu1 }
 0x169   : > { %v443_v26 = vpop.f32.mrb[2].mxu1 }
 0x16a   : > { %v444_v29 = vpop.f32.mrb[3].mxu1 }
 0x16b   : > { %v480_v33 = vpop.f32.mrb[4].mxu0 }
 0x16c   : > { %v482_v34 = vpop.f32.mrb[5].mxu0 }
 0x16d   : > { %v484_v35 = vpop.f32.mrb[6].mxu0 }
 0x16e   : > { %v485_v36 = vpop.f32.mrb[7].mxu0 }
 0x16f   : > { %v521_v18 = vpop.f32.mrb[4].mxu1 }
 0x170   : > { %v523_v19 = vpop.f32.mrb[5].mxu1 }
 0x171   : > { %v525_v37 = vpop.f32.mrb[6].mxu1 }
 0x172   : > { %v526_v38 = vpop.f32.mrb[7].mxu1 }
 0x173   : > { %v562_v21 = vpop.f32.mrb[8].mxu0 }
 0x174   : > { %v564_v39 = vpop.f32.mrb[9].mxu0 }
 0x175   : > { %v566_v22 = vpop.f32.mrb[10].mxu0 }
 0x176   : > { %v567_v24 = vpop.f32.mrb[11].mxu0 }
 0x177   : > { %v669_v40 = vpop.f32.mrb[8].mxu1 }
 0x178   : > { %v670_v41 = vadd.f32 %v669_v40, %v398_v14  ;;  %v671_v25 = vpop.f32.mrb[9].mxu1 }
 0x179   : > { %v672_v27 = vadd.f32 %v671_v25, %v400_v15  ;;  %v673_v42 = vpop.f32.mrb[10].mxu1 }
 0x17a   : > { %v674_v43 = vpop.f32.mrb[11].mxu1 }
 0x17b   : > { %v710_v28 = vpop.f32.mrb[12].mxu0 }
 0x17c   : > { %v711_v30 = vadd.f32 %v710_v28, %v439_v20  ;;  %v712_v44 = vpop.f32.mrb[13].mxu0 }
 0x17d   : > { %v713_v45 = vadd.f32 %v712_v44, %v441_v23  ;;  %v714_v46 = vpop.f32.mrb[14].mxu0 }
 0x17e   : > { %v715_v47 = vpop.f32.mrb[15].mxu0 }
 0x17f   : > { %v751_v31 = vpop.f32.mrb[12].mxu1 }
 0x180   : > { %v752_v48 = vadd.f32 %v751_v31, %v480_v33  ;;  %v753_v49 = vpop.f32.mrb[13].mxu1 }
 0x181   : > { %v754_v50 = vadd.f32 %v753_v49, %v482_v34  ;;  %v755_v51 = vpop.f32.mrb[14].mxu1 }
 0x182   : > { %v756_v52 = vpop.f32.mrb[15].mxu1 }
 0x183   : > { %v792_v53 = vpop.f32.mrb[16].mxu0 }
 0x184   : > { %v793_v54 = vadd.f32 %v792_v53, %v521_v18  ;;  %v794_v55 = vpop.f32.mrb[17].mxu0 }
 0x185   : > { %v795_v56 = vadd.f32 %v794_v55, %v523_v19  ;;  %v796_v57 = vpop.f32.mrb[18].mxu0 }
 0x186   : > { %v797_v58 = vpop.f32.mrb[19].mxu0 }
 0x187   : > { %v833_v59 = vpop.f32.mrb[16].mxu1 }
 0x188   : > { %v834_v60 = vadd.f32 %v833_v59, %v562_v21  ;;  %v835_v32 = vpop.f32.mrb[17].mxu1 }
 0x189   : > { %v836_v61 = vadd.f32 %v835_v32, %v564_v39  ;;  %v837_v62 = vpop.f32.mrb[18].mxu1 }
 0x18a   : > { %v838_v63 = vpop.f32.mrb[19].mxu1 }
 0x18f   : > { %v942_v1 = vpop.f32.mrb[20].mxu0 }
 0x190   : > { %v1113_v2 = vadd.f32 %v942_v1, %v670_v41  ;;  %v944_v3 = vpop.f32.mrb[21].mxu0 }
 0x191   : > { %v1114_v4 = vadd.f32 %v944_v3, %v672_v27  ;;  %v946_v5 = vpop.f32.mrb[22].mxu0 }
 0x192   : > { %v947_v6 = vpop.f32.mrb[23].mxu0 }
 0x193   : > { %v983_v7 = vpop.f32.mrb[20].mxu1 }
 0x194   : > { %v1115_v8 = vadd.f32 %v983_v7, %v711_v30  ;;  %v985_v9 = vpop.f32.mrb[21].mxu1 }
 0x195   : > { %v1116_v10 = vadd.f32 %v985_v9, %v713_v45  ;;  %v987_v11 = vpop.f32.mrb[22].mxu1 }
 0x196   : > { %v988_v12 = vpop.f32.mrb[23].mxu1 }
 0x197   : > { %v1024_v13 = vpop.f32.mrb[24].mxu0 }
 0x198   : > { %v1117_v14 = vadd.f32 %v1024_v13, %v752_v48  ;;  %v1026_v15 = vpop.f32.mrb[25].mxu0 }
 0x199   : > { %v1118_v16 = vadd.f32 %v1026_v15, %v754_v50  ;;  %v1028_v17 = vpop.f32.mrb[26].mxu0 }
 0x19a   : > { %v1029_v20 = vpop.f32.mrb[27].mxu0 }
 0x19b   : > { %v1065_v23 = vpop.f32.mrb[24].mxu1 }
 0x19c   : > { %v1119_v26 = vadd.f32 %v1065_v23, %v793_v54  ;;  %v1067_v29 = vpop.f32.mrb[25].mxu1 }
 0x19d   : > { %v1120_v33 = vadd.f32 %v1067_v29, %v795_v56  ;;  %v1069_v34 = vpop.f32.mrb[26].mxu1 }
 0x19e   : > { %v1070_v35 = vpop.f32.mrb[27].mxu1 }
 0x19f   : > { %v1106_v36 = vpop.f32.mrb[28].mxu0 }
 0x1a0   : > { %v1121_v18 = vadd.f32 %v1106_v36, %v834_v60  ;;  %v1108_v19 = vpop.f32.mrb[29].mxu0 }
 0x1a1   : > { %v1122_v37 = vadd.f32 %v1108_v19, %v836_v61  ;;  %v1110_v38 = vpop.f32.mrb[30].mxu0 }
 0x1a2   : > { %v1111_v21 = vpop.f32.mrb[31].mxu0 }
 0x1a3   : > { %v1225_v39 = vpop.f32.mrb[28].mxu1 }
 0x1a4   : > { %v1396_v22 = vadd.f32 %v1225_v39, %v1113_v2  ;;  %v1227_v24 = vpop.f32.mrb[29].mxu1 }
 0x1a5   : > { %v1397_v40 = vadd.f32 %v1227_v24, %v1114_v4  ;;  %v1229_v41 = vpop.f32.mrb[30].mxu1 }
 0x1a6   : > { %v1230_v25 = vpop.f32.mrb[31].mxu1 }
 0x1a7   : > { %v1266_v27 = vpop.f32.mrb[32].mxu0 }
 0x1a8   : > { %v1398_v42 = vadd.f32 %v1266_v27, %v1115_v8  ;;  %v1268_v43 = vpop.f32.mrb[33].mxu0 }
 0x1a9   : > { %v1399_v28 = vadd.f32 %v1268_v43, %v1116_v10  ;;  %v1270_v30 = vpop.f32.mrb[34].mxu0 }
 0x1aa   : > { %v1271_v44 = vpop.f32.mrb[35].mxu0 }
 0x1ab   : > { %v1307_v45 = vpop.f32.mrb[32].mxu1 }
 0x1ac   : > { %v1400_v46 = vadd.f32 %v1307_v45, %v1117_v14  ;;  %v1309_v47 = vpop.f32.mrb[33].mxu1 }
 0x1ad   : > { %v1401_v31 = vadd.f32 %v1309_v47, %v1118_v16  ;;  %v1311_v48 = vpop.f32.mrb[34].mxu1 }
 0x1ae   : > { %v1312_v49 = vpop.f32.mrb[35].mxu1 }
 0x1af   : > { %v1348_v50 = vpop.f32.mrb[36].mxu0 }
 0x1b0   : > { %v1402_v51 = vadd.f32 %v1348_v50, %v1119_v26  ;;  %v1350_v52 = vpop.f32.mrb[37].mxu0 }
 0x1b1   : > { %v1403_v53 = vadd.f32 %v1350_v52, %v1120_v33  ;;  %v1352_v54 = vpop.f32.mrb[38].mxu0 }
 0x1b2   : > { %v1353_v55 = vpop.f32.mrb[39].mxu0 }
 0x1b3   : > { %v1389_v56 = vpop.f32.mrb[36].mxu1 }
 0x1b4   : > { %v1404_v57 = vadd.f32 %v1389_v56, %v1121_v18  ;;  %v1391_v58 = vpop.f32.mrb[37].mxu1 }
 0x1b5   : > { %v1405_v59 = vadd.f32 %v1391_v58, %v1122_v37  ;;  %v1393_v60 = vpop.f32.mrb[38].mxu1 }
 0x1b6   : > { %v1394_v32 = vpop.f32.mrb[39].mxu1 }
 0x1b7   : > { %v1505_v61 = vpop.f32.mrb[40].mxu0 }
 0x1b8   : > { %v1676_v62 = vadd.f32 %v1505_v61, %v1396_v22  ;;  %v1507_v63 = vpop.f32.mrb[41].mxu0 }
 0x1b9   : > { %v1677_v1 = vadd.f32 %v1507_v63, %v1397_v40  ;;  %v1509_v2 = vpop.f32.mrb[42].mxu0 }
 0x1ba   : > { %v1510_v3 = vpop.f32.mrb[43].mxu0 }
 0x1bb   : > { %v1546_v4 = vpop.f32.mrb[40].mxu1 }
 0x1bc   : > { %v1678_v5 = vadd.f32 %v1546_v4, %v1398_v42  ;;  %v1548_v6 = vpop.f32.mrb[41].mxu1 }
 0x1bd   : > { %v1679_v7 = vadd.f32 %v1548_v6, %v1399_v28  ;;  %v1550_v8 = vpop.f32.mrb[42].mxu1 }
 0x1be   : > { %v1551_v9 = vpop.f32.mrb[43].mxu1 }
 0x1bf   : > { %v1587_v10 = vpop.f32.mrb[44].mxu0 }
 0x1c0   : > { %v1680_v11 = vadd.f32 %v1587_v10, %v1400_v46  ;;  %v1589_v12 = vpop.f32.mrb[45].mxu0 }
 0x1c1   : > { %v1681_v13 = vadd.f32 %v1589_v12, %v1401_v31  ;;  %v1591_v14 = vpop.f32.mrb[46].mxu0 }
 0x1c2   : > { %v1592_v15 = vpop.f32.mrb[47].mxu0 }
 0x1c3   : > { %v1628_v16 = vpop.f32.mrb[44].mxu1 }
 0x1c4   : > { %v1682_v17 = vadd.f32 %v1628_v16, %v1402_v51  ;;  %v1630_v20 = vpop.f32.mrb[45].mxu1 }
 0x1c5   : > { %v1683_v23 = vadd.f32 %v1630_v20, %v1403_v53  ;;  %v1632_v26 = vpop.f32.mrb[46].mxu1 }
 0x1c6   : > { %v1633_v29 = vpop.f32.mrb[47].mxu1 }
 0x1c7   : > { %v1669_v33 = vpop.f32.mrb[48].mxu0 }
 0x1c8   : > { %v1684_v34 = vadd.f32 %v1669_v33, %v1404_v57  ;;  %v1671_v35 = vpop.f32.mrb[49].mxu0 }
 0x1c9   : > { %v1685_v36 = vadd.f32 %v1671_v35, %v1405_v59  ;;  %v1673_v18 = vpop.f32.mrb[50].mxu0 }
 0x1ca   : > { %v1674_v19 = vpop.f32.mrb[51].mxu0 }
 0x1cb   : > { %v1822_v37 = vpop.f32.mrb[48].mxu1 }
 0x1cc   : > { %v1993_v38 = vadd.f32 %v1822_v37, %v1676_v62  ;;  %v1824_v21 = vpop.f32.mrb[49].mxu1 }
 0x1cd   : > { %v1994_v39 = vadd.f32 %v1824_v21, %v1677_v1  ;;  %v1826_v22 = vpop.f32.mrb[50].mxu1 }
 0x1ce   : > { %v1827_v24 = vpop.f32.mrb[51].mxu1 }
 0x1cf   : > { %v1863_v40 = vpop.f32.mrb[52].mxu0 }
 0x1d0   : > { %v1995_v41 = vadd.f32 %v1863_v40, %v1678_v5  ;;  %v1865_v25 = vpop.f32.mrb[53].mxu0 }
 0x1d1   : > { %v1996_v27 = vadd.f32 %v1865_v25, %v1679_v7  ;;  %v1867_v42 = vpop.f32.mrb[54].mxu0 }
 0x1d2   : > { %v1868_v43 = vpop.f32.mrb[55].mxu0 }
 0x1d3   : > { %v1904_v28 = vpop.f32.mrb[52].mxu1 }
 0x1d4   : > { %v1997_v30 = vadd.f32 %v1904_v28, %v1680_v11  ;;  %v1906_v44 = vpop.f32.mrb[53].mxu1 }
 0x1d5   : > { %v1998_v45 = vadd.f32 %v1906_v44, %v1681_v13  ;;  %v1908_v46 = vpop.f32.mrb[54].mxu1 }
 0x1d6   : > { %v1909_v47 = vpop.f32.mrb[55].mxu1 }
 0x1d7   : > { %v1945_v31 = vpop.f32.mrb[56].mxu0 }
 0x1d8   : > { %v1999_v48 = vadd.f32 %v1945_v31, %v1682_v17  ;;  %v1947_v49 = vpop.f32.mrb[57].mxu0 }
 0x1d9   : > { %v2000_v50 = vadd.f32 %v1947_v49, %v1683_v23  ;;  %v1949_v51 = vpop.f32.mrb[58].mxu0 }
 0x1da   : > { %v1950_v52 = vpop.f32.mrb[59].mxu0 }
 0x1db   : > { %v1986_v53 = vpop.f32.mrb[56].mxu1 }
 0x1dc   : > { %v2001_v54 = vadd.f32 %v1986_v53, %v1684_v34  ;;  %v1988_v55 = vpop.f32.mrb[57].mxu1 }
 0x1dd   : > { %v2002_v56 = vadd.f32 %v1988_v55, %v1685_v36  ;;  %v1990_v57 = vpop.f32.mrb[58].mxu1 }
 0x1de   : > { %v1991_v58 = vpop.f32.mrb[59].mxu1 }
 0x1df   : > { %v2105_v59 = vpop.f32.mrb[60].mxu0 }
 0x1e0   : > { %v2276_v60 = vadd.f32 %v2105_v59, %v1993_v38  ;;  %v2107_v32 = vpop.f32.mrb[61].mxu0 }
 0x1e1   : > { %v2277_v61 = vadd.f32 %v2107_v32, %v1994_v39  ;;  %v2109_v62 = vpop.f32.mrb[62].mxu0  ;;  %v253_v32 = vld [vmem:[%s7182_s5] sm:$0xff] }
 0x1e2   : > { %v2110_v63 = vpop.f32.mrb[63].mxu0 }
 0x1e3   : > { %v2146_v1 = vpop.f32.mrb[60].mxu1 }
 0x1e4   : > { %v2278_v2 = vadd.f32 %v2146_v1, %v1995_v41  ;;  %v2148_v3 = vpop.f32.mrb[61].mxu1 }
 0x1e5   : > { %v2279_v4 = vadd.f32 %v2148_v3, %v1996_v27  ;;  %v2150_v5 = vpop.f32.mrb[62].mxu1 }
 0x1e6   : > { %v2151_v6 = vpop.f32.mrb[63].mxu1 }
 0x1e7   : > { %v2187_v7 = vpop.f32.mrb[64].mxu0 }
 0x1e8   : > { %v2280_v8 = vadd.f32 %v2187_v7, %v1997_v30  ;;  %v2189_v9 = vpop.f32.mrb[65].mxu0 }
 0x1e9   : > { %v2281_v10 = vadd.f32 %v2189_v9, %v1998_v45  ;;  %v2191_v11 = vpop.f32.mrb[66].mxu0  ;;  %v2879_v45 = vlaneseq }
 0x1ea   : > { %v2192_v12 = vpop.f32.mrb[67].mxu0 }
 0x1eb   : > { %v2228_v13 = vpop.f32.mrb[64].mxu1  ;;  %v6553_v51 = vshrl.u32 %v2879_v45, 7 }
 0x1ec   : > { %v2282_v14 = vadd.f32 %v2228_v13, %v1999_v48  ;;  %v2230_v15 = vpop.f32.mrb[65].mxu1 }
 0x1ed   : > { %v2283_v16 = vadd.f32 %v2230_v15, %v2000_v50  ;;  %v2232_v17 = vpop.f32.mrb[66].mxu1  ;;  %v2881_v58 = vsub.s32 0, %v6553_v51  ;;  %v2909_v45 = vsub.s32 7, %v6553_v51 }
 0x1ee   : > { %v2233_v20 = vpop.f32.mrb[67].mxu1 }
 0x1ef   : > { %v2269_v23 = vpop.f32.mrb[68].mxu0  ;;  %v6570_v6 = vrot.slane %v253_v32, %v2881_v58 }
 0x1f0   : > { %v2284_v26 = vadd.f32 %v2269_v23, %v2001_v54  ;;  %v2271_v29 = vpop.f32.mrb[69].mxu0 }
 0x1f1   : > { %v2285_v33 = vadd.f32 %v2271_v29, %v2002_v56  ;;  %v2273_v34 = vpop.f32.mrb[70].mxu0 }
 0x1f2   : > { %v2274_v35 = vpop.f32.mrb[71].mxu0 }
 0x1f3   : > { %v2388_v36 = vpop.f32.mrb[68].mxu1 }
 0x1f4   : > { %v2559_v18 = vadd.f32 %v2388_v36, %v2276_v60  ;;  %v2390_v19 = vpop.f32.mrb[69].mxu1  ;;  %v6560_v60 = vpop.permute.xlu0 %2854  ;;  %v2901_v36 = vsub.s32 5, %v6553_v51 }
 0x1f5   : > { %v2560_v37 = vadd.f32 %v2390_v19, %v2277_v61  ;;  %v2392_v38 = vpop.f32.mrb[70].mxu1  ;;  %v2885_v61 = vsub.s32 1, %v6553_v51 }
 0x1f6   : > { %v2393_v21 = vpop.f32.mrb[71].mxu1 }
 0x1f7   : > { %v2429_v39 = vpop.f32.mrb[72].mxu0 }
 0x1f8   : > { %v2561_v22 = vadd.f32 %v2429_v39, %v2278_v2  ;;  %v2431_v24 = vpop.f32.mrb[73].mxu0 }
 0x1f9   : > { %v2562_v40 = vadd.f32 %v2431_v24, %v2279_v4  ;;  %v2433_v41 = vpop.f32.mrb[74].mxu0  ;;  %v2889_v4 = vsub.s32 2, %v6553_v51 }
 0x1fa   : > { %v2434_v25 = vpop.f32.mrb[75].mxu0 }
 0x1fb   : > { %v2470_v27 = vpop.f32.mrb[72].mxu1  ;;  %v6579_v20 = vrot.slane %v253_v32, %v2889_v4 }
 0x1fc   : > { %v2563_v42 = vadd.f32 %v2470_v27, %v2280_v8  ;;  %v2472_v43 = vpop.f32.mrb[73].mxu1  ;;  %v2893_v8 = vsub.s32 3, %v6553_v51  ;;  %v2905_v27 = vsub.s32 6, %v6553_v51 }
 0x1fd   : > { %v2564_v28 = vadd.f32 %v2472_v43, %v2281_v10  ;;  %v2474_v30 = vpop.f32.mrb[74].mxu1  ;;  %v6576_v10 = vrot.slane %v253_v32, %v2885_v61 }
 0x1fe   : > { %v2475_v44 = vpop.f32.mrb[75].mxu1  ;;  %v6586_v34 = vrot.slane %v253_v32, %v2893_v8 }
 0x1ff   : > { %v2511_v46 = vpop.f32.mrb[76].mxu0 }
 0x200   : > { %v6549_v47 = vadd.f32 %v2511_v46, %v2282_v14  ;;  %v2513_v31 = vpop.f32.mrb[77].mxu0 }
 0x201   : > { %v6551_v48 = vadd.f32 %v2513_v31, %v2283_v16  ;;  %v2515_v49 = vpop.f32.mrb[78].mxu0 }
 0x202   : > { %v2516_v50 = vpop.f32.mrb[79].mxu0 }
 0x203   : > { %v2552_v52 = vpop.f32.mrb[76].mxu1 }
 0x204   : > { %v6555_v53 = vadd.f32 %v2552_v52, %v2284_v26  ;;  %v2554_v54 = vpop.f32.mrb[77].mxu1  ;;  %v2897_v26 = vsub.s32 4, %v6553_v51 }
 0x205   : > { %v6557_v55 = vadd.f32 %v2554_v54, %v2285_v33  ;;  %v2556_v56 = vpop.f32.mrb[78].mxu1 }
 0x206   : > { %v2557_v57 = vpop.f32.mrb[79].mxu1  ;;  %v6598_v25 = vrot.slane %v253_v32, %v2897_v26 }
 0x207   : > { %v2671_v59 = vpop.f32.mrb[80].mxu0 }
 0x208   : > { %v2842_v62 = vadd.f32 %v2671_v59, %v2559_v18  ;;  %v2673_v63 = vpop.f32.mrb[81].mxu0 }
 0x209   : > { %v2843_v1 = vadd.f32 %v2673_v63, %v2560_v37  ;;  %v2675_v2 = vpop.f32.mrb[82].mxu0 }
 0x20a   : > { %v2676_v3 = vpop.f32.mrb[83].mxu0  ;;  %v2857_v5 = vadd.f32 %v6560_v60, %v2842_v62  ;;  %v6616_v62 = vrot.slane %v253_v32, %v2905_v27  ;;  %v6622_v2 = vrot.slane %v253_v32, %v2909_v45 }
 0x20b   : > { %v2712_v7 = vpop.f32.mrb[80].mxu1  ;;  %v2858_v9 = vadd.f32 %v6560_v60, %v2843_v1 }
 0x20c   : > { %v2844_v11 = vadd.f32 %v2712_v7, %v2561_v22  ;;  %v2714_v12 = vpop.f32.mrb[81].mxu1  ;;  %v2867_v13 = vmax.f32 %v2857_v5, 0.0 }
 0x20d   : > { %v2845_v14 = vadd.f32 %v2714_v12, %v2562_v40  ;;  %v2716_v15 = vpop.f32.mrb[82].mxu1  ;;  %v2868_v16 = vmax.f32 %v2858_v9, 0.0 }
 0x20e   : > { %v2859_v17 = vadd.f32 %v6560_v60, %v2844_v11  ;;  %v2717_v23 = vpop.f32.mrb[83].mxu1  ;;  %v6583_v29 = vmul.f32 %v6570_v6, %v2867_v13 }
 0x20f   : > { %v2860_v33 = vadd.f32 %v6560_v60, %v2845_v14  ;;  %v2753_v35 = vpop.f32.mrb[84].mxu0  ;;  %v6590_v18 = vmul.f32 %v6576_v10, %v2868_v16 }
 0x210   : > { %v2869_v19 = vmax.f32 %v2859_v17, 0.0  ;;  %v2846_v37 = vadd.f32 %v2753_v35, %v2563_v42  ;;  %v2755_v38 = vpop.f32.mrb[85].mxu0  ;;  %v6702_v45 = vpack.c.bf16 %v6583_v29, %v6583_v29 }
 0x211   : > { %v2870_v21 = vmax.f32 %v2860_v33, 0.0  ;;  %v2847_v39 = vadd.f32 %v2755_v38, %v2564_v28  ;;  %v2757_v22 = vpop.f32.mrb[86].mxu0  ;;  %v5941_v24 = vpack.c.bf16 %v6590_v18, %v6583_v29  ;;  %v6605_v28 = vrot.slane %v253_v32, %v2901_v36 }
 0x212   : > { %v6595_v40 = vmul.f32 %v6579_v20, %v2869_v19  ;;  %v2861_v41 = vadd.f32 %v6560_v60, %v2846_v37  ;;  %v2758_v43 = vpop.f32.mrb[87].mxu0 }
 0x213   : > { %v6602_v30 = vmul.f32 %v6586_v34, %v2870_v21  ;;  %v2862_v42 = vadd.f32 %v6560_v60, %v2847_v39  ;;  %v2794_v44 = vpop.f32.mrb[84].mxu1  ;;  %2979 = vst [vmem:[#allocation2 + $0x4] sm:$0xff] %v5941_v24 }
 0x214   : > { %v2871_v46 = vmax.f32 %v2861_v41, 0.0  ;;  %v2848_v31 = vadd.f32 %v2794_v44, %v6549_v47  ;;  %v2796_v49 = vpop.f32.mrb[85].mxu1 }
 0x215   : > { %v5942_v50 = vpack.c.bf16 %v6602_v30, %v6595_v40  ;;  %v2872_v52 = vmax.f32 %v2862_v42, 0.0  ;;  %v2849_v54 = vadd.f32 %v2796_v49, %v6551_v48  ;;  %v2798_v56 = vpop.f32.mrb[86].mxu1  ;;  %v254_v48 = vld [vmem:[%s7182_s5 + $0x8] sm:$0x3]  ;;  %v6725_v49 = vpack.c.bf16 %v6602_v30, %v6602_v30  ;;  %v6743_v30 = vld [vmem:[#allocation2 + $0x2c] ss:$0 sps:$4 sm:$0xff]  }
 0x216   : > { %v6613_v57 = vmul.f32 %v6598_v25, %v2871_v46  ;;  %v2863_v59 = vadd.f32 %v6560_v60, %v2848_v31  ;;  %v2799_v63 = vpop.f32.mrb[87].mxu1  ;;  %v6637_v14 = vrot.slane %v254_v48, %v2881_v58  ;;  %v6709_v46 = vpack.c.bf16 %v6595_v40, %v6595_v40 }
 0x217   : > { %2980 = vst [vmem:[#allocation2 + $0xc] sm:$0xff] %v5942_v50  ;;  %v6619_v1 = vmul.f32 %v6605_v28, %v2872_v52  ;;  %v2864_v47 = vadd.f32 %v6560_v60, %v2849_v54  ;;  %v2835_v3 = vpop.f32.mrb[88].mxu0  ;;  %v6713_v31 = vpack.c.bf16 %v6590_v18, %v6590_v18 }
 0x218   : > { %v2873_v4 = vmax.f32 %v2863_v59, 0.0  ;;  %v2850_v5 = vadd.f32 %v2835_v3, %v6555_v53  ;;  %v2837_v7 = vpop.f32.mrb[89].mxu0  ;;  %v6721_v29 = vpack.c.bf16 %v6613_v57, %v6613_v57 }
 0x219   : > { %v5943_v8 = vpack.c.bf16 %v6619_v1, %v6613_v57  ;;  %v2874_v9 = vmax.f32 %v2864_v47, 0.0  ;;  %v2851_v11 = vadd.f32 %v2837_v7, %v6557_v55  ;;  %v2839_v12 = vpop.f32.mrb[90].mxu0  ;;  %v6645_v55 = vrot.slane %v254_v48, %v2885_v61 }
 0x21a   : > { %v6632_v13 = vmul.f32 %v6616_v62, %v2873_v4  ;;  %v2865_v32 = vadd.f32 %v6560_v60, %v2850_v5  ;;  %v2984_v15 = vld [vmem:[#allocation2] sm:$0xff]  ;;  %v2840_v16 = vpop.f32.mrb[91].mxu0  ;;  %v6737_v40 = vpack.c.bf16 %v6619_v1, %v6619_v1 }
 0x21b   : > { %2981 = vst [vmem:[#allocation2 + $0x14] sm:$0xff] %v5943_v8  ;;  %v6640_v53 = vmul.f32 %v6622_v2, %v2874_v9  ;;  %v2866_v17 = vadd.f32 %v6560_v60, %v2851_v11  ;;  %v5810_v23 = vcombine.low %v2984_v15, %v2984_v15  ;;  %v5811_v51 = vcombine.high %v2984_v15, %v2984_v15  ;;  %v6784_v4 = vld [vmem:[%s7180_s3 + $0x4] sm:$0xf] }
 0x21c   : > { %v2875_v26 = vmax.f32 %v2865_v32, 0.0  ;;  %v6733_v18 = vpack.c.bf16 %v6632_v13, %v6632_v13 }
 0x21d   : > { %v5944_v33 = vpack.c.bf16 %v6640_v53, %v6632_v13  ;;  %v2876_v35 = vmax.f32 %v2866_v17, 0.0  ;;  %3021 = vrot.lane.b32.xlu1 %v5810_v23, %s6019_s27  ;;  %v6747_v50 = vpack.c.bf16 %v6640_v53, %v6640_v53 }
 0x21e   : > { %v6651_v58 = vmul.f32 %v6637_v14, %v2875_v26  ;;  %v2985_v36 = vld [vmem:[#allocation2 + $0x8] sm:$0xff] }
 0x21f   : > { %2982 = vst [vmem:[#allocation2 + $0x1c] sm:$0xff] %v5944_v33  ;;  %v6654_v19 = vmul.f32 %v6645_v55, %v2876_v35  ;;  %v5812_v60 = vcombine.low %v2985_v36, %v2985_v36  ;;  %v5813_v37 = vcombine.high %v2985_v36, %v2985_v36 }
 0x220   : > { %v6755_v52 = vpack.c.bf16 %v6651_v58, %v6651_v58 }
 0x221   : > { %v5945_v61 = vpack.c.bf16 %v6654_v19, %v6651_v58  ;;  %3025 = vrot.lane.b32.xlu0 %v5812_v60, %s6019_s27  ;;  %3023 = vrot.lane.b32.xlu1 %v5811_v51, %s6019_s27  ;;  %v6771_v59 = vpack.c.bf16 %v6654_v19, %v6654_v19 }
 0x222   : > { %v2986_v38 = vld [vmem:[#allocation2 + $0x10] sm:$0xff] }
 0x223   : > { %2983 = vst [vmem:[#allocation2 + $0x24] sm:$0xff] %v5945_v61  ;;  %v5814_v21 = vcombine.low %v2986_v38, %v2986_v38  ;;  %v5815_v27 = vcombine.high %v2986_v38, %v2986_v38 }
 0x225   : > { %3293 = vrot.lane.b32.xlu0 %v5811_v51, %s6020_s28  ;;  %3027 = vrot.lane.b32.xlu1 %v5813_v37, %s6019_s27 }
 0x226   : > { %v2987_v39 = vld [vmem:[#allocation2 + $0x18] sm:$0xff] }
 0x227   : > { %v5816_v22 = vcombine.low %v2987_v39, %v2987_v39  ;;  %v5817_v42 = vcombine.high %v2987_v39, %v2987_v39 }
 0x229   : > { %3029 = vrot.lane.b32.xlu0 %v5814_v21, %s6019_s27  ;;  %3291 = vrot.lane.b32.xlu1 %v5810_v23, %s6020_s28 }
 0x22a   : > { %v2988_v24 = vld [vmem:[#allocation2 + $0x20] sm:$0xff]  ;;  %v5996_v43 = vld [vmem:[#allocation2 + $0x28] ss:$0 sps:$4 sm:$0xff]  }
 0x22b   : > { %v5818_v41 = vcombine.low %v2988_v24, %v2988_v24  ;;  %v5819_v44 = vcombine.high %v2988_v24, %v2988_v24 }
 0x22d   : > { %3033 = vrot.lane.b32.xlu0 %v5816_v22, %s6019_s27  ;;  %3295 = vrot.lane.b32.xlu1 %v5812_v60, %s6020_s28 }
 0x231   : > { %3037 = vrot.lane.b32.xlu0 %v5818_v41, %s6019_s27  ;;  %3031 = vrot.lane.b32.xlu1 %v5815_v27, %s6019_s27 }
 0x235   : > { %3041 = vrot.lane.b32.xlu0 %v5996_v43, %s6019_s27  ;;  %3035 = vrot.lane.b32.xlu1 %v5817_v42, %s6019_s27 }
 0x239   : > { %3297 = vrot.lane.b32.xlu0 %v5813_v37, %s6020_s28  ;;  %3039 = vrot.lane.b32.xlu1 %v5819_v44, %s6019_s27 }
 0x23d   : > { %3301 = vrot.lane.b32.xlu0 %v5815_v27, %s6020_s28  ;;  %3299 = vrot.lane.b32.xlu1 %v5814_v21, %s6020_s28 }
 0x241   : > { %3305 = vrot.lane.b32.xlu0 %v5817_v42, %s6020_s28  ;;  %3303 = vrot.lane.b32.xlu1 %v5816_v22, %s6020_s28 }
 0x245   : > { %3563 = vrot.lane.b32.xlu0 %v5810_v23, %s6021_s29  ;;  %3565 = vrot.lane.b32.xlu1 %v5811_v51, %s6021_s29 }
 0x249   : > { %3567 = vrot.lane.b32.xlu0 %v5812_v60, %s6021_s29  ;;  %3307 = vrot.lane.b32.xlu1 %v5818_v41, %s6020_s28 }
 0x24d   : > { %3309 = vrot.lane.b32.xlu0 %v5819_v44, %s6020_s28  ;;  %3569 = vrot.lane.b32.xlu1 %v5813_v37, %s6021_s29 }
 0x251   : > { %3571 = vrot.lane.b32.xlu0 %v5814_v21, %s6021_s29  ;;  %3311 = vrot.lane.b32.xlu1 %v5996_v43, %s6020_s28  ;;  %s7144_s28 = scalar_lea.vmem %s7183_s6, %s5947_s19 }
 0x255   : > { %3575 = vrot.lane.b32.xlu0 %v5816_v22, %s6021_s29  ;;  %3573 = vrot.lane.b32.xlu1 %v5815_v27, %s6021_s29 }
 0x259   : > { %3579 = vrot.lane.b32.xlu0 %v5818_v41, %s6021_s29  ;;  %3577 = vrot.lane.b32.xlu1 %v5817_v42, %s6021_s29 }
 0x25d   : > { %3583 = vrot.lane.b32.xlu0 %v5996_v43, %s6021_s29  ;;  %3845 = vrot.lane.b32.xlu1 %v5810_v23, %s6022_s30 }
 0x261   : > { %3847 = vrot.lane.b32.xlu0 %v5811_v51, %s6022_s30  ;;  %3581 = vrot.lane.b32.xlu1 %v5819_v44, %s6021_s29 }
 0x265   : > { %3851 = vrot.lane.b32.xlu0 %v5813_v37, %s6022_s30  ;;  %3849 = vrot.lane.b32.xlu1 %v5812_v60, %s6022_s30 }
 0x269   : > { %3855 = vrot.lane.b32.xlu0 %v5815_v27, %s6022_s30  ;;  %3853 = vrot.lane.b32.xlu1 %v5814_v21, %s6022_s30 }
 0x26d   : > { %3859 = vrot.lane.b32.xlu0 %v5817_v42, %s6022_s30  ;;  %3857 = vrot.lane.b32.xlu1 %v5816_v22, %s6022_s30 }
 0x271   : > { %3863 = vrot.lane.b32.xlu0 %v5819_v44, %s6022_s30  ;;  %3861 = vrot.lane.b32.xlu1 %v5818_v41, %s6022_s30 }
 0x275   : > { %4441 = vrot.lane.b32.xlu0 %v6702_v45, %s6023_s7  ;;  %3865 = vrot.lane.b32.xlu1 %v5996_v43, %s6022_s30 }
 0x279   : > { %4445 = vrot.lane.b32.xlu0 %v6709_v46, %s6023_s7  ;;  %4443 = vrot.lane.b32.xlu1 %v6713_v31, %s6023_s7 }
 0x27d   : > { %4449 = vrot.lane.b32.xlu0 %v6721_v29, %s6023_s7  ;;  %4447 = vrot.lane.b32.xlu1 %v6725_v49, %s6023_s7 }
 0x281   : > { %4453 = vrot.lane.b32.xlu0 %v6733_v18, %s6023_s7  ;;  %4451 = vrot.lane.b32.xlu1 %v6737_v40, %s6023_s7 }
 0x285   : > { %4461 = vrot.lane.b32.xlu0 %v6743_v30, %s6023_s7  ;;  %4455 = vrot.lane.b32.xlu1 %v6747_v50, %s6023_s7 }
 0x289   : > { %4457 = vrot.lane.b32.xlu0 %v6755_v52, %s6023_s7  ;;  %4723 = vrot.lane.b32.xlu1 %v6702_v45, %s6024_s8 }
 0x28d   : > { %4725 = vrot.lane.b32.xlu0 %v6713_v31, %s6024_s8  ;;  %4727 = vrot.lane.b32.xlu1 %v6709_v46, %s6024_s8 }
 0x28f   : > { %v3022_v54 = vpop.permute.xlu1 %3021 }
 0x291   : > { %4729 = vrot.lane.b32.xlu0 %v6725_v49, %s6024_s8  ;;  %4731 = vrot.lane.b32.xlu1 %v6721_v29, %s6024_s8 }
 0x293   : > { %v3026_v56 = vpop.permute.xlu0 %3025  ;;  %v3024_v57 = vpop.permute.xlu1 %3023 }
 0x294   : > { %v3043_v63 = vsel %vm318_vm0, %v3022_v54, %v3024_v57  ;;  %v3044_v1 = vsel %vm318_vm0, %v3024_v57, %v3026_v56  ;;  %v2990_v54 = vld [vmem:[%s7180_s3] sm:$0xf] }
 0x295   : > { %v3057_v47 = vsel %vm333_vm1, %v3043_v63, 0  ;;  %4733 = vrot.lane.b32.xlu0 %v6737_v40, %s6024_s8  ;;  %4459 = vrot.lane.b32.xlu1 %v6771_v59, %s6023_s7 }
 0x296   : > { %5821 = vmatprep.subr.msk.bf16.mxu1 %vm333_vm1, %v3044_v1 }
 0x297   : > { %3087 = vmatpush1.bf16.msra.mxu1 %v3057_v47  ;;  %v3294_v48 = vpop.permute.xlu0 %3293  ;;  %v3028_v3 = vpop.permute.xlu1 %3027 }
 0x298   : > { %v3045_v5 = vsel %vm318_vm0, %v3026_v56, %v3028_v3 }
 0x299   : > { %4737 = vrot.lane.b32.xlu0 %v6747_v50, %s6024_s8  ;;  %4735 = vrot.lane.b32.xlu1 %v6733_v18, %s6024_s8  ;;  %v3063_v11 = vsel %vm333_vm1, %v3045_v5, 0 }
 0x29a   : > { %5822 = vmatmul.mubr.msk.bf16.vlgmr.msra.gmra.mrb[88].mxu1 %vm329_vm2, %v6784_v4 }
 0x29b   : > { %v3030_v7 = vpop.permute.xlu0 %3029  ;;  %v3292_v8 = vpop.permute.xlu1 %3291  ;;  %3200 = vmatprep.mubr.bf16.mxu1 %v6018_v0 }
 0x29c   : > { %v3046_v9 = vsel %vm318_vm0, %v3028_v3, %v3030_v7  ;;  %v3313_v36 = vsel %vm591_vm3, %v3292_v8, %v3294_v48 }
 0x29d   : > { %5005 = vrot.lane.b32.xlu0 %v6702_v45, %s6025_s11  ;;  %4743 = vrot.lane.b32.xlu1 %v6743_v30, %s6024_s8  ;;  %v3327_v21 = vsel %vm333_vm1, %v3313_v36, 0 }
 0x29e   : > { %5823 = vmatprep.subr.msk.bf16.mxu0 %vm333_vm1, %v3046_v9 }
 0x29f   : > { %3128 = vmatpush1.bf16.msra.mxu0 %v3063_v11  ;;  %v3034_v12 = vpop.permute.xlu0 %3033  ;;  %v3296_v13 = vpop.permute.xlu1 %3295 }
 0x2a0   : > { %v3314_v19 = vsel %vm591_vm3, %v3294_v48, %v3296_v13 }
 0x2a1   : > { %4741 = vrot.lane.b32.xlu0 %v6771_v59, %s6024_s8  ;;  %5007 = vrot.lane.b32.xlu1 %v6713_v31, %s6025_s11 }
 0x2a2   : > { %5824 = vmatmul.mubr.msk.bf16.vlgmr.msra.gmra.mrb[92].mxu0 %vm329_vm2, %v6784_v4 }
 0x2a3   : > { %v3038_v32 = vpop.permute.xlu0 %3037  ;;  %v3032_v15 = vpop.permute.xlu1 %3031  ;;  %3241 = vmatprep.mubr.bf16.mxu0 %v6018_v0 }
 0x2a4   : > { %v3047_v16 = vsel %vm318_vm0, %v3030_v7, %v3032_v15  ;;  %v3048_v53 = vsel %vm318_vm0, %v3032_v15, %v3034_v12 }
 0x2a5   : > { %v3069_v17 = vsel %vm333_vm1, %v3047_v16, 0  ;;  %5009 = vrot.lane.b32.xlu0 %v6709_v46, %s6025_s11  ;;  %4739 = vrot.lane.b32.xlu1 %v6755_v52, %s6024_s8 }
 0x2a6   : > { %5825 = vmatprep.subr.msk.bf16.mxu1 %vm333_vm1, %v3048_v53 }
 0x2a7   : > { %3169 = vmatpush1.bf16.msra.mxu1 %v3069_v17  ;;  %v3042_v23 = vpop.permute.xlu0 %3041  ;;  %v3036_v26 = vpop.permute.xlu1 %3035 }
 0x2a8   : > { %v3049_v33 = vsel %vm318_vm0, %v3034_v12, %v3036_v26  ;;  %v3050_v35 = vsel %vm318_vm0, %v3036_v26, %v3038_v32 }
 0x2a9   : > { %v3075_v58 = vsel %vm333_vm1, %v3049_v33, 0  ;;  %5013 = vrot.lane.b32.xlu0 %v6721_v29, %s6025_s11  ;;  %5011 = vrot.lane.b32.xlu1 %v6725_v49, %s6025_s11 }
 0x2aa   : > { %5826 = vmatmul.mubr.msk.bf16.vlgmr.msra.gmra.mrb[92].mxu1 %vm329_vm2, %v6784_v4  ;;  %5827 = vmatprep.subr.msk.bf16.mxu0 %vm333_vm1, %v3050_v35  ;;  %v5841_v35 = vld [vmem:[%s7180_s3 + $0x8] sm:$0xf] }
 0x2ab   : > { %3210 = vmatpush1.bf16.msra.mxu0 %v3075_v58  ;;  %v3298_v60 = vpop.permute.xlu0 %3297  ;;  %v3040_v51 = vpop.permute.xlu1 %3039  ;;  %3282 = vmatprep.mubr.bf16.mxu1 %v6018_v0 }
 0x2ac   : > { %5831 = vmatprep.subr.msk.bf16.mxu0 %vm333_vm1, %v3314_v19  ;;  %v3051_v61 = vsel %vm318_vm0, %v3038_v32, %v3040_v51  ;;  %v3052_v37 = vsel %vm318_vm0, %v3040_v51, %v3042_v23  ;;  %v3315_v39 = vsel %vm591_vm3, %v3296_v13, %v3298_v60  ;;  %v256_v51 = vld [vmem:[%s7181_s4] sm:$0xff] }
 0x2ad   : > { %v3081_v38 = vsel %vm333_vm1, %v3051_v61, 0  ;;  %5017 = vrot.lane.b32.xlu0 %v6733_v18, %s6025_s11  ;;  %5015 = vrot.lane.b32.xlu1 %v6737_v40, %s6025_s11  ;;  %v3333_v27 = vsel %vm333_vm1, %v3315_v39, 0 }
 0x2ae   : > { %5828 = vmatmul.mubr.msk.bf16.vlgmr.msra.gmra.mrb[96].mxu0 %vm329_vm2, %v6784_v4  ;;  %5829 = vmatprep.subr.msk.bf16.mxu1 %vm333_vm1, %v3052_v37 }
 0x2af   : > { %3251 = vmatpush1.bf16.msra.mxu1 %v3081_v38  ;;  %3357 = vmatpush1.bf16.msra.mxu0 %v3327_v21  ;;  %v3302_v22 = vpop.permute.xlu0 %3301  ;;  %v3300_v24 = vpop.permute.xlu1 %3299 }
 0x2b0   : > { %v3316_v41 = vsel %vm591_vm3, %v3298_v60, %v3300_v24  ;;  %3388 = vmatprep.mubr.bf16.mxu0 %v6018_v0  ;;  %v3317_v43 = vsel %vm591_vm3, %v3300_v24, %v3302_v22 }
 0x2b1   : > { %5021 = vrot.lane.b32.xlu0 %v6755_v52, %s6025_s11  ;;  %5019 = vrot.lane.b32.xlu1 %v6747_v50, %s6025_s11  ;;  %v3339_v57 = vsel %vm333_vm1, %v3317_v43, 0 }
 0x2b2   : > { %5830 = vmatmul.mubr.msk.bf16.vlgmr.msra.gmra.mrb[96].mxu1 %vm329_vm2, %v6784_v4  ;;  %5833 = vmatprep.subr.msk.bf16.mxu1 %vm333_vm1, %v3316_v41 }
 0x2b3   : > { %3398 = vmatpush1.bf16.msra.mxu1 %v3333_v27  ;;  %v3306_v42 = vpop.permute.xlu0 %3305  ;;  %v3304_v44 = vpop.permute.xlu1 %3303  ;;  %3429 = vmatprep.mubr.bf16.mxu1 %v6018_v0 }
 0x2b4   : > { %v3318_v56 = vsel %vm591_vm3, %v3302_v22, %v3304_v44  ;;  %v3319_v47 = vsel %vm591_vm3, %v3304_v44, %v3306_v42 }
 0x2b5   : > { %5025 = vrot.lane.b32.xlu0 %v6743_v30, %s6025_s11  ;;  %5287 = vrot.lane.b32.xlu1 %v6702_v45, %s6026_s14  ;;  %v3345_v5 = vsel %vm333_vm1, %v3319_v47, 0 }
 0x2b6   : > { %5832 = vmatmul.mubr.msk.bf16.vlgmr.msra.gmra.mrb[100].mxu0 %vm329_vm2, %v2990_v54  ;;  %5835 = vmatprep.subr.msk.bf16.mxu0 %vm333_vm1, %v3318_v56 }
 0x2b7   : > { %3439 = vmatpush1.bf16.msra.mxu0 %v3339_v57  ;;  %v3564_v63 = vpop.permute.xlu0 %3563  ;;  %v3566_v1 = vpop.permute.xlu1 %3565  ;;  %3470 = vmatprep.mubr.bf16.mxu0 %v6018_v0 }
 0x2b8   : > { %v3585_v7 = vsel %vm864_vm4, %v3564_v63, %v3566_v1 }
 0x2b9   : > { %5289 = vrot.lane.b32.xlu0 %v6713_v31, %s6026_s14  ;;  %5291 = vrot.lane.b32.xlu1 %v6709_v46, %s6026_s14  ;;  %v3599_v12 = vsel %vm333_vm1, %v3585_v7, 0 }
 0x2ba   : > { %5834 = vmatmul.mubr.msk.bf16.vlgmr.msra.gmra.mrb[100].mxu1 %vm329_vm2, %v2990_v54 }
 0x2bb   : > { %v3568_v48 = vpop.permute.xlu0 %3567  ;;  %v3308_v3 = vpop.permute.xlu1 %3307  ;;  %3511 = vmatprep.mubr.bf16.mxu1 %v6018_v0 }
 0x2bc   : > { %v3320_v4 = vsel %vm591_vm3, %v3306_v42, %v3308_v3  ;;  %v3586_v8 = vsel %vm864_vm4, %v3566_v1, %v3568_v48 }
 0x2bd   : > { %5293 = vrot.lane.b32.xlu0 %v6725_v49, %s6026_s14  ;;  %5023 = vrot.lane.b32.xlu1 %v6771_v59, %s6025_s11 }
 0x2be   : > { %5836 = vmatmul.mubr.msk.bf16.vlgmr.msra.gmra.mrb[104].mxu0 %vm329_vm2, %v2990_v54  ;;  %5837 = vmatprep.subr.msk.bf16.mxu1 %vm333_vm1, %v3320_v4 }
 0x2bf   : > { %3480 = vmatpush1.bf16.msra.mxu1 %v3345_v5  ;;  %v3310_v9 = vpop.permute.xlu0 %3309  ;;  %v3570_v11 = vpop.permute.xlu1 %3569  ;;  %3552 = vmatprep.mubr.bf16.mxu0 %v6018_v0 }
 0x2c0   : > { %5842 = vmatprep.subr.msk.bf16.mxu1 %vm333_vm1, %v3586_v8  ;;  %v3321_v13 = vsel %vm591_vm3, %v3308_v3, %v3310_v9  ;;  %v3587_v17 = vsel %vm864_vm4, %v3568_v48, %v3570_v11 }
 0x2c1   : > { %5297 = vrot.lane.b32.xlu0 %v6737_v40, %s6026_s14  ;;  %5295 = vrot.lane.b32.xlu1 %v6721_v29, %s6026_s14  ;;  %v3351_v53 = vsel %vm333_vm1, %v3321_v13, 0  ;;  %v3605_v60 = vsel %vm333_vm1, %v3587_v17, 0 }
 0x2c2   : > { %5838 = vmatmul.mubr.msk.bf16.vlgmr.msra.gmra.mrb[104].mxu1 %vm329_vm2, %v2990_v54 }
 0x2c3   : > { %3629 = vmatpush1.bf16.msra.mxu1 %v3599_v12  ;;  %v3572_v32 = vpop.permute.xlu0 %3571  ;;  %v3312_v15 = vpop.permute.xlu1 %3311  ;;  %3660 = vmatprep.mubr.bf16.mxu1 %v6018_v0 }
 0x2c4   : > { %v3322_v16 = vsel %vm591_vm3, %v3310_v9, %v3312_v15  ;;  %v3588_v23 = vsel %vm864_vm4, %v3570_v11, %v3572_v32  ;;  %v5852_v9 = vld [vmem:[%s7180_s3 + $0xc] sm:$0xf] }
 0x2c5   : > { %5301 = vrot.lane.b32.xlu0 %v6747_v50, %s6026_s14  ;;  %5299 = vrot.lane.b32.xlu1 %v6733_v18, %s6026_s14 }
 0x2c6   : > { %5839 = vmatprep.subr.msk.bf16.mxu0 %vm333_vm1, %v3322_v16 }
 0x2c7   : > { %3521 = vmatpush1.bf16.msra.mxu0 %v3351_v53  ;;  %v3576_v26 = vpop.permute.xlu0 %3575  ;;  %v3574_v33 = vpop.permute.xlu1 %3573 }
 0x2c8   : > { %5844 = vmatprep.subr.msk.bf16.mxu0 %vm333_vm1, %v3588_v23  ;;  %v3589_v58 = vsel %vm864_vm4, %v3572_v32, %v3574_v33  ;;  %v3590_v36 = vsel %vm864_vm4, %v3574_v33, %v3576_v26 }
 0x2c9   : > { %v3611_v19 = vsel %vm333_vm1, %v3589_v58, 0  ;;  %5305 = vrot.lane.b32.xlu0 %v6771_v59, %s6026_s14  ;;  %5303 = vrot.lane.b32.xlu1 %v6755_v52, %s6026_s14  ;;  %v4161_v58 = vsel %vm333_vm1, %v6702_v45, 0  ;;  %v5863_v45 = vld [vmem:[%s7180_s3 + $0x10] sm:$0xf] }
 0x2ca   : > { %5840 = vmatmul.mubr.msk.bf16.vlgmr.msra.gmra.mrb[108].mxu0 %vm329_vm2, %v2990_v54  ;;  %5843 = vmatmul.mubr.msk.bf16.vlgmr.msra.gmra.mrb[108].mxu1 %vm329_vm2, %v5841_v35 }
 0x2cb   : > { %5846 = vmatprep.subr.msk.bf16.mxu1 %vm333_vm1, %v3590_v36  ;;  %3670 = vmatpush1.bf16.msra.mxu0 %v3605_v60  ;;  %v3580_v61 = vpop.permute.xlu0 %3579  ;;  %v3578_v37 = vpop.permute.xlu1 %3577 }
 0x2cc   : > { %3711 = vmatpush1.bf16.msra.mxu1 %v3611_v19  ;;  %v3592_v38 = vsel %vm864_vm4, %v3578_v37, %v3580_v61  ;;  %3701 = vmatprep.mubr.bf16.mxu0 %v6018_v0  ;;  %v3591_v21 = vsel %vm864_vm4, %v3576_v26, %v3578_v37 }
 0x2cd   : > { %5569 = vperm.xlu0 %5965, %v256_v51   ;;  %5307 = vrot.lane.b32.xlu1 %v6743_v30, %s6026_s14  ;;  %v3617_v24 = vsel %vm333_vm1, %v3591_v21, 0 }
 0x2ce   : > { %5848 = vmatprep.subr.msk.bf16.mxu0 %vm333_vm1, %v3592_v38  ;;  %3742 = vmatprep.mubr.bf16.mxu1 %v6018_v0 }
 0x2cf   : > { %v3584_v39 = vpop.permute.xlu0 %3583  ;;  %v3846_v22 = vpop.permute.xlu1 %3845 }
 0x2d2   : > { %5845 = vmatmul.mubr.msk.bf16.vlgmr.msra.gmra.mrb[112].mxu0 %vm329_vm2, %v5841_v35  ;;  %5847 = vmatmul.mubr.msk.bf16.vlgmr.msra.gmra.mrb[112].mxu1 %vm329_vm2, %v5841_v35 }
 0x2d3   : > { %3752 = vmatpush1.bf16.msra.mxu0 %v3617_v24  ;;  %v3848_v41 = vpop.permute.xlu0 %3847  ;;  %v3582_v27 = vpop.permute.xlu1 %3581  ;;  %3783 = vmatprep.mubr.bf16.mxu0 %v6018_v0 }
 0x2d4   : > { %v3593_v30 = vsel %vm864_vm4, %v3580_v61, %v3582_v27  ;;  %v3594_v43 = vsel %vm864_vm4, %v3582_v27, %v3584_v39  ;;  %3824 = vmatprep.mubr.bf16.mxu1 %v6018_v0  ;;  %v3867_v44 = vsel %vm1147_vm5, %v3846_v22, %v3848_v41 }
 0x2d5   : > { %v3623_v42 = vsel %vm333_vm1, %v3593_v30, 0  ;;  %5850 = vmatprep.subr.msk.bf16.mxu1 %vm333_vm1, %v3594_v43  ;;  %v3881_v63 = vsel %vm333_vm1, %v3867_v44, 0 }
 0x2d6   : > { %3793 = vmatpush1.bf16.msra.mxu1 %v3623_v42 }
 0x2d7   : > { %v3852_v54 = vpop.permute.xlu0 %3851  ;;  %v3850_v56 = vpop.permute.xlu1 %3849 }
 0x2d8   : > { %v3868_v57 = vsel %vm1147_vm5, %v3848_v41, %v3850_v56  ;;  %v3869_v1 = vsel %vm1147_vm5, %v3850_v56, %v3852_v54 }
 0x2d9   : > { %5853 = vmatprep.subr.msk.bf16.mxu0 %vm333_vm1, %v3868_v57  ;;  %v3887_v4 = vsel %vm333_vm1, %v3869_v1, 0  ;;  %v5884_v1 = vld [vmem:[%s7180_s3 + $0x14] sm:$0xf] }
 0x2da   : > { %5849 = vmatmul.mubr.msk.bf16.vlgmr.msra.gmra.mrb[116].mxu0 %vm329_vm2, %v5841_v35  ;;  %5851 = vmatmul.mubr.msk.bf16.vlgmr.msra.gmra.mrb[116].mxu1 %vm329_vm2, %v5841_v35 }
 0x2db   : > { %3911 = vmatpush1.bf16.msra.mxu0 %v3881_v63  ;;  %v3856_v47 = vpop.permute.xlu0 %3855  ;;  %v3854_v48 = vpop.permute.xlu1 %3853  ;;  %3942 = vmatprep.mubr.bf16.mxu0 %v6018_v0 }
 0x2dc   : > { %v3870_v3 = vsel %vm1147_vm5, %v3852_v54, %v3854_v48  ;;  %3983 = vmatprep.mubr.bf16.mxu1 %v6018_v0  ;;  %v3871_v5 = vsel %vm1147_vm5, %v3854_v48, %v3856_v47 }
 0x2dd   : > { %5855 = vmatprep.subr.msk.bf16.mxu1 %vm333_vm1, %v3870_v3  ;;  %v3893_v12 = vsel %vm333_vm1, %v3871_v5, 0 }
 0x2de   : > { %3952 = vmatpush1.bf16.msra.mxu1 %v3887_v4 }
 0x2df   : > { %v3860_v7 = vpop.permute.xlu0 %3859  ;;  %v3858_v8 = vpop.permute.xlu1 %3857 }
 0x2e0   : > { %v3872_v11 = vsel %vm1147_vm5, %v3856_v47, %v3858_v8  ;;  %v3873_v13 = vsel %vm1147_vm5, %v3858_v8, %v3860_v7 }
 0x2e1   : > { %5857 = vmatprep.subr.msk.bf16.mxu0 %vm333_vm1, %v3872_v11  ;;  %v3899_v53 = vsel %vm333_vm1, %v3873_v13, 0 }
 0x2e2   : > { %5854 = vmatmul.mubr.msk.bf16.vlgmr.msra.gmra.mrb[120].mxu0 %vm329_vm2, %v5852_v9  ;;  %5856 = vmatmul.mubr.msk.bf16.vlgmr.msra.gmra.mrb[120].mxu1 %vm329_vm2, %v5852_v9 }
 0x2e3   : > { %3993 = vmatpush1.bf16.msra.mxu0 %v3893_v12  ;;  %v3864_v32 = vpop.permute.xlu0 %3863  ;;  %v3862_v15 = vpop.permute.xlu1 %3861  ;;  %4024 = vmatprep.mubr.bf16.mxu0 %v6018_v0 }
 0x2e4   : > { %v3874_v16 = vsel %vm1147_vm5, %v3860_v7, %v3862_v15  ;;  %4065 = vmatprep.mubr.bf16.mxu1 %v6018_v0  ;;  %v3875_v17 = vsel %vm1147_vm5, %v3862_v15, %v3864_v32 }
 0x2e5   : > { %5859 = vmatprep.subr.msk.bf16.mxu1 %vm333_vm1, %v3874_v16  ;;  %v3905_v35 = vsel %vm333_vm1, %v3875_v17, 0 }
 0x2e6   : > { %4034 = vmatpush1.bf16.msra.mxu1 %v3899_v53 }
 0x2e7   : > { %v4442_v23 = vpop.permute.xlu0 %4441  ;;  %5874 = vmatprep.subr.msk.bf16.mxu1 %vm333_vm1, %v6713_v31  ;;  %v3866_v26 = vpop.permute.xlu1 %3865 }
 0x2e8   : > { %v3876_v33 = vsel %vm1147_vm5, %v3864_v32, %v3866_v26 }
 0x2e9   : > { %5861 = vmatprep.subr.msk.bf16.mxu0 %vm333_vm1, %v3876_v33 }
 0x2ea   : > { %5858 = vmatmul.mubr.msk.bf16.vlgmr.msra.gmra.mrb[124].mxu0 %vm329_vm2, %v5852_v9  ;;  %5860 = vmatmul.mubr.msk.bf16.vlgmr.msra.gmra.mrb[124].mxu1 %vm329_vm2, %v5852_v9 }
 0x2eb   : > { %4075 = vmatpush1.bf16.msra.mxu0 %v3905_v35  ;;  %4191 = vmatpush1.bf16.msra.mxu1 %v4161_v58  ;;  %v4446_v36 = vpop.permute.xlu0 %4445  ;;  %v4444_v19 = vpop.permute.xlu1 %4443  ;;  %v5906_v58 = vld [vmem:[%s7180_s3 + $0x18] sm:$0xf] }
 0x2ec   : > { %5876 = vmatprep.subr.msk.bf16.mxu0 %vm333_vm1, %v6725_v49  ;;  %5878 = vmatprep.subr.msk.bf16.mxu1 %vm333_vm1, %v6737_v40  ;;  %v4167_v49 = vsel %vm333_vm1, %v6709_v46, 0  ;;  %v4173_v40 = vsel %vm333_vm1, %v6721_v29, 0  ;;  %v4179_v46 = vsel %vm333_vm1, %v6733_v18, 0  ;;  %v4185_v29 = vsel %vm333_vm1, %v6755_v52, 0 }
 0x2ed   : > { %4106 = vmatprep.mubr.bf16.mxu0 %v6018_v0  ;;  %4222 = vmatprep.mubr.bf16.mxu1 %v6018_v0  ;;  %v4463_v18 = vsel %vm1744_vm6, %v4442_v23, %v4444_v19 }
 0x2ee   : > { %v4477_v41 = vsel %vm333_vm1, %v4463_v18, 0 }
 0x2ef   : > { %v4450_v31 = vpop.permute.xlu0 %4449  ;;  %v4448_v60 = vpop.permute.xlu1 %4447 }
 0x2f0   : > { %v4465_v52 = vsel %vm1744_vm6, %v4446_v36, %v4448_v60 }
 0x2f1   : > { %v4483_v27 = vsel %vm333_vm1, %v4465_v52, 0 }
 0x2f2   : > { %5862 = vmatmul.mubr.msk.bf16.vlgmr.msra.gmra.mrb[128].mxu0 %vm329_vm2, %v5852_v9  ;;  %5875 = vmatmul.mubr.msk.bf16.vlgmr.msra.gmra.mrb[128].mxu1 %vm329_vm2, %v5863_v45 }
 0x2f3   : > { %4232 = vmatpush1.bf16.msra.mxu0 %v4167_v49  ;;  %4273 = vmatpush1.bf16.msra.mxu1 %v4173_v40  ;;  %v4454_v51 = vpop.permute.xlu0 %4453  ;;  %v4452_v61 = vpop.permute.xlu1 %4451 }
 0x2f4   : > { %5880 = vmatprep.subr.msk.bf16.mxu0 %vm333_vm1, %v6747_v50  ;;  %5882 = vmatprep.subr.msk.bf16.mxu1 %vm333_vm1, %v6771_v59  ;;  %v4464_v50 = vsel %vm1744_vm6, %v4444_v19, %v4446_v36  ;;  %v4466_v59 = vsel %vm1744_vm6, %v4448_v60, %v4450_v31  ;;  %v4468_v30 = vsel %vm1744_vm6, %v4452_v61, %v4454_v51 }
 0x2f5   : > { %4263 = vmatprep.mubr.bf16.mxu0 %v6018_v0  ;;  %4304 = vmatprep.mubr.bf16.mxu1 %v6018_v0  ;;  %v4467_v54 = vsel %vm1744_vm6, %v4450_v31, %v4452_v61 }
 0x2f6   : > { %v4489_v48 = vsel %vm333_vm1, %v4467_v54, 0 }
 0x2f7   : > { %v4462_v37 = vpop.permute.xlu0 %4461  ;;  %v4456_v38 = vpop.permute.xlu1 %4455 }
 0x2f8   : > { %v4469_v56 = vsel %vm1744_vm6, %v4454_v51, %v4456_v38 }
 0x2f9   : > { %v4495_v3 = vsel %vm333_vm1, %v4469_v56, 0 }
 0x2fa   : > { %5877 = vmatmul.mubr.msk.bf16.vlgmr.msra.gmra.mrb[132].mxu0 %vm329_vm2, %v5863_v45  ;;  %5879 = vmatmul.mubr.msk.bf16.vlgmr.msra.gmra.mrb[132].mxu1 %vm329_vm2, %v5863_v45 }
 0x2fb   : > { %4314 = vmatpush1.bf16.msra.mxu0 %v4179_v46  ;;  %4355 = vmatpush1.bf16.msra.mxu1 %v4185_v29  ;;  %v4458_v21 = vpop.permute.xlu0 %4457  ;;  %v4724_v39 = vpop.permute.xlu1 %4723 }
 0x2fc   : > { %5896 = vmatprep.subr.msk.bf16.mxu0 %vm333_vm1, %v4464_v50  ;;  %5898 = vmatprep.subr.msk.bf16.mxu1 %vm333_vm1, %v4466_v59  ;;  %v4470_v43 = vsel %vm1744_vm6, %v4456_v38, %v4458_v21 }
 0x2fd   : > { %4345 = vmatprep.mubr.bf16.mxu0 %v6018_v0  ;;  %4386 = vmatprep.mubr.bf16.mxu1 %v6018_v0 }
 0x2ff   : > { %v4726_v22 = vpop.permute.xlu0 %4725  ;;  %v4728_v24 = vpop.permute.xlu1 %4727 }
 0x300   : > { %v4746_v4 = vsel %vm2027_vm7, %v4726_v22, %v4728_v24  ;;  %v4745_v8 = vsel %vm2027_vm7, %v4724_v39, %v4726_v22 }
 0x301   : > { %v4759_v13 = vsel %vm333_vm1, %v4745_v8, 0 }
 0x302   : > { %5881 = vmatmul.mubr.msk.bf16.vlgmr.msra.gmra.mrb[136].mxu0 %vm329_vm2, %v5863_v45  ;;  %5883 = vmatmul.mubr.msk.bf16.vlgmr.msra.gmra.mrb[136].mxu1 %vm329_vm2, %v5863_v45 }
 0x303   : > { %4507 = vmatpush1.bf16.msra.mxu0 %v4477_v41  ;;  %4548 = vmatpush1.bf16.msra.mxu1 %v4483_v27  ;;  %v4730_v42 = vpop.permute.xlu0 %4729  ;;  %v4732_v44 = vpop.permute.xlu1 %4731 }
 0x304   : > { %5900 = vmatprep.subr.msk.bf16.mxu0 %vm333_vm1, %v4468_v30  ;;  %5902 = vmatprep.subr.msk.bf16.mxu1 %vm333_vm1, %v4470_v43  ;;  %v4748_v15 = vsel %vm2027_vm7, %v4730_v42, %v4732_v44  ;;  %v4747_v23 = vsel %vm2027_vm7, %v4728_v24, %v4730_v42 }
 0x305   : > { %4538 = vmatprep.mubr.bf16.mxu0 %v6018_v0  ;;  %4579 = vmatprep.mubr.bf16.mxu1 %v6018_v0  ;;  %v4765_v19 = vsel %vm333_vm1, %v4747_v23, 0 }
 0x307   : > { %v4734_v57 = vpop.permute.xlu0 %4733  ;;  %v4460_v63 = vpop.permute.xlu1 %4459 }
 0x308   : > { %v4472_v47 = vsel %vm1744_vm6, %v4460_v63, %v4462_v37  ;;  %v4471_v9 = vsel %vm1744_vm6, %v4458_v21, %v4460_v63  ;;  %v4749_v26 = vsel %vm2027_vm7, %v4732_v44, %v4734_v57  ;;  %v5917_v63 = vld [vmem:[%s7180_s3 + $0x1c] sm:$0xf] }
 0x309   : > { %v4501_v32 = vsel %vm333_vm1, %v4471_v9, 0  ;;  %v4771_v31 = vsel %vm333_vm1, %v4749_v26, 0  ;;  %v5928_v26 = vld [vmem:[%s7180_s3 + $0x20] sm:$0xf] }
 0x30a   : > { %5897 = vmatmul.mubr.msk.bf16.vlgmr.msra.gmra.mrb[140].mxu0 %vm329_vm2, %v5884_v1  ;;  %5899 = vmatmul.mubr.msk.bf16.vlgmr.msra.gmra.mrb[140].mxu1 %vm329_vm2, %v5884_v1 }
 0x30b   : > { %4589 = vmatpush1.bf16.msra.mxu0 %v4489_v48  ;;  %4630 = vmatpush1.bf16.msra.mxu1 %v4495_v3  ;;  %v4738_v5 = vpop.permute.xlu0 %4737  ;;  %v4736_v7 = vpop.permute.xlu1 %4735 }
 0x30c   : > { %5904 = vmatprep.subr.msk.bf16.mxu0 %vm333_vm1, %v4472_v47  ;;  %5907 = vmatprep.subr.msk.bf16.mxu1 %vm333_vm1, %v4746_v4  ;;  %v4750_v16 = vsel %vm2027_vm7, %v4734_v57, %v4736_v7  ;;  %v4751_v40 = vsel %vm2027_vm7, %v4736_v7, %v4738_v5 }
 0x30d   : > { %4620 = vmatprep.mubr.bf16.mxu0 %v6018_v0  ;;  %4661 = vmatprep.mubr.bf16.mxu1 %v6018_v0  ;;  %v4777_v38 = vsel %vm333_vm1, %v4751_v40, 0 }
 0x30f   : > { %v5006_v11 = vpop.permute.xlu0 %5005  ;;  %v4744_v12 = vpop.permute.xlu1 %4743 }
 0x312   : > { %5901 = vmatmul.mubr.msk.bf16.vlgmr.msra.gmra.mrb[144].mxu0 %vm329_vm2, %v5884_v1  ;;  %5903 = vmatmul.mubr.msk.bf16.vlgmr.msra.gmra.mrb[144].mxu1 %vm329_vm2, %v5884_v1 }
 0x313   : > { %4671 = vmatpush1.bf16.msra.mxu0 %v4501_v32  ;;  %4789 = vmatpush1.bf16.msra.mxu1 %v4759_v13  ;;  %v4742_v53 = vpop.permute.xlu0 %4741  ;;  %v5008_v17 = vpop.permute.xlu1 %5007 }
 0x314   : > { %5909 = vmatprep.subr.msk.bf16.mxu0 %vm333_vm1, %v4748_v15  ;;  %5911 = vmatprep.subr.msk.bf16.mxu1 %vm333_vm1, %v4750_v16  ;;  %v4754_v60 = vsel %vm2027_vm7, %v4742_v53, %v4744_v12  ;;  %v5027_v39 = vsel %vm2310_vm8, %v5006_v11, %v5008_v17 }
 0x315   : > { %4702 = vmatprep.mubr.bf16.mxu0 %v6018_v0  ;;  %4820 = vmatprep.mubr.bf16.mxu1 %v6018_v0  ;;  %v5041_v24 = vsel %vm333_vm1, %v5027_v39, 0 }
 0x317   : > { %v5010_v33 = vpop.permute.xlu0 %5009  ;;  %v4740_v35 = vpop.permute.xlu1 %4739 }
 0x318   : > { %v4752_v36 = vsel %vm2027_vm7, %v4738_v5, %v4740_v35  ;;  %v4753_v51 = vsel %vm2027_vm7, %v4740_v35, %v4742_v53  ;;  %v5028_v29 = vsel %vm2310_vm8, %v5008_v17, %v5010_v33 }
 0x319   : > { %v4783_v46 = vsel %vm333_vm1, %v4753_v51, 0 }
 0x31a   : > { %5905 = vmatmul.mubr.msk.bf16.vlgmr.msra.gmra.mrb[148].mxu0 %vm329_vm2, %v5884_v1  ;;  %5908 = vmatmul.mubr.msk.bf16.vlgmr.msra.gmra.mrb[148].mxu1 %vm329_vm2, %v5906_v58 }
 0x31b   : > { %4830 = vmatpush1.bf16.msra.mxu0 %v4765_v19  ;;  %4871 = vmatpush1.bf16.msra.mxu1 %v4771_v31  ;;  %v5014_v45 = vpop.permute.xlu0 %5013  ;;  %v5012_v49 = vpop.permute.xlu1 %5011 }
 0x31c   : > { %5913 = vmatprep.subr.msk.bf16.mxu0 %vm333_vm1, %v4752_v36  ;;  %5915 = vmatprep.subr.msk.bf16.mxu1 %vm333_vm1, %v4754_v60  ;;  %v5030_v50 = vsel %vm2310_vm8, %v5012_v49, %v5014_v45  ;;  %v5029_v18 = vsel %vm2310_vm8, %v5010_v33, %v5012_v49 }
 0x31d   : > { %4861 = vmatprep.mubr.bf16.mxu0 %v6018_v0  ;;  %4902 = vmatprep.mubr.bf16.mxu1 %v6018_v0  ;;  %v5047_v41 = vsel %vm333_vm1, %v5029_v18, 0 }
 0x31f   : > { %v5018_v61 = vpop.permute.xlu0 %5017  ;;  %v5016_v37 = vpop.permute.xlu1 %5015 }
 0x320   : > { %v5032_v27 = vsel %vm2310_vm8, %v5016_v37, %v5018_v61  ;;  %v5031_v44 = vsel %vm2310_vm8, %v5014_v45, %v5016_v37 }
 0x321   : > { %v5053_v47 = vsel %vm333_vm1, %v5031_v44, 0 }
 0x322   : > { %5910 = vmatmul.mubr.msk.bf16.vlgmr.msra.gmra.mrb[152].mxu0 %vm329_vm2, %v5906_v58  ;;  %5912 = vmatmul.mubr.msk.bf16.vlgmr.msra.gmra.mrb[152].mxu1 %vm329_vm2, %v5906_v58 }
 0x323   : > { %4912 = vmatpush1.bf16.msra.mxu0 %v4777_v38  ;;  %4953 = vmatpush1.bf16.msra.mxu1 %v4783_v46  ;;  %v5022_v59 = vpop.permute.xlu0 %5021  ;;  %v5020_v21 = vpop.permute.xlu1 %5019 }
 0x324   : > { %5918 = vmatprep.subr.msk.bf16.mxu0 %vm333_vm1, %v5028_v29  ;;  %5920 = vmatprep.subr.msk.bf16.mxu1 %vm333_vm1, %v5030_v50  ;;  %v5034_v30 = vsel %vm2310_vm8, %v5020_v21, %v5022_v59  ;;  %v5033_v54 = vsel %vm2310_vm8, %v5018_v61, %v5020_v21 }
 0x325   : > { %4943 = vmatprep.mubr.bf16.mxu0 %v6018_v0  ;;  %4984 = vmatprep.mubr.bf16.mxu1 %v6018_v0  ;;  %v5059_v48 = vsel %vm333_vm1, %v5033_v54, 0 }
 0x327   : > { %v5026_v52 = vpop.permute.xlu0 %5025  ;;  %v5288_v22 = vpop.permute.xlu1 %5287 }
 0x32a   : > { %5914 = vmatmul.mubr.msk.bf16.vlgmr.msra.gmra.mrb[156].mxu0 %vm329_vm2, %v5906_v58  ;;  %5916 = vmatmul.mubr.msk.bf16.vlgmr.msra.gmra.mrb[156].mxu1 %vm329_vm2, %v5906_v58 }
 0x32b   : > { %5071 = vmatpush1.bf16.msra.mxu0 %v5041_v24  ;;  %5112 = vmatpush1.bf16.msra.mxu1 %v5047_v41  ;;  %v5290_v43 = vpop.permute.xlu0 %5289  ;;  %v5292_v42 = vpop.permute.xlu1 %5291 }
 0x32c   : > { %5922 = vmatprep.subr.msk.bf16.mxu0 %vm333_vm1, %v5032_v27  ;;  %5924 = vmatprep.subr.msk.bf16.mxu1 %vm333_vm1, %v5034_v30  ;;  %v5310_v3 = vsel %vm2593_vm9, %v5290_v43, %v5292_v42  ;;  %v5309_v7 = vsel %vm2593_vm9, %v5288_v22, %v5290_v43 }
 0x32d   : > { %5102 = vmatprep.mubr.bf16.mxu0 %v6018_v0  ;;  %5143 = vmatprep.mubr.bf16.mxu1 %v6018_v0  ;;  %v5323_v12 = vsel %vm333_vm1, %v5309_v7, 0 }
 0x32f   : > { %v5294_v56 = vpop.permute.xlu0 %5293  ;;  %v5024_v57 = vpop.permute.xlu1 %5023 }
 0x330   : > { %v5036_v1 = vsel %vm2310_vm8, %v5024_v57, %v5026_v52  ;;  %v5035_v8 = vsel %vm2310_vm8, %v5022_v59, %v5024_v57  ;;  %v5311_v53 = vsel %vm2593_vm9, %v5292_v42, %v5294_v56 }
 0x331   : > { %v5065_v13 = vsel %vm333_vm1, %v5035_v8, 0  ;;  %v5329_v58 = vsel %vm333_vm1, %v5311_v53, 0 }
 0x332   : > { %5919 = vmatmul.mubr.msk.bf16.vlgmr.msra.gmra.mrb[160].mxu0 %vm329_vm2, %v5917_v63  ;;  %5921 = vmatmul.mubr.msk.bf16.vlgmr.msra.gmra.mrb[160].mxu1 %vm329_vm2, %v5917_v63 }
 0x333   : > { %5153 = vmatpush1.bf16.msra.mxu0 %v5053_v47  ;;  %5194 = vmatpush1.bf16.msra.mxu1 %v5059_v48  ;;  %v5296_v4 = vpop.permute.xlu1 %5295  ;;  %v5298_v5 = vpop.permute.xlu0 %5297 }
 0x334   : > { %5926 = vmatprep.subr.msk.bf16.mxu0 %vm333_vm1, %v5036_v1  ;;  %5929 = vmatprep.subr.msk.bf16.mxu1 %vm333_vm1, %v5310_v3  ;;  %v5312_v15 = vsel %vm2593_vm9, %v5294_v56, %v5296_v4  ;;  %v5313_v17 = vsel %vm2593_vm9, %v5296_v4, %v5298_v5 }
 0x335   : > { %5184 = vmatprep.mubr.bf16.mxu0 %v6018_v0  ;;  %5225 = vmatprep.mubr.bf16.mxu1 %v6018_v0  ;;  %v5335_v36 = vsel %vm333_vm1, %v5313_v17, 0 }
 0x337   : > { %v5300_v9 = vpop.permute.xlu1 %5299  ;;  %v5302_v32 = vpop.permute.xlu0 %5301 }
 0x338   : > { %v5314_v11 = vsel %vm2593_vm9, %v5298_v5, %v5300_v9  ;;  %v5315_v31 = vsel %vm2593_vm9, %v5300_v9, %v5302_v32 }
 0x339   : > { %v5341_v45 = vsel %vm333_vm1, %v5315_v31, 0 }
 0x33a   : > { %5923 = vmatmul.mubr.msk.bf16.vlgmr.msra.gmra.mrb[164].mxu0 %vm329_vm2, %v5917_v63  ;;  %5925 = vmatmul.mubr.msk.bf16.vlgmr.msra.gmra.mrb[164].mxu1 %vm329_vm2, %v5917_v63 }
 0x33b   : > { %5235 = vmatpush1.bf16.msra.mxu0 %v5065_v13  ;;  %5353 = vmatpush1.bf16.msra.mxu1 %v5323_v12  ;;  %v5304_v16 = vpop.permute.xlu1 %5303  ;;  %v5306_v33 = vpop.permute.xlu0 %5305 }
 0x33c   : > { %5931 = vmatprep.subr.msk.bf16.mxu0 %vm333_vm1, %v5312_v15  ;;  %5933 = vmatprep.subr.msk.bf16.mxu1 %vm333_vm1, %v5314_v11  ;;  %v5316_v19 = vsel %vm2593_vm9, %v5302_v32, %v5304_v16  ;;  %v5317_v60 = vsel %vm2593_vm9, %v5304_v16, %v5306_v33 }
 0x33d   : > { %5266 = vmatprep.mubr.bf16.mxu0 %v6018_v0  ;;  %5384 = vmatprep.mubr.bf16.mxu1 %v6018_v0  ;;  %v5347_v49 = vsel %vm333_vm1, %v5317_v60, 0 }
 0x33f   : > { %v5308_v23 = vpop.permute.xlu1 %5307 }
 0x340   : > { %v5318_v35 = vsel %vm2593_vm9, %v5306_v33, %v5308_v23 }
 0x342   : > { %5927 = vmatmul.mubr.msk.bf16.vlgmr.msra.gmra.mrb[168].mxu0 %vm329_vm2, %v5917_v63  ;;  %5930 = vmatmul.mubr.msk.bf16.vlgmr.msra.gmra.mrb[168].mxu1 %vm329_vm2, %v5928_v26 }
 0x343   : > { %5394 = vmatpush1.bf16.msra.mxu0 %v5329_v58  ;;  %5435 = vmatpush1.bf16.msra.mxu1 %v5335_v36 }
 0x344   : > { %5935 = vmatprep.subr.msk.bf16.mxu0 %vm333_vm1, %v5316_v19  ;;  %5937 = vmatprep.subr.msk.bf16.mxu1 %vm333_vm1, %v5318_v35 }
 0x345   : > { %5425 = vmatprep.mubr.bf16.mxu0 %v6018_v0  ;;  %5466 = vmatprep.mubr.bf16.mxu1 %v6018_v0 }
 0x34a   : > { %5932 = vmatmul.mubr.msk.bf16.vlgmr.msra.gmra.mrb[172].mxu0 %vm329_vm2, %v5928_v26  ;;  %5934 = vmatmul.mubr.msk.bf16.vlgmr.msra.gmra.mrb[172].mxu1 %vm329_vm2, %v5928_v26 }
 0x34b   : > { %5476 = vmatpush1.bf16.msra.mxu0 %v5341_v45  ;;  %5517 = vmatpush1.bf16.msra.mxu1 %v5347_v49 }
 0x34c   : > { %5507 = vmatprep.mubr.bf16.mxu0 %v6018_v0  ;;  %5548 = vmatprep.mubr.bf16.mxu1 %v6018_v0 }
 0x352   : > { %5936 = vmatmul.mubr.msk.bf16.vlgmr.msra.gmra.mrb[176].mxu0 %vm329_vm2, %v5928_v26  ;;  %5938 = vmatmul.mubr.msk.bf16.vlgmr.msra.gmra.mrb[176].mxu1 %vm329_vm2, %v5928_v26 }
 0x36d   : > { %v3120_v40 = vpop.f32.mrb[88].mxu1 }
 0x36e   : > { %v3122_v51 = vpop.f32.mrb[89].mxu1 }
 0x36f   : > { %v3124_v61 = vpop.f32.mrb[90].mxu1 }
 0x370   : > { %v3125_v37 = vpop.f32.mrb[91].mxu1 }
 0x375   : > { %v3161_v38 = vpop.f32.mrb[92].mxu0 }
 0x376   : > { %v3163_v46 = vpop.f32.mrb[93].mxu0 }
 0x377   : > { %v3165_v29 = vpop.f32.mrb[94].mxu0 }
 0x378   : > { %v3166_v50 = vpop.f32.mrb[95].mxu0 }
 0x37d   : > { %v3202_v59 = vpop.f32.mrb[92].mxu1 }
 0x37e   : > { %v3204_v21 = vpop.f32.mrb[93].mxu1 }
 0x37f   : > { %v3206_v39 = vpop.f32.mrb[94].mxu1 }
 0x380   : > { %v3207_v18 = vpop.f32.mrb[95].mxu1 }
 0x381   : > { %v3243_v52 = vpop.f32.mrb[96].mxu0 }
 0x382   : > { %v3245_v22 = vpop.f32.mrb[97].mxu0 }
 0x383   : > { %v3247_v24 = vpop.f32.mrb[98].mxu0 }
 0x384   : > { %v3248_v0 = vpop.f32.mrb[99].mxu0 }
 0x385   : > { %v3284_v41 = vpop.f32.mrb[96].mxu1 }
 0x386   : > { %v3286_v27 = vpop.f32.mrb[97].mxu1 }
 0x387   : > { %v3288_v30 = vpop.f32.mrb[98].mxu1 }
 0x388   : > { %v3289_v43 = vpop.f32.mrb[99].mxu1 }
 0x389   : > { %v3390_v42 = vpop.f32.mrb[100].mxu0 }
 0x38a   : > { %v3391_v44 = vadd.f32 %v3390_v42, %v3120_v40  ;;  %v3392_v54 = vpop.f32.mrb[101].mxu0 }
 0x38b   : > { %v3393_v56 = vadd.f32 %v3392_v54, %v3122_v51  ;;  %v3394_v57 = vpop.f32.mrb[102].mxu0 }
 0x38c   : > { %v3395_v63 = vpop.f32.mrb[103].mxu0 }
 0x38d   : > { %v3431_v1 = vpop.f32.mrb[100].mxu1 }
 0x38e   : > { %v3432_v47 = vadd.f32 %v3431_v1, %v3161_v38  ;;  %v3433_v48 = vpop.f32.mrb[101].mxu1 }
 0x38f   : > { %v3434_v3 = vadd.f32 %v3433_v48, %v3163_v46  ;;  %v3435_v4 = vpop.f32.mrb[102].mxu1 }
 0x390   : > { %v3436_v5 = vpop.f32.mrb[103].mxu1 }
 0x391   : > { %v3472_v7 = vpop.f32.mrb[104].mxu0 }
 0x392   : > { %v3473_v8 = vadd.f32 %v3472_v7, %v3202_v59  ;;  %v3474_v9 = vpop.f32.mrb[105].mxu0 }
 0x393   : > { %v3475_v11 = vadd.f32 %v3474_v9, %v3204_v21  ;;  %v3476_v12 = vpop.f32.mrb[106].mxu0 }
 0x394   : > { %v3477_v13 = vpop.f32.mrb[107].mxu0 }
 0x395   : > { %v3513_v32 = vpop.f32.mrb[104].mxu1 }
 0x396   : > { %v3514_v15 = vadd.f32 %v3513_v32, %v3243_v52  ;;  %v3515_v16 = vpop.f32.mrb[105].mxu1 }
 0x397   : > { %v3516_v53 = vadd.f32 %v3515_v16, %v3245_v22  ;;  %v3517_v17 = vpop.f32.mrb[106].mxu1 }
 0x398   : > { %v3518_v23 = vpop.f32.mrb[107].mxu1 }
 0x39d   : > { %v3554_v26 = vpop.f32.mrb[108].mxu0  ;;  %v3662_v33 = vpop.f32.mrb[108].mxu1 }
 0x39e   : > { %v3555_v35 = vadd.f32 %v3554_v26, %v3284_v41  ;;  %v3833_v58 = vadd.f32 %v3662_v33, %v3391_v44  ;;  %v3556_v36 = vpop.f32.mrb[109].mxu0  ;;  %v3664_v19 = vpop.f32.mrb[109].mxu1 }
 0x39f   : > { %v3557_v31 = vadd.f32 %v3556_v36, %v3286_v27  ;;  %v3834_v60 = vadd.f32 %v3664_v19, %v3393_v56  ;;  %v3558_v45 = vpop.f32.mrb[110].mxu0  ;;  %v3666_v49 = vpop.f32.mrb[110].mxu1 }
 0x3a0   : > { %v3559_v40 = vpop.f32.mrb[111].mxu0  ;;  %v3667_v51 = vpop.f32.mrb[111].mxu1 }
 0x3a5   : > { %v3703_v61 = vpop.f32.mrb[112].mxu0  ;;  %v3744_v37 = vpop.f32.mrb[112].mxu1 }
 0x3a6   : > { %v3835_v38 = vadd.f32 %v3703_v61, %v3432_v47  ;;  %v3837_v46 = vadd.f32 %v3744_v37, %v3473_v8  ;;  %v3705_v29 = vpop.f32.mrb[113].mxu0  ;;  %v3746_v50 = vpop.f32.mrb[113].mxu1 }
 0x3a7   : > { %v3836_v59 = vadd.f32 %v3705_v29, %v3434_v3  ;;  %v3838_v21 = vadd.f32 %v3746_v50, %v3475_v11  ;;  %v3707_v39 = vpop.f32.mrb[114].mxu0  ;;  %v3748_v18 = vpop.f32.mrb[114].mxu1 }
 0x3a8   : > { %v3708_v52 = vpop.f32.mrb[115].mxu0  ;;  %v3749_v22 = vpop.f32.mrb[115].mxu1 }
 0x3ad   : > { %v3785_v24 = vpop.f32.mrb[116].mxu0  ;;  %v3826_v0 = vpop.f32.mrb[116].mxu1 }
 0x3ae   : > { %v3839_v41 = vadd.f32 %v3785_v24, %v3514_v15  ;;  %v3841_v27 = vadd.f32 %v3826_v0, %v3555_v35  ;;  %v3787_v30 = vpop.f32.mrb[117].mxu0  ;;  %v3828_v43 = vpop.f32.mrb[117].mxu1 }
 0x3af   : > { %v3840_v42 = vadd.f32 %v3787_v30, %v3516_v53  ;;  %v3842_v44 = vadd.f32 %v3828_v43, %v3557_v31  ;;  %v3789_v54 = vpop.f32.mrb[118].mxu0  ;;  %v3830_v56 = vpop.f32.mrb[118].mxu1 }
 0x3b0   : > { %v3790_v57 = vpop.f32.mrb[119].mxu0  ;;  %v3831_v63 = vpop.f32.mrb[119].mxu1 }
 0x3b5   : > { %v3944_v1 = vpop.f32.mrb[120].mxu0  ;;  %v3985_v47 = vpop.f32.mrb[120].mxu1 }
 0x3b6   : > { %v4115_v48 = vadd.f32 %v3944_v1, %v3833_v58  ;;  %v4117_v3 = vadd.f32 %v3985_v47, %v3835_v38  ;;  %v3946_v4 = vpop.f32.mrb[121].mxu0  ;;  %v3987_v5 = vpop.f32.mrb[121].mxu1 }
 0x3b7   : > { %v4116_v7 = vadd.f32 %v3946_v4, %v3834_v60  ;;  %v4118_v8 = vadd.f32 %v3987_v5, %v3836_v59  ;;  %v3948_v9 = vpop.f32.mrb[122].mxu0  ;;  %v3989_v11 = vpop.f32.mrb[122].mxu1 }
 0x3b8   : > { %v3949_v12 = vpop.f32.mrb[123].mxu0  ;;  %v3990_v13 = vpop.f32.mrb[123].mxu1 }
 0x3bd   : > { %v4026_v32 = vpop.f32.mrb[124].mxu0  ;;  %v4067_v15 = vpop.f32.mrb[124].mxu1 }
 0x3be   : > { %v4119_v16 = vadd.f32 %v4026_v32, %v3837_v46  ;;  %v4121_v53 = vadd.f32 %v4067_v15, %v3839_v41  ;;  %v4028_v17 = vpop.f32.mrb[125].mxu0  ;;  %v4069_v23 = vpop.f32.mrb[125].mxu1 }
 0x3bf   : > { %v4120_v26 = vadd.f32 %v4028_v17, %v3838_v21  ;;  %v4122_v33 = vadd.f32 %v4069_v23, %v3840_v42  ;;  %v4030_v35 = vpop.f32.mrb[126].mxu0  ;;  %v4071_v36 = vpop.f32.mrb[126].mxu1 }
 0x3c0   : > { %v4031_v58 = vpop.f32.mrb[127].mxu0  ;;  %v4072_v19 = vpop.f32.mrb[127].mxu1 }
 0x3c5   : > { %v4108_v31 = vpop.f32.mrb[128].mxu0  ;;  %v4224_v45 = vpop.f32.mrb[128].mxu1 }
 0x3c6   : > { %v4123_v60 = vadd.f32 %v4108_v31, %v3841_v27  ;;  %v4395_v49 = vadd.f32 %v4224_v45, %v4115_v48  ;;  %v4110_v40 = vpop.f32.mrb[129].mxu0  ;;  %v4226_v51 = vpop.f32.mrb[129].mxu1 }
 0x3c7   : > { %v4124_v61 = vadd.f32 %v4110_v40, %v3842_v44  ;;  %v4396_v37 = vadd.f32 %v4226_v51, %v4116_v7  ;;  %v4112_v38 = vpop.f32.mrb[130].mxu0  ;;  %v4228_v29 = vpop.f32.mrb[130].mxu1 }
 0x3c8   : > { %v4113_v46 = vpop.f32.mrb[131].mxu0  ;;  %v4229_v50 = vpop.f32.mrb[131].mxu1 }
 0x3cd   : > { %v4265_v59 = vpop.f32.mrb[132].mxu0  ;;  %v4306_v39 = vpop.f32.mrb[132].mxu1 }
 0x3ce   : > { %v4397_v21 = vadd.f32 %v4265_v59, %v4117_v3  ;;  %v4399_v18 = vadd.f32 %v4306_v39, %v4119_v16  ;;  %v4267_v52 = vpop.f32.mrb[133].mxu0  ;;  %v4308_v22 = vpop.f32.mrb[133].mxu1 }
 0x3cf   : > { %v4398_v24 = vadd.f32 %v4267_v52, %v4118_v8  ;;  %v4400_v0 = vadd.f32 %v4308_v22, %v4120_v26  ;;  %v4269_v41 = vpop.f32.mrb[134].mxu0  ;;  %v4310_v30 = vpop.f32.mrb[134].mxu1 }
 0x3d0   : > { %v4270_v27 = vpop.f32.mrb[135].mxu0  ;;  %v4311_v43 = vpop.f32.mrb[135].mxu1 }
 0x3d5   : > { %v4347_v42 = vpop.f32.mrb[136].mxu0  ;;  %v4388_v54 = vpop.f32.mrb[136].mxu1 }
 0x3d6   : > { %v4401_v44 = vadd.f32 %v4347_v42, %v4121_v53  ;;  %v4403_v56 = vadd.f32 %v4388_v54, %v4123_v60  ;;  %v4349_v57 = vpop.f32.mrb[137].mxu0  ;;  %v4390_v63 = vpop.f32.mrb[137].mxu1 }
 0x3d7   : > { %v4402_v1 = vadd.f32 %v4349_v57, %v4122_v33  ;;  %v4404_v47 = vadd.f32 %v4390_v63, %v4124_v61  ;;  %v4351_v48 = vpop.f32.mrb[138].mxu0  ;;  %v4392_v4 = vpop.f32.mrb[138].mxu1 }
 0x3d8   : > { %v4352_v3 = vpop.f32.mrb[139].mxu0  ;;  %v4393_v5 = vpop.f32.mrb[139].mxu1 }
 0x3dd   : > { %v4540_v7 = vpop.f32.mrb[140].mxu0  ;;  %v4581_v9 = vpop.f32.mrb[140].mxu1 }
 0x3de   : > { %v4711_v8 = vadd.f32 %v4540_v7, %v4395_v49  ;;  %v4713_v11 = vadd.f32 %v4581_v9, %v4397_v21  ;;  %v4542_v12 = vpop.f32.mrb[141].mxu0  ;;  %v4583_v13 = vpop.f32.mrb[141].mxu1 }
 0x3df   : > { %v4712_v32 = vadd.f32 %v4542_v12, %v4396_v37  ;;  %v4714_v15 = vadd.f32 %v4583_v13, %v4398_v24  ;;  %v4544_v16 = vpop.f32.mrb[142].mxu0  ;;  %v4585_v17 = vpop.f32.mrb[142].mxu1 }
 0x3e0   : > { %v4545_v53 = vpop.f32.mrb[143].mxu0  ;;  %v4586_v23 = vpop.f32.mrb[143].mxu1 }
 0x3e5   : > { %v4622_v26 = vpop.f32.mrb[144].mxu0  ;;  %v4663_v35 = vpop.f32.mrb[144].mxu1 }
 0x3e6   : > { %v4715_v33 = vadd.f32 %v4622_v26, %v4399_v18  ;;  %v4717_v36 = vadd.f32 %v4663_v35, %v4401_v44  ;;  %v4624_v58 = vpop.f32.mrb[145].mxu0  ;;  %v4665_v19 = vpop.f32.mrb[145].mxu1 }
 0x3e7   : > { %v4716_v31 = vadd.f32 %v4624_v58, %v4400_v0  ;;  %v4718_v45 = vadd.f32 %v4665_v19, %v4402_v1  ;;  %v4626_v60 = vpop.f32.mrb[146].mxu0  ;;  %v4667_v40 = vpop.f32.mrb[146].mxu1 }
 0x3e8   : > { %v4627_v49 = vpop.f32.mrb[147].mxu0  ;;  %v4668_v51 = vpop.f32.mrb[147].mxu1 }
 0x3ed   : > { %v4704_v61 = vpop.f32.mrb[148].mxu0  ;;  %v4822_v38 = vpop.f32.mrb[148].mxu1 }
 0x3ee   : > { %v4719_v37 = vadd.f32 %v4704_v61, %v4403_v56  ;;  %v4993_v29 = vadd.f32 %v4822_v38, %v4711_v8  ;;  %v4706_v46 = vpop.f32.mrb[149].mxu0  ;;  %v4824_v50 = vpop.f32.mrb[149].mxu1 }
 0x3ef   : > { %v4720_v59 = vadd.f32 %v4706_v46, %v4404_v47  ;;  %v4994_v39 = vadd.f32 %v4824_v50, %v4712_v32  ;;  %v4708_v21 = vpop.f32.mrb[150].mxu0  ;;  %v4826_v52 = vpop.f32.mrb[150].mxu1 }
 0x3f0   : > { %v4709_v18 = vpop.f32.mrb[151].mxu0  ;;  %v4827_v22 = vpop.f32.mrb[151].mxu1 }
 0x3f5   : > { %v4863_v24 = vpop.f32.mrb[152].mxu0  ;;  %v4904_v41 = vpop.f32.mrb[152].mxu1 }
 0x3f6   : > { %v4995_v0 = vadd.f32 %v4863_v24, %v4713_v11  ;;  %v4997_v30 = vadd.f32 %v4904_v41, %v4715_v33  ;;  %v4865_v27 = vpop.f32.mrb[153].mxu0  ;;  %v4906_v43 = vpop.f32.mrb[153].mxu1 }
 0x3f7   : > { %v4996_v42 = vadd.f32 %v4865_v27, %v4714_v15  ;;  %v4998_v54 = vadd.f32 %v4906_v43, %v4716_v31  ;;  %v4867_v44 = vpop.f32.mrb[154].mxu0  ;;  %v4908_v57 = vpop.f32.mrb[154].mxu1 }
 0x3f8   : > { %v4868_v56 = vpop.f32.mrb[155].mxu0  ;;  %v4909_v63 = vpop.f32.mrb[155].mxu1 }
 0x3fd   : > { %v4945_v1 = vpop.f32.mrb[156].mxu0  ;;  %v4986_v48 = vpop.f32.mrb[156].mxu1 }
 0x3fe   : > { %v4999_v47 = vadd.f32 %v4945_v1, %v4717_v36  ;;  %v5001_v4 = vadd.f32 %v4986_v48, %v4719_v37  ;;  %v4947_v3 = vpop.f32.mrb[157].mxu0  ;;  %v4988_v5 = vpop.f32.mrb[157].mxu1 }
 0x3ff   : > { %v5000_v7 = vadd.f32 %v4947_v3, %v4718_v45  ;;  %v5002_v9 = vadd.f32 %v4988_v5, %v4720_v59  ;;  %v4949_v8 = vpop.f32.mrb[158].mxu0  ;;  %v4990_v12 = vpop.f32.mrb[158].mxu1 }
 0x400   : > { %v4950_v11 = vpop.f32.mrb[159].mxu0  ;;  %v4991_v13 = vpop.f32.mrb[159].mxu1 }
 0x401   : > { %v7136_v59 = vpop.permute.xlu0 %5569 }
 0x405   : > { %v5104_v32 = vpop.f32.mrb[160].mxu0  ;;  %v5145_v16 = vpop.f32.mrb[160].mxu1 }
 0x406   : > { %v5275_v15 = vadd.f32 %v5104_v32, %v4993_v29  ;;  %v5277_v17 = vadd.f32 %v5145_v16, %v4995_v0  ;;  %v5106_v53 = vpop.f32.mrb[161].mxu0  ;;  %v5147_v23 = vpop.f32.mrb[161].mxu1 }
 0x407   : > { %v5276_v26 = vadd.f32 %v5106_v53, %v4994_v39  ;;  %v5278_v35 = vadd.f32 %v5147_v23, %v4996_v42  ;;  %v5108_v33 = vpop.f32.mrb[162].mxu0  ;;  %v5149_v58 = vpop.f32.mrb[162].mxu1 }
 0x408   : > { %v5109_v36 = vpop.f32.mrb[163].mxu0  ;;  %v5150_v19 = vpop.f32.mrb[163].mxu1 }
 0x40d   : > { %v5186_v31 = vpop.f32.mrb[164].mxu0  ;;  %v5227_v60 = vpop.f32.mrb[164].mxu1 }
 0x40e   : > { %v5279_v45 = vadd.f32 %v5186_v31, %v4997_v30  ;;  %v5281_v40 = vadd.f32 %v5227_v60, %v4999_v47  ;;  %v5188_v49 = vpop.f32.mrb[165].mxu0  ;;  %v5229_v51 = vpop.f32.mrb[165].mxu1 }
 0x40f   : > { %v5280_v61 = vadd.f32 %v5188_v49, %v4998_v54  ;;  %v5282_v38 = vadd.f32 %v5229_v51, %v5000_v7  ;;  %v5190_v37 = vpop.f32.mrb[166].mxu0  ;;  %v5231_v29 = vpop.f32.mrb[166].mxu1 }
 0x410   : > { %v5191_v46 = vpop.f32.mrb[167].mxu0  ;;  %v5232_v50 = vpop.f32.mrb[167].mxu1 }
 0x415   : > { %v5268_v39 = vpop.f32.mrb[168].mxu0  ;;  %v5386_v21 = vpop.f32.mrb[168].mxu1 }
 0x416   : > { %v5283_v52 = vadd.f32 %v5268_v39, %v5001_v4  ;;  %v5557_v18 = vadd.f32 %v5386_v21, %v5275_v15  ;;  %v5270_v22 = vpop.f32.mrb[169].mxu0  ;;  %v5388_v24 = vpop.f32.mrb[169].mxu1 }
 0x417   : > { %v5284_v41 = vadd.f32 %v5270_v22, %v5002_v9  ;;  %v5558_v0 = vadd.f32 %v5388_v24, %v5276_v26  ;;  %v5272_v30 = vpop.f32.mrb[170].mxu0  ;;  %v5390_v27 = vpop.f32.mrb[170].mxu1 }
 0x418   : > { %v5572_v43 = vadd.f32 %v7136_v59, %v5557_v18  ;;  %v5273_v42 = vpop.f32.mrb[171].mxu0  ;;  %v5391_v54 = vpop.f32.mrb[171].mxu1 }
 0x419   : > { %v5573_v44 = vadd.f32 %v7136_v59, %v5558_v0 }
 0x41a   : > { %v5582_v57 = vmax.f32 %v5572_v43, 0.0 }
 0x41b   : > { %v5583_v56 = vmax.f32 %v5573_v44, 0.0 }
 0x41c   : > { %v5592_v63 = vmul.f32 %v5582_v57, %v6570_v6 }
 0x41d   : > { %v5593_v1 = vmul.f32 %v5583_v56, %v6576_v10  ;;  %v5427_v48 = vpop.f32.mrb[172].mxu0  ;;  %v5468_v47 = vpop.f32.mrb[172].mxu1 }
 0x41e   : > { %5602 = vst [vmem:[%s7144_s28] sm:$0xff] %v5592_v63  ;;  %v5559_v4 = vadd.f32 %v5427_v48, %v5277_v17  ;;  %v5561_v3 = vadd.f32 %v5468_v47, %v5279_v45  ;;  %v5429_v5 = vpop.f32.mrb[173].mxu0  ;;  %v5470_v7 = vpop.f32.mrb[173].mxu1 }
 0x41f   : > { %5603 = vst [vmem:[%s7144_s28 + $0x8] sm:$0xff] %v5593_v1  ;;  %v5560_v9 = vadd.f32 %v5429_v5, %v5278_v35  ;;  %v5562_v8 = vadd.f32 %v5470_v7, %v5280_v61  ;;  %v5431_v12 = vpop.f32.mrb[174].mxu0  ;;  %v5472_v11 = vpop.f32.mrb[174].mxu1 }
 0x420   : > { %v5574_v13 = vadd.f32 %v7136_v59, %v5559_v4  ;;  %v5576_v32 = vadd.f32 %v7136_v59, %v5561_v3  ;;  %v5432_v6 = vpop.f32.mrb[175].mxu0  ;;  %v5473_v10 = vpop.f32.mrb[175].mxu1 }
 0x421   : > { %v5575_v16 = vadd.f32 %v7136_v59, %v5560_v9  ;;  %v5577_v15 = vadd.f32 %v7136_v59, %v5562_v8 }
 0x422   : > { %v5584_v17 = vmax.f32 %v5574_v13, 0.0  ;;  %v5586_v53 = vmax.f32 %v5576_v32, 0.0 }
 0x423   : > { %v5585_v23 = vmax.f32 %v5575_v16, 0.0  ;;  %v5587_v26 = vmax.f32 %v5577_v15, 0.0 }
 0x424   : > { %v5594_v35 = vmul.f32 %v5584_v17, %v6579_v20  ;;  %v5596_v33 = vmul.f32 %v5586_v53, %v6598_v25 }
 0x425   : > { %v5595_v58 = vmul.f32 %v5585_v23, %v6586_v34  ;;  %v5597_v36 = vmul.f32 %v5587_v26, %v6605_v28  ;;  %v5509_v19 = vpop.f32.mrb[176].mxu0  ;;  %v5550_v31 = vpop.f32.mrb[176].mxu1 }
 0x426   : > { %5604 = vst [vmem:[%s7144_s28 + $0x10] sm:$0xff] %v5594_v35  ;;  %5606 = vst [vmem:[%s7144_s28 + $0x20] sm:$0xff] %v5596_v33  ;;  %v5563_v60 = vadd.f32 %v5509_v19, %v5281_v40  ;;  %v5565_v45 = vadd.f32 %v5550_v31, %v5283_v52  ;;  %v5511_v49 = vpop.f32.mrb[177].mxu0  ;;  %v5552_v51 = vpop.f32.mrb[177].mxu1 }
 0x427   : > { %5605 = vst [vmem:[%s7144_s28 + $0x18] sm:$0xff] %v5595_v58  ;;  %5607 = vst [vmem:[%s7144_s28 + $0x28] sm:$0xff] %v5597_v36  ;;  %v5564_v61 = vadd.f32 %v5511_v49, %v5282_v38  ;;  %v5566_v37 = vadd.f32 %v5552_v51, %v5284_v41  ;;  %v5513_v29 = vpop.f32.mrb[178].mxu0  ;;  %v5554_v20 = vpop.f32.mrb[178].mxu1 }
 0x428   : > { %v5578_v34 = vadd.f32 %v7136_v59, %v5563_v60  ;;  %v5580_v25 = vadd.f32 %v7136_v59, %v5565_v45  ;;  %v5514_v28 = vpop.f32.mrb[179].mxu0  ;;  %v5555_v46 = vpop.f32.mrb[179].mxu1 }
 0x429   : > { %v5579_v40 = vadd.f32 %v7136_v59, %v5564_v61  ;;  %v5581_v50 = vadd.f32 %v7136_v59, %v5566_v37 }
 0x42a   : > { %v5588_v39 = vmax.f32 %v5578_v34, 0.0  ;;  %v5590_v21 = vmax.f32 %v5580_v25, 0.0 }
 0x42b   : > { %v5589_v38 = vmax.f32 %v5579_v40, 0.0  ;;  %v5591_v52 = vmax.f32 %v5581_v50, 0.0 }
 0x42c   : > { %v5598_v18 = vmul.f32 %v5588_v39, %v6616_v62  ;;  %v5600_v22 = vmul.f32 %v5590_v21, %v6637_v14 }
 0x42d   : > { %v5599_v24 = vmul.f32 %v5589_v38, %v6622_v2  ;;  %v5601_v41 = vmul.f32 %v5591_v52, %v6645_v55 }
 0x42e   : > { %5608 = vst [vmem:[%s7144_s28 + $0x30] sm:$0xff] %v5598_v18  ;;  %5610 = vst [vmem:[%s7144_s28 + $0x40] sm:$0xff] %v5600_v22 }
 0x42f   : > { %5609 = vst [vmem:[%s7144_s28 + $0x38] sm:$0xff] %v5599_v24  ;;  %5611 = vst [vmem:[%s7144_s28 + $0x48] sm:$0xff] %v5601_v41 }
 0x430 PF: > { %s16_s21 = sadd.s32 1, %s6016_s21  }
 0x431   : > { %p13_p4 = scmp.ge.s32.totalorder %s16_s21, 4  }
 0x433   :  { %15 = sbr.rel (!%p13_p4) target bundleno = 1 (0x1), region = 90 }

</bundles_post_ra>
